<compile_context>
chip_gen: v5e
topology: v5e:2x2
jax: 0.10.0
libtpu: 0.0.40
codegen_flags: <defaults>
</compile_context>

<pallas_src>
import functools

import jax
import jax.numpy as jnp
import numpy as np
from jax.experimental import pallas as pl
from jax.experimental.pallas import tpu as pltpu


# ------------------------- fused Pallas kernel -------------------------

def _dqn_fused_kernel(p1_ref, w1_ref, b1_ref, w2_ref, b2_ref,
                      bh_ref, bzv_ref, bza_ref,
                      wh_hbm, wzv_hbm, wza_hbm,
                      q_ref,
                      y1_s, wh_s, wzv_s, wza_s, sem,
                      *, atoms):
    B = q_ref.shape[0]
    c1 = w1_ref.shape[1]                 # conv1 out channels (32)
    c2 = w2_ref.shape[1]                 # conv2 out channels (64)
    n_pos = w2_ref.shape[0] // c1        # 25 conv1 positions per conv2 window
    mp = y1_s.shape[0] // n_pos          # padded rows per position group (24)
    n_sp = wh_s.shape[0] // c2           # 9 conv2 spatial positions
    hidden = wh_s.shape[1] // 2          # 32
    ap = wzv_s.shape[1]                  # padded atoms per action (128)
    n_act = wza_s.shape[1] // ap         # 6

    # ---- kick off head-weight DMAs (HBM -> VMEM); they hide under conv compute ----
    cp_wh = pltpu.make_async_copy(wh_hbm, wh_s, sem.at[0]); cp_wh.start()
    cp_wzv = pltpu.make_async_copy(wzv_hbm, wzv_s, sem.at[1]); cp_wzv.start()
    cp_wza = pltpu.make_async_copy(wza_hbm, wza_s, sem.at[2]); cp_wza.start()

    # ---- conv1 (k=s=5) as ONE deep im2col matmul + bias + ReLU -> VMEM scratch ----
    y1_s[...] = jnp.maximum(
        jnp.dot(p1_ref[...], w1_ref[...], preferred_element_type=jnp.float32)
        + b1_ref[...], 0.0)

    # ---- conv2 (k=s=5): K-split accumulation over 25 aligned position groups ----
    # (replaces the former 25 misaligned VMEM copies + deep-matmul repack)
    y2 = b2_ref[...]                                          # (1, c2) broadcasts
    for p in range(n_pos):
        y2 = y2 + jnp.dot(
            y1_s[p * mp:(p + 1) * mp, :].astype(jnp.bfloat16),
            w2_ref[p * c1:(p + 1) * c1, :],
            preferred_element_type=jnp.float32)
    y2 = jnp.maximum(y2, 0.0)                                 # (mp, c2); rows >= n_sp*B pad

    # ---- dueling hidden layer: flatten folded into an accumulation over spatial s ----
    cp_wh.wait()
    h = bh_ref[...]                                           # (1, 2H) broadcasts
    for s in range(n_sp):
        h = h + jnp.dot(
            y2[s * B:(s + 1) * B, :].astype(jnp.bfloat16),
            wh_s[s * c2:(s + 1) * c2, :],
            preferred_element_type=jnp.float32)
    h = jnp.maximum(h, 0.0)                                   # (B, 2H)
    hv = h[:, :hidden].astype(jnp.bfloat16)
    ha = h[:, hidden:].astype(jnp.bfloat16)

    # ---- value / advantage streams (atoms padded to 128 lanes per action) ----
    cp_wzv.wait()
    cp_wza.wait()
    v = jnp.dot(hv, wzv_s[...], preferred_element_type=jnp.float32) + bzv_ref[...]   # (B, ap)
    a = jnp.dot(ha, wza_s[...], preferred_element_type=jnp.float32) + bza_ref[...]   # (B, n_act*ap)

    # mean over actions via lane-aligned 128-wide blocks
    a_sum = a[:, 0:ap]
    for j in range(1, n_act):
        a_sum = a_sum + a[:, j * ap:(j + 1) * ap]
    base = v - a_sum * (1.0 / n_act)

    # dueling combine + masked softmax over real atoms; aligned lane-dense stores
    mask = jax.lax.broadcasted_iota(jnp.int32, (B, ap), 1) < atoms
    neg = jnp.float32(-1e30)
    for j in range(n_act):
        logits = jnp.where(mask, base + a[:, j * ap:(j + 1) * ap], neg)
        m = jnp.max(logits, axis=-1, keepdims=True)
        e = jnp.exp(logits - m)                               # padded lanes -> 0
        z = jnp.sum(e, axis=-1, keepdims=True)
        q_ref[:, j * ap:(j + 1) * ap] = e / z                 # exact normalization


def _fullspec(shape):
    nd = len(shape)
    return pl.BlockSpec(shape, lambda i: (0,) * nd)


def dqn_forward(x, kp, atoms):
    """DQN.forward(x, log=False) for the 'data-efficient' architecture."""
    B, C, H, W = x.shape
    h1o = (H - 5) // 5 + 1                  # 16
    w1o = (W - 5) // 5 + 1                  # 16
    h2o = (h1o - 5) // 5 + 1                # 3
    w2o = (w1o - 5) // 5 + 1                # 3
    n_sp = h2o * w2o                        # 9
    m2 = n_sp * B                           # conv2 output rows (18)
    mp = ((m2 + 7) // 8) * 8                # padded to 8-sublane boundary (24)

    # Host-side conv1 im2col (only op outside the kernel). Rows grouped by the
    # conv2-window position p = (kh1, kw1); each group zero-padded to mp rows so the
    # in-kernel K-split slices are sublane-aligned. Row order within a group:
    # (ho, wo, b); col order: (c, kh0, kw0).
    xc = x[:, :, :h2o * 25, :w2o * 25].reshape(B, C, h2o, 5, 5, w2o, 5, 5)
    p1 = xc.transpose(3, 6, 2, 5, 0, 1, 4, 7).reshape(25, m2, C * 25)
    p1 = jnp.pad(p1, ((0, 0), (0, mp - m2), (0, 0)))
    p1 = p1.reshape(25 * mp, C * 25).astype(jnp.bfloat16)

    c1 = kp['w1'].shape[1]                  # 32
    n_pos = kp['w2'].shape[0] // c1         # 25
    ap = kp['wzv'].shape[1]                 # 128 (padded atoms)
    a_cols = kp['wza'].shape[1]             # n_act * 128
    n_act = a_cols // ap

    vmem_args = (p1, kp['w1'], kp['b1'], kp['w2'], kp['b2'],
                 kp['bh'], kp['bzv'], kp['bza'])
    any_args = (kp['wh'], kp['wzv'], kp['wza'])   # manually DMA'd inside the kernel

    kernel = functools.partial(_dqn_fused_kernel, atoms=atoms)
    q2d = pl.pallas_call(
        kernel,
        out_shape=jax.ShapeDtypeStruct((B, a_cols), jnp.float32),
        grid=(1,),
        in_specs=[_fullspec(a.shape) for a in vmem_args]
                + [pl.BlockSpec(memory_space=pl.ANY)] * len(any_args),
        out_specs=_fullspec((B, a_cols)),
        scratch_shapes=[
            pltpu.VMEM((n_pos * mp, c1), jnp.float32),        # y1 (conv1 output)
            pltpu.VMEM(kp['wh'].shape, jnp.bfloat16),         # wh landing buffer
            pltpu.VMEM(kp['wzv'].shape, jnp.bfloat16),        # wzv landing buffer
            pltpu.VMEM(kp['wza'].shape, jnp.bfloat16),        # wza landing buffer
            pltpu.SemaphoreType.DMA((3,)),
        ],
        compiler_params=pltpu.CompilerParams(
            dimension_semantics=("arbitrary",)),
    )(*vmem_args, *any_args)
    return q2d.reshape(B, n_act, ap)[:, :, :atoms]


# ------------------------- deterministic params -------------------------

def init_params(key, history_length, hidden, atoms, action_space, atoms_pad=128):
    C = history_length
    conv_out = 576
    n_c2, n_sp = 64, 9
    ap = atoms_pad
    keys = jax.random.split(key, 12)
    W1 = jax.random.normal(keys[0], (32, C, 5, 5), jnp.float32) / np.sqrt(C * 25)
    b1 = jax.random.normal(keys[1], (32,), jnp.float32) * 0.01
    W2 = jax.random.normal(keys[2], (64, 32, 5, 5), jnp.float32) / np.sqrt(32 * 25)
    b2 = jax.random.normal(keys[3], (64,), jnp.float32) * 0.01
    Whv = jax.random.normal(keys[4], (hidden, conv_out), jnp.float32) / np.sqrt(conv_out)
    bhv = jax.random.normal(keys[5], (hidden,), jnp.float32) * 0.01
    Wha = jax.random.normal(keys[6], (hidden, conv_out), jnp.float32) / np.sqrt(conv_out)
    bha = jax.random.normal(keys[7], (hidden,), jnp.float32) * 0.01
    Wzv = jax.random.normal(keys[8], (atoms, hidden), jnp.float32) / np.sqrt(hidden)
    bzv = jax.random.normal(keys[9], (atoms,), jnp.float32) * 0.01
    Wza = jax.random.normal(keys[10], (action_space * atoms, hidden), jnp.float32) / np.sqrt(hidden)
    bza = jax.random.normal(keys[11], (action_space * atoms,), jnp.float32) * 0.01

    pt = dict(W1=W1, b1=b1, W2=W2, b2=b2, Whv=Whv, bhv=bhv, Wha=Wha, bha=bha,
              Wzv=Wzv, bzv=bzv, Wza=Wza, bza=bza)

    # Permute head weights to consume features in (spatial, channel) flatten order
    # (PyTorch flatten order is (channel, spatial)).
    def perm_head(Wfc):  # (hidden, 576) -> (576, hidden), row = s*64 + c2
        return Wfc.reshape(hidden, n_c2, n_sp).transpose(2, 1, 0).reshape(conv_out, hidden)

    # z-layer weights/biases padded per action block from `atoms` to `ap` lanes.
    wza_p = jnp.pad(Wza.T.reshape(hidden, action_space, atoms),
                    ((0, 0), (0, 0), (0, ap - atoms)))
    bza_p = jnp.pad(bza.reshape(action_space, atoms), ((0, 0), (0, ap - atoms)))

    kp = dict(
        w1=W1.reshape(32, C * 25).T.astype(jnp.bfloat16),            # (C*25, 32)
        b1=b1.reshape(1, 32),
        w2=W2.transpose(2, 3, 1, 0).reshape(25 * 32, 64).astype(jnp.bfloat16),  # rows (kh1,kw1,c1)
        b2=b2.reshape(1, 64),
        wh=jnp.concatenate([perm_head(Whv), perm_head(Wha)], axis=1).astype(jnp.bfloat16),  # (576, 2H)
        bh=jnp.concatenate([bhv, bha]).reshape(1, 2 * hidden),
        wzv=jnp.pad(Wzv.T, ((0, 0), (0, ap - atoms))).astype(jnp.bfloat16),     # (H, ap)
        bzv=jnp.pad(bzv, (0, ap - atoms)).reshape(1, ap),
        wza=wza_p.reshape(hidden, action_space * ap).astype(jnp.bfloat16),      # (H, A*ap)
        bza=bza_p.reshape(1, action_space * ap),
    )
    return pt, kp


# ------------------------- pure-JAX reference -------------------------

def reference_forward(x, pt, atoms, action_space):
    dn = ('NCHW', 'OIHW', 'NCHW')
    prec = jax.lax.Precision.HIGHEST
    y = jax.lax.conv_general_dilated(x, pt['W1'], (5, 5), 'VALID',
                                     dimension_numbers=dn, precision=prec)
    y = jax.nn.relu(y + pt['b1'][None, :, None, None])
    y = jax.lax.conv_general_dilated(y, pt['W2'], (5, 5), 'VALID',
                                     dimension_numbers=dn, precision=prec)
    y = jax.nn.relu(y + pt['b2'][None, :, None, None])
    f = y.reshape(y.shape[0], -1)                                   # (B, 576)
    with jax.default_matmul_precision('highest'):
        hv = jax.nn.relu(f @ pt['Whv'].T + pt['bhv'])
        ha = jax.nn.relu(f @ pt['Wha'].T + pt['bha'])
        v = hv @ pt['Wzv'].T + pt['bzv']
        a = ha @ pt['Wza'].T + pt['bza']
    v = v.reshape(-1, 1, atoms)
    a = a.reshape(-1, action_space, atoms)
    q = v + a - a.mean(1, keepdims=True)
    return jax.nn.softmax(q, axis=2)


# ------------------------- main -------------------------

if __name__ == "__main__":
    cfg = dict(architecture='data-efficient', history_length=4,
               hidden_size=32, atoms=51, noisy_std=0.1)
    action_space = 6
    B = 2

    key = jax.random.PRNGKey(0)
    k_x, k_p = jax.random.split(key)
    # data-efficient architecture implies 84x84 Atari frames (-> conv_output_size 576)
    x = jax.random.normal(k_x, (B, cfg['history_length'], 84, 84), jnp.float32)
    pt, kp = init_params(k_p, cfg['history_length'], cfg['hidden_size'],
                         cfg['atoms'], action_space)

    dqn_fwd = jax.jit(dqn_forward, static_argnames=('atoms',))
    q = jax.block_until_ready(dqn_fwd(x, kp, atoms=cfg['atoms']))

    assert q.shape == (B, action_space, cfg['atoms'])
    ref = jax.block_until_ready(reference_forward(x, pt, cfg['atoms'], action_space))
    np.testing.assert_allclose(np.asarray(q), np.asarray(ref), atol=2e-2, rtol=0)
    np.testing.assert_allclose(np.asarray(q).sum(-1), 1.0, atol=2e-3)

    print("KERNEL_OK")
</pallas_src>

<mosaic_0001>
module attributes {stable_mosaic.version = 11 : i64} {
  func.func @_dqn_fused_kernel(%arg0: i32, %arg1: memref<600x100xbf16, #tpu.memory_space<vmem>>, %arg2: memref<100x32xbf16, #tpu.memory_space<vmem>>, %arg3: memref<1x32xf32, #tpu.memory_space<vmem>>, %arg4: memref<800x64xbf16, #tpu.memory_space<vmem>>, %arg5: memref<1x64xf32, #tpu.memory_space<vmem>>, %arg6: memref<1x64xf32, #tpu.memory_space<vmem>>, %arg7: memref<1x128xf32, #tpu.memory_space<vmem>>, %arg8: memref<1x768xf32, #tpu.memory_space<vmem>>, %arg9: memref<576x64xbf16, #tpu.memory_space<any>>, %arg10: memref<32x128xbf16, #tpu.memory_space<any>>, %arg11: memref<32x768xbf16, #tpu.memory_space<any>>, %arg12: memref<2x768xf32, #tpu.memory_space<vmem>>, %arg13: memref<600x32xf32, #tpu.memory_space<vmem>>, %arg14: memref<576x64xbf16, #tpu.memory_space<vmem>>, %arg15: memref<32x128xbf16, #tpu.memory_space<vmem>>, %arg16: memref<32x768xbf16, #tpu.memory_space<vmem>>, %arg17: memref<3x!tpu.dma_semaphore, #tpu.memory_space<semaphore_mem>>) attributes {dimension_semantics = [#tpu.dimension_semantics<arbitrary>], iteration_bounds = array<i64: 1>, scalar_prefetch = 0 : i64, scratch_operands = 5 : i64, tpu.core_type = #tpu.core_type<tc>, window_params = [{pipeline_mode = #tpu.pipeline_mode<synchronous>, transform_indices = @transform_0, window_bounds = array<i64: 600, 100>}, {pipeline_mode = #tpu.pipeline_mode<synchronous>, transform_indices = @transform_1, window_bounds = array<i64: 100, 32>}, {pipeline_mode = #tpu.pipeline_mode<synchronous>, transform_indices = @transform_2, window_bounds = array<i64: 1, 32>}, {pipeline_mode = #tpu.pipeline_mode<synchronous>, transform_indices = @transform_3, window_bounds = array<i64: 800, 64>}, {pipeline_mode = #tpu.pipeline_mode<synchronous>, transform_indices = @transform_4, window_bounds = array<i64: 1, 64>}, {pipeline_mode = #tpu.pipeline_mode<synchronous>, transform_indices = @transform_5, window_bounds = array<i64: 1, 64>}, {pipeline_mode = #tpu.pipeline_mode<synchronous>, transform_indices = @transform_6, window_bounds = array<i64: 1, 128>}, {pipeline_mode = #tpu.pipeline_mode<synchronous>, transform_indices = @transform_7, window_bounds = array<i64: 1, 768>}, {}, {}, {}, {pipeline_mode = #tpu.pipeline_mode<synchronous>, transform_indices = @transform_11, window_bounds = array<i64: 2, 768>}]} {
    %c0_i32 = arith.constant 0 : i32
    %0 = tpu.memref_slice %arg17[%c0_i32] : memref<3x!tpu.dma_semaphore, #tpu.memory_space<semaphore_mem>> -> memref<1x!tpu.dma_semaphore, #tpu.memory_space<semaphore_mem>>
    %1 = tpu.memref_squeeze %0 : memref<1x!tpu.dma_semaphore, #tpu.memory_space<semaphore_mem>> -> memref<!tpu.dma_semaphore, #tpu.memory_space<semaphore_mem>>
    tpu.enqueue_dma source(%arg9 : memref<576x64xbf16, #tpu.memory_space<any>>) target(%arg14 : memref<576x64xbf16, #tpu.memory_space<vmem>>) target_semaphore(%1 : memref<!tpu.dma_semaphore, #tpu.memory_space<semaphore_mem>>)
    %c1_i32 = arith.constant 1 : i32
    %2 = tpu.memref_slice %arg17[%c1_i32] : memref<3x!tpu.dma_semaphore, #tpu.memory_space<semaphore_mem>> -> memref<1x!tpu.dma_semaphore, #tpu.memory_space<semaphore_mem>>
    %3 = tpu.memref_squeeze %2 : memref<1x!tpu.dma_semaphore, #tpu.memory_space<semaphore_mem>> -> memref<!tpu.dma_semaphore, #tpu.memory_space<semaphore_mem>>
    tpu.enqueue_dma source(%arg10 : memref<32x128xbf16, #tpu.memory_space<any>>) target(%arg15 : memref<32x128xbf16, #tpu.memory_space<vmem>>) target_semaphore(%3 : memref<!tpu.dma_semaphore, #tpu.memory_space<semaphore_mem>>)
    %c2_i32 = arith.constant 2 : i32
    %4 = tpu.memref_slice %arg17[%c2_i32] : memref<3x!tpu.dma_semaphore, #tpu.memory_space<semaphore_mem>> -> memref<1x!tpu.dma_semaphore, #tpu.memory_space<semaphore_mem>>
    %5 = tpu.memref_squeeze %4 : memref<1x!tpu.dma_semaphore, #tpu.memory_space<semaphore_mem>> -> memref<!tpu.dma_semaphore, #tpu.memory_space<semaphore_mem>>
    tpu.enqueue_dma source(%arg11 : memref<32x768xbf16, #tpu.memory_space<any>>) target(%arg16 : memref<32x768xbf16, #tpu.memory_space<vmem>>) target_semaphore(%5 : memref<!tpu.dma_semaphore, #tpu.memory_space<semaphore_mem>>)
    %c0 = arith.constant 0 : index
    %c0_0 = arith.constant 0 : index
    %6 = vector.load %arg1[%c0, %c0_0] : memref<600x100xbf16, #tpu.memory_space<vmem>>, vector<600x100xbf16>
    %c0_1 = arith.constant 0 : index
    %c0_2 = arith.constant 0 : index
    %7 = vector.load %arg2[%c0_1, %c0_2] : memref<100x32xbf16, #tpu.memory_space<vmem>>, vector<100x32xbf16>
    %cst = arith.constant dense<0.000000e+00> : vector<600x32xf32>
    %8 = tpu.matmul %6, %7, %cst {dimension_numbers = #tpu.dot_dimension_numbers<[1], [0], [0], [1], [0, 0, 1, 1], [], []>} : vector<600x100xbf16>, vector<100x32xbf16>, vector<600x32xf32> -> vector<600x32xf32>
    %c0_3 = arith.constant 0 : index
    %c0_4 = arith.constant 0 : index
    %9 = vector.load %arg3[%c0_3, %c0_4] : memref<1x32xf32, #tpu.memory_space<vmem>>, vector<1x32xf32>
    %10 = vector.broadcast %9 : vector<1x32xf32> to vector<600x32xf32>
    %11 = arith.addf %8, %10 : vector<600x32xf32>
    %cst_5 = arith.constant 0.000000e+00 : f32
    %12 = vector.broadcast %cst_5 : f32 to vector<600x32xf32>
    %13 = arith.maximumf %11, %12 : vector<600x32xf32>
    %c0_6 = arith.constant 0 : index
    %c0_7 = arith.constant 0 : index
    %14 = vector.load %arg13[%c0_6, %c0_7] : memref<600x32xf32, #tpu.memory_space<vmem>>, vector<600x32xf32>
    tpu.vector_store %arg13[%c0_6, %c0_7], %13 {strides = array<i32>} : memref<600x32xf32, #tpu.memory_space<vmem>>, vector<600x32xf32>,
    %c0_8 = arith.constant 0 : index
    %c0_9 = arith.constant 0 : index
    %15 = vector.load %arg5[%c0_8, %c0_9] : memref<1x64xf32, #tpu.memory_space<vmem>>, vector<1x64xf32>
    %c0_10 = arith.constant 0 : index
    %c0_11 = arith.constant 0 : index
    %16 = vector.load %arg13[%c0_10, %c0_11] : memref<600x32xf32, #tpu.memory_space<vmem>>, vector<24x32xf32>
    %17 = arith.truncf %16 : vector<24x32xf32> to vector<24x32xbf16>
    %c0_12 = arith.constant 0 : index
    %c0_13 = arith.constant 0 : index
    %18 = vector.load %arg4[%c0_12, %c0_13] : memref<800x64xbf16, #tpu.memory_space<vmem>>, vector<32x64xbf16>
    %cst_14 = arith.constant dense<0.000000e+00> : vector<24x64xf32>
    %19 = tpu.matmul %17, %18, %cst_14 {dimension_numbers = #tpu.dot_dimension_numbers<[1], [0], [0], [1], [0, 0, 1, 1], [], []>} : vector<24x32xbf16>, vector<32x64xbf16>, vector<24x64xf32> -> vector<24x64xf32>
    %20 = vector.broadcast %15 : vector<1x64xf32> to vector<24x64xf32>
    %21 = arith.addf %20, %19 : vector<24x64xf32>
    %c24 = arith.constant 24 : index
    %c0_15 = arith.constant 0 : index
    %22 = vector.load %arg13[%c24, %c0_15] : memref<600x32xf32, #tpu.memory_space<vmem>>, vector<24x32xf32>
    %23 = arith.truncf %22 : vector<24x32xf32> to vector<24x32xbf16>
    %c32 = arith.constant 32 : index
    %c0_16 = arith.constant 0 : index
    %24 = vector.load %arg4[%c32, %c0_16] : memref<800x64xbf16, #tpu.memory_space<vmem>>, vector<32x64xbf16>
    %cst_17 = arith.constant dense<0.000000e+00> : vector<24x64xf32>
    %25 = tpu.matmul %23, %24, %cst_17 {dimension_numbers = #tpu.dot_dimension_numbers<[1], [0], [0], [1], [0, 0, 1, 1], [], []>} : vector<24x32xbf16>, vector<32x64xbf16>, vector<24x64xf32> -> vector<24x64xf32>
    %26 = arith.addf %21, %25 : vector<24x64xf32>
    %c48 = arith.constant 48 : index
    %c0_18 = arith.constant 0 : index
    %27 = vector.load %arg13[%c48, %c0_18] : memref<600x32xf32, #tpu.memory_space<vmem>>, vector<24x32xf32>
    %28 = arith.truncf %27 : vector<24x32xf32> to vector<24x32xbf16>
    %c64 = arith.constant 64 : index
    %c0_19 = arith.constant 0 : index
    %29 = vector.load %arg4[%c64, %c0_19] : memref<800x64xbf16, #tpu.memory_space<vmem>>, vector<32x64xbf16>
    %cst_20 = arith.constant dense<0.000000e+00> : vector<24x64xf32>
    %30 = tpu.matmul %28, %29, %cst_20 {dimension_numbers = #tpu.dot_dimension_numbers<[1], [0], [0], [1], [0, 0, 1, 1], [], []>} : vector<24x32xbf16>, vector<32x64xbf16>, vector<24x64xf32> -> vector<24x64xf32>
    %31 = arith.addf %26, %30 : vector<24x64xf32>
    %c72 = arith.constant 72 : index
    %c0_21 = arith.constant 0 : index
    %32 = vector.load %arg13[%c72, %c0_21] : memref<600x32xf32, #tpu.memory_space<vmem>>, vector<24x32xf32>
    %33 = arith.truncf %32 : vector<24x32xf32> to vector<24x32xbf16>
    %c96 = arith.constant 96 : index
    %c0_22 = arith.constant 0 : index
    %34 = vector.load %arg4[%c96, %c0_22] : memref<800x64xbf16, #tpu.memory_space<vmem>>, vector<32x64xbf16>
    %cst_23 = arith.constant dense<0.000000e+00> : vector<24x64xf32>
    %35 = tpu.matmul %33, %34, %cst_23 {dimension_numbers = #tpu.dot_dimension_numbers<[1], [0], [0], [1], [0, 0, 1, 1], [], []>} : vector<24x32xbf16>, vector<32x64xbf16>, vector<24x64xf32> -> vector<24x64xf32>
    %36 = arith.addf %31, %35 : vector<24x64xf32>
    %c96_24 = arith.constant 96 : index
    %c0_25 = arith.constant 0 : index
    %37 = vector.load %arg13[%c96_24, %c0_25] : memref<600x32xf32, #tpu.memory_space<vmem>>, vector<24x32xf32>
    %38 = arith.truncf %37 : vector<24x32xf32> to vector<24x32xbf16>
    %c128 = arith.constant 128 : index
    %c0_26 = arith.constant 0 : index
    %39 = vector.load %arg4[%c128, %c0_26] : memref<800x64xbf16, #tpu.memory_space<vmem>>, vector<32x64xbf16>
    %cst_27 = arith.constant dense<0.000000e+00> : vector<24x64xf32>
    %40 = tpu.matmul %38, %39, %cst_27 {dimension_numbers = #tpu.dot_dimension_numbers<[1], [0], [0], [1], [0, 0, 1, 1], [], []>} : vector<24x32xbf16>, vector<32x64xbf16>, vector<24x64xf32> -> vector<24x64xf32>
    %41 = arith.addf %36, %40 : vector<24x64xf32>
    %c120 = arith.constant 120 : index
    %c0_28 = arith.constant 0 : index
    %42 = vector.load %arg13[%c120, %c0_28] : memref<600x32xf32, #tpu.memory_space<vmem>>, vector<24x32xf32>
    %43 = arith.truncf %42 : vector<24x32xf32> to vector<24x32xbf16>
    %c160 = arith.constant 160 : index
    %c0_29 = arith.constant 0 : index
    %44 = vector.load %arg4[%c160, %c0_29] : memref<800x64xbf16, #tpu.memory_space<vmem>>, vector<32x64xbf16>
    %cst_30 = arith.constant dense<0.000000e+00> : vector<24x64xf32>
    %45 = tpu.matmul %43, %44, %cst_30 {dimension_numbers = #tpu.dot_dimension_numbers<[1], [0], [0], [1], [0, 0, 1, 1], [], []>} : vector<24x32xbf16>, vector<32x64xbf16>, vector<24x64xf32> -> vector<24x64xf32>
    %46 = arith.addf %41, %45 : vector<24x64xf32>
    %c144 = arith.constant 144 : index
    %c0_31 = arith.constant 0 : index
    %47 = vector.load %arg13[%c144, %c0_31] : memref<600x32xf32, #tpu.memory_space<vmem>>, vector<24x32xf32>
    %48 = arith.truncf %47 : vector<24x32xf32> to vector<24x32xbf16>
    %c192 = arith.constant 192 : index
    %c0_32 = arith.constant 0 : index
    %49 = vector.load %arg4[%c192, %c0_32] : memref<800x64xbf16, #tpu.memory_space<vmem>>, vector<32x64xbf16>
    %cst_33 = arith.constant dense<0.000000e+00> : vector<24x64xf32>
    %50 = tpu.matmul %48, %49, %cst_33 {dimension_numbers = #tpu.dot_dimension_numbers<[1], [0], [0], [1], [0, 0, 1, 1], [], []>} : vector<24x32xbf16>, vector<32x64xbf16>, vector<24x64xf32> -> vector<24x64xf32>
    %51 = arith.addf %46, %50 : vector<24x64xf32>
    %c168 = arith.constant 168 : index
    %c0_34 = arith.constant 0 : index
    %52 = vector.load %arg13[%c168, %c0_34] : memref<600x32xf32, #tpu.memory_space<vmem>>, vector<24x32xf32>
    %53 = arith.truncf %52 : vector<24x32xf32> to vector<24x32xbf16>
    %c224 = arith.constant 224 : index
    %c0_35 = arith.constant 0 : index
    %54 = vector.load %arg4[%c224, %c0_35] : memref<800x64xbf16, #tpu.memory_space<vmem>>, vector<32x64xbf16>
    %cst_36 = arith.constant dense<0.000000e+00> : vector<24x64xf32>
    %55 = tpu.matmul %53, %54, %cst_36 {dimension_numbers = #tpu.dot_dimension_numbers<[1], [0], [0], [1], [0, 0, 1, 1], [], []>} : vector<24x32xbf16>, vector<32x64xbf16>, vector<24x64xf32> -> vector<24x64xf32>
    %56 = arith.addf %51, %55 : vector<24x64xf32>
    %c192_37 = arith.constant 192 : index
    %c0_38 = arith.constant 0 : index
    %57 = vector.load %arg13[%c192_37, %c0_38] : memref<600x32xf32, #tpu.memory_space<vmem>>, vector<24x32xf32>
    %58 = arith.truncf %57 : vector<24x32xf32> to vector<24x32xbf16>
    %c256 = arith.constant 256 : index
    %c0_39 = arith.constant 0 : index
    %59 = vector.load %arg4[%c256, %c0_39] : memref<800x64xbf16, #tpu.memory_space<vmem>>, vector<32x64xbf16>
    %cst_40 = arith.constant dense<0.000000e+00> : vector<24x64xf32>
    %60 = tpu.matmul %58, %59, %cst_40 {dimension_numbers = #tpu.dot_dimension_numbers<[1], [0], [0], [1], [0, 0, 1, 1], [], []>} : vector<24x32xbf16>, vector<32x64xbf16>, vector<24x64xf32> -> vector<24x64xf32>
    %61 = arith.addf %56, %60 : vector<24x64xf32>
    %c216 = arith.constant 216 : index
    %c0_41 = arith.constant 0 : index
    %62 = vector.load %arg13[%c216, %c0_41] : memref<600x32xf32, #tpu.memory_space<vmem>>, vector<24x32xf32>
    %63 = arith.truncf %62 : vector<24x32xf32> to vector<24x32xbf16>
    %c288 = arith.constant 288 : index
    %c0_42 = arith.constant 0 : index
    %64 = vector.load %arg4[%c288, %c0_42] : memref<800x64xbf16, #tpu.memory_space<vmem>>, vector<32x64xbf16>
    %cst_43 = arith.constant dense<0.000000e+00> : vector<24x64xf32>
    %65 = tpu.matmul %63, %64, %cst_43 {dimension_numbers = #tpu.dot_dimension_numbers<[1], [0], [0], [1], [0, 0, 1, 1], [], []>} : vector<24x32xbf16>, vector<32x64xbf16>, vector<24x64xf32> -> vector<24x64xf32>
    %66 = arith.addf %61, %65 : vector<24x64xf32>
    %c240 = arith.constant 240 : index
    %c0_44 = arith.constant 0 : index
    %67 = vector.load %arg13[%c240, %c0_44] : memref<600x32xf32, #tpu.memory_space<vmem>>, vector<24x32xf32>
    %68 = arith.truncf %67 : vector<24x32xf32> to vector<24x32xbf16>
    %c320 = arith.constant 320 : index
    %c0_45 = arith.constant 0 : index
    %69 = vector.load %arg4[%c320, %c0_45] : memref<800x64xbf16, #tpu.memory_space<vmem>>, vector<32x64xbf16>
    %cst_46 = arith.constant dense<0.000000e+00> : vector<24x64xf32>
    %70 = tpu.matmul %68, %69, %cst_46 {dimension_numbers = #tpu.dot_dimension_numbers<[1], [0], [0], [1], [0, 0, 1, 1], [], []>} : vector<24x32xbf16>, vector<32x64xbf16>, vector<24x64xf32> -> vector<24x64xf32>
    %71 = arith.addf %66, %70 : vector<24x64xf32>
    %c264 = arith.constant 264 : index
    %c0_47 = arith.constant 0 : index
    %72 = vector.load %arg13[%c264, %c0_47] : memref<600x32xf32, #tpu.memory_space<vmem>>, vector<24x32xf32>
    %73 = arith.truncf %72 : vector<24x32xf32> to vector<24x32xbf16>
    %c352 = arith.constant 352 : index
    %c0_48 = arith.constant 0 : index
    %74 = vector.load %arg4[%c352, %c0_48] : memref<800x64xbf16, #tpu.memory_space<vmem>>, vector<32x64xbf16>
    %cst_49 = arith.constant dense<0.000000e+00> : vector<24x64xf32>
    %75 = tpu.matmul %73, %74, %cst_49 {dimension_numbers = #tpu.dot_dimension_numbers<[1], [0], [0], [1], [0, 0, 1, 1], [], []>} : vector<24x32xbf16>, vector<32x64xbf16>, vector<24x64xf32> -> vector<24x64xf32>
    %76 = arith.addf %71, %75 : vector<24x64xf32>
    %c288_50 = arith.constant 288 : index
    %c0_51 = arith.constant 0 : index
    %77 = vector.load %arg13[%c288_50, %c0_51] : memref<600x32xf32, #tpu.memory_space<vmem>>, vector<24x32xf32>
    %78 = arith.truncf %77 : vector<24x32xf32> to vector<24x32xbf16>
    %c384 = arith.constant 384 : index
    %c0_52 = arith.constant 0 : index
    %79 = vector.load %arg4[%c384, %c0_52] : memref<800x64xbf16, #tpu.memory_space<vmem>>, vector<32x64xbf16>
    %cst_53 = arith.constant dense<0.000000e+00> : vector<24x64xf32>
    %80 = tpu.matmul %78, %79, %cst_53 {dimension_numbers = #tpu.dot_dimension_numbers<[1], [0], [0], [1], [0, 0, 1, 1], [], []>} : vector<24x32xbf16>, vector<32x64xbf16>, vector<24x64xf32> -> vector<24x64xf32>
    %81 = arith.addf %76, %80 : vector<24x64xf32>
    %c312 = arith.constant 312 : index
    %c0_54 = arith.constant 0 : index
    %82 = vector.load %arg13[%c312, %c0_54] : memref<600x32xf32, #tpu.memory_space<vmem>>, vector<24x32xf32>
    %83 = arith.truncf %82 : vector<24x32xf32> to vector<24x32xbf16>
    %c416 = arith.constant 416 : index
    %c0_55 = arith.constant 0 : index
    %84 = vector.load %arg4[%c416, %c0_55] : memref<800x64xbf16, #tpu.memory_space<vmem>>, vector<32x64xbf16>
    %cst_56 = arith.constant dense<0.000000e+00> : vector<24x64xf32>
    %85 = tpu.matmul %83, %84, %cst_56 {dimension_numbers = #tpu.dot_dimension_numbers<[1], [0], [0], [1], [0, 0, 1, 1], [], []>} : vector<24x32xbf16>, vector<32x64xbf16>, vector<24x64xf32> -> vector<24x64xf32>
    %86 = arith.addf %81, %85 : vector<24x64xf32>
    %c336 = arith.constant 336 : index
    %c0_57 = arith.constant 0 : index
    %87 = vector.load %arg13[%c336, %c0_57] : memref<600x32xf32, #tpu.memory_space<vmem>>, vector<24x32xf32>
    %88 = arith.truncf %87 : vector<24x32xf32> to vector<24x32xbf16>
    %c448 = arith.constant 448 : index
    %c0_58 = arith.constant 0 : index
    %89 = vector.load %arg4[%c448, %c0_58] : memref<800x64xbf16, #tpu.memory_space<vmem>>, vector<32x64xbf16>
    %cst_59 = arith.constant dense<0.000000e+00> : vector<24x64xf32>
    %90 = tpu.matmul %88, %89, %cst_59 {dimension_numbers = #tpu.dot_dimension_numbers<[1], [0], [0], [1], [0, 0, 1, 1], [], []>} : vector<24x32xbf16>, vector<32x64xbf16>, vector<24x64xf32> -> vector<24x64xf32>
    %91 = arith.addf %86, %90 : vector<24x64xf32>
    %c360 = arith.constant 360 : index
    %c0_60 = arith.constant 0 : index
    %92 = vector.load %arg13[%c360, %c0_60] : memref<600x32xf32, #tpu.memory_space<vmem>>, vector<24x32xf32>
    %93 = arith.truncf %92 : vector<24x32xf32> to vector<24x32xbf16>
    %c480 = arith.constant 480 : index
    %c0_61 = arith.constant 0 : index
    %94 = vector.load %arg4[%c480, %c0_61] : memref<800x64xbf16, #tpu.memory_space<vmem>>, vector<32x64xbf16>
    %cst_62 = arith.constant dense<0.000000e+00> : vector<24x64xf32>
    %95 = tpu.matmul %93, %94, %cst_62 {dimension_numbers = #tpu.dot_dimension_numbers<[1], [0], [0], [1], [0, 0, 1, 1], [], []>} : vector<24x32xbf16>, vector<32x64xbf16>, vector<24x64xf32> -> vector<24x64xf32>
    %96 = arith.addf %91, %95 : vector<24x64xf32>
    %c384_63 = arith.constant 384 : index
    %c0_64 = arith.constant 0 : index
    %97 = vector.load %arg13[%c384_63, %c0_64] : memref<600x32xf32, #tpu.memory_space<vmem>>, vector<24x32xf32>
    %98 = arith.truncf %97 : vector<24x32xf32> to vector<24x32xbf16>
    %c512 = arith.constant 512 : index
    %c0_65 = arith.constant 0 : index
    %99 = vector.load %arg4[%c512, %c0_65] : memref<800x64xbf16, #tpu.memory_space<vmem>>, vector<32x64xbf16>
    %cst_66 = arith.constant dense<0.000000e+00> : vector<24x64xf32>
    %100 = tpu.matmul %98, %99, %cst_66 {dimension_numbers = #tpu.dot_dimension_numbers<[1], [0], [0], [1], [0, 0, 1, 1], [], []>} : vector<24x32xbf16>, vector<32x64xbf16>, vector<24x64xf32> -> vector<24x64xf32>
    %101 = arith.addf %96, %100 : vector<24x64xf32>
    %c408 = arith.constant 408 : index
    %c0_67 = arith.constant 0 : index
    %102 = vector.load %arg13[%c408, %c0_67] : memref<600x32xf32, #tpu.memory_space<vmem>>, vector<24x32xf32>
    %103 = arith.truncf %102 : vector<24x32xf32> to vector<24x32xbf16>
    %c544 = arith.constant 544 : index
    %c0_68 = arith.constant 0 : index
    %104 = vector.load %arg4[%c544, %c0_68] : memref<800x64xbf16, #tpu.memory_space<vmem>>, vector<32x64xbf16>
    %cst_69 = arith.constant dense<0.000000e+00> : vector<24x64xf32>
    %105 = tpu.matmul %103, %104, %cst_69 {dimension_numbers = #tpu.dot_dimension_numbers<[1], [0], [0], [1], [0, 0, 1, 1], [], []>} : vector<24x32xbf16>, vector<32x64xbf16>, vector<24x64xf32> -> vector<24x64xf32>
    %106 = arith.addf %101, %105 : vector<24x64xf32>
    %c432 = arith.constant 432 : index
    %c0_70 = arith.constant 0 : index
    %107 = vector.load %arg13[%c432, %c0_70] : memref<600x32xf32, #tpu.memory_space<vmem>>, vector<24x32xf32>
    %108 = arith.truncf %107 : vector<24x32xf32> to vector<24x32xbf16>
    %c576 = arith.constant 576 : index
    %c0_71 = arith.constant 0 : index
    %109 = vector.load %arg4[%c576, %c0_71] : memref<800x64xbf16, #tpu.memory_space<vmem>>, vector<32x64xbf16>
    %cst_72 = arith.constant dense<0.000000e+00> : vector<24x64xf32>
    %110 = tpu.matmul %108, %109, %cst_72 {dimension_numbers = #tpu.dot_dimension_numbers<[1], [0], [0], [1], [0, 0, 1, 1], [], []>} : vector<24x32xbf16>, vector<32x64xbf16>, vector<24x64xf32> -> vector<24x64xf32>
    %111 = arith.addf %106, %110 : vector<24x64xf32>
    %c456 = arith.constant 456 : index
    %c0_73 = arith.constant 0 : index
    %112 = vector.load %arg13[%c456, %c0_73] : memref<600x32xf32, #tpu.memory_space<vmem>>, vector<24x32xf32>
    %113 = arith.truncf %112 : vector<24x32xf32> to vector<24x32xbf16>
    %c608 = arith.constant 608 : index
    %c0_74 = arith.constant 0 : index
    %114 = vector.load %arg4[%c608, %c0_74] : memref<800x64xbf16, #tpu.memory_space<vmem>>, vector<32x64xbf16>
    %cst_75 = arith.constant dense<0.000000e+00> : vector<24x64xf32>
    %115 = tpu.matmul %113, %114, %cst_75 {dimension_numbers = #tpu.dot_dimension_numbers<[1], [0], [0], [1], [0, 0, 1, 1], [], []>} : vector<24x32xbf16>, vector<32x64xbf16>, vector<24x64xf32> -> vector<24x64xf32>
    %116 = arith.addf %111, %115 : vector<24x64xf32>
    %c480_76 = arith.constant 480 : index
    %c0_77 = arith.constant 0 : index
    %117 = vector.load %arg13[%c480_76, %c0_77] : memref<600x32xf32, #tpu.memory_space<vmem>>, vector<24x32xf32>
    %118 = arith.truncf %117 : vector<24x32xf32> to vector<24x32xbf16>
    %c640 = arith.constant 640 : index
    %c0_78 = arith.constant 0 : index
    %119 = vector.load %arg4[%c640, %c0_78] : memref<800x64xbf16, #tpu.memory_space<vmem>>, vector<32x64xbf16>
    %cst_79 = arith.constant dense<0.000000e+00> : vector<24x64xf32>
    %120 = tpu.matmul %118, %119, %cst_79 {dimension_numbers = #tpu.dot_dimension_numbers<[1], [0], [0], [1], [0, 0, 1, 1], [], []>} : vector<24x32xbf16>, vector<32x64xbf16>, vector<24x64xf32> -> vector<24x64xf32>
    %121 = arith.addf %116, %120 : vector<24x64xf32>
    %c504 = arith.constant 504 : index
    %c0_80 = arith.constant 0 : index
    %122 = vector.load %arg13[%c504, %c0_80] : memref<600x32xf32, #tpu.memory_space<vmem>>, vector<24x32xf32>
    %123 = arith.truncf %122 : vector<24x32xf32> to vector<24x32xbf16>
    %c672 = arith.constant 672 : index
    %c0_81 = arith.constant 0 : index
    %124 = vector.load %arg4[%c672, %c0_81] : memref<800x64xbf16, #tpu.memory_space<vmem>>, vector<32x64xbf16>
    %cst_82 = arith.constant dense<0.000000e+00> : vector<24x64xf32>
    %125 = tpu.matmul %123, %124, %cst_82 {dimension_numbers = #tpu.dot_dimension_numbers<[1], [0], [0], [1], [0, 0, 1, 1], [], []>} : vector<24x32xbf16>, vector<32x64xbf16>, vector<24x64xf32> -> vector<24x64xf32>
    %126 = arith.addf %121, %125 : vector<24x64xf32>
    %c528 = arith.constant 528 : index
    %c0_83 = arith.constant 0 : index
    %127 = vector.load %arg13[%c528, %c0_83] : memref<600x32xf32, #tpu.memory_space<vmem>>, vector<24x32xf32>
    %128 = arith.truncf %127 : vector<24x32xf32> to vector<24x32xbf16>
    %c704 = arith.constant 704 : index
    %c0_84 = arith.constant 0 : index
    %129 = vector.load %arg4[%c704, %c0_84] : memref<800x64xbf16, #tpu.memory_space<vmem>>, vector<32x64xbf16>
    %cst_85 = arith.constant dense<0.000000e+00> : vector<24x64xf32>
    %130 = tpu.matmul %128, %129, %cst_85 {dimension_numbers = #tpu.dot_dimension_numbers<[1], [0], [0], [1], [0, 0, 1, 1], [], []>} : vector<24x32xbf16>, vector<32x64xbf16>, vector<24x64xf32> -> vector<24x64xf32>
    %131 = arith.addf %126, %130 : vector<24x64xf32>
    %c552 = arith.constant 552 : index
    %c0_86 = arith.constant 0 : index
    %132 = vector.load %arg13[%c552, %c0_86] : memref<600x32xf32, #tpu.memory_space<vmem>>, vector<24x32xf32>
    %133 = arith.truncf %132 : vector<24x32xf32> to vector<24x32xbf16>
    %c736 = arith.constant 736 : index
    %c0_87 = arith.constant 0 : index
    %134 = vector.load %arg4[%c736, %c0_87] : memref<800x64xbf16, #tpu.memory_space<vmem>>, vector<32x64xbf16>
    %cst_88 = arith.constant dense<0.000000e+00> : vector<24x64xf32>
    %135 = tpu.matmul %133, %134, %cst_88 {dimension_numbers = #tpu.dot_dimension_numbers<[1], [0], [0], [1], [0, 0, 1, 1], [], []>} : vector<24x32xbf16>, vector<32x64xbf16>, vector<24x64xf32> -> vector<24x64xf32>
    %136 = arith.addf %131, %135 : vector<24x64xf32>
    %c576_89 = arith.constant 576 : index
    %c0_90 = arith.constant 0 : index
    %137 = vector.load %arg13[%c576_89, %c0_90] : memref<600x32xf32, #tpu.memory_space<vmem>>, vector<24x32xf32>
    %138 = arith.truncf %137 : vector<24x32xf32> to vector<24x32xbf16>
    %c768 = arith.constant 768 : index
    %c0_91 = arith.constant 0 : index
    %139 = vector.load %arg4[%c768, %c0_91] : memref<800x64xbf16, #tpu.memory_space<vmem>>, vector<32x64xbf16>
    %cst_92 = arith.constant dense<0.000000e+00> : vector<24x64xf32>
    %140 = tpu.matmul %138, %139, %cst_92 {dimension_numbers = #tpu.dot_dimension_numbers<[1], [0], [0], [1], [0, 0, 1, 1], [], []>} : vector<24x32xbf16>, vector<32x64xbf16>, vector<24x64xf32> -> vector<24x64xf32>
    %141 = arith.addf %136, %140 : vector<24x64xf32>
    %cst_93 = arith.constant 0.000000e+00 : f32
    %142 = vector.broadcast %cst_93 : f32 to vector<24x64xf32>
    %143 = arith.maximumf %141, %142 : vector<24x64xf32>
    %c0_i32_94 = arith.constant 0 : i32
    %144 = tpu.memref_slice %arg17[%c0_i32_94] : memref<3x!tpu.dma_semaphore, #tpu.memory_space<semaphore_mem>> -> memref<1x!tpu.dma_semaphore, #tpu.memory_space<semaphore_mem>>
    %145 = tpu.memref_squeeze %144 : memref<1x!tpu.dma_semaphore, #tpu.memory_space<semaphore_mem>> -> memref<!tpu.dma_semaphore, #tpu.memory_space<semaphore_mem>>
    tpu.wait_dma2 semaphore(%145 : memref<!tpu.dma_semaphore, #tpu.memory_space<semaphore_mem>>) src(%arg9 : memref<576x64xbf16, #tpu.memory_space<any>>) dst(%arg14 : memref<576x64xbf16, #tpu.memory_space<vmem>>)
    %c0_95 = arith.constant 0 : index
    %c0_96 = arith.constant 0 : index
    %146 = vector.load %arg6[%c0_95, %c0_96] : memref<1x64xf32, #tpu.memory_space<vmem>>, vector<1x64xf32>
    %147 = vector.extract_strided_slice %143 {offsets = [0, 0], sizes = [2, 64], strides = [1, 1]} : vector<24x64xf32> to vector<2x64xf32>
    %148 = arith.truncf %147 : vector<2x64xf32> to vector<2x64xbf16>
    %c0_97 = arith.constant 0 : index
    %c0_98 = arith.constant 0 : index
    %149 = vector.load %arg14[%c0_97, %c0_98] : memref<576x64xbf16, #tpu.memory_space<vmem>>, vector<64x64xbf16>
    %cst_99 = arith.constant dense<0.000000e+00> : vector<2x64xf32>
    %150 = tpu.matmul %148, %149, %cst_99 {dimension_numbers = #tpu.dot_dimension_numbers<[1], [0], [0], [1], [0, 0, 1, 1], [], []>} : vector<2x64xbf16>, vector<64x64xbf16>, vector<2x64xf32> -> vector<2x64xf32>
    %151 = vector.broadcast %146 : vector<1x64xf32> to vector<2x64xf32>
    %152 = arith.addf %151, %150 : vector<2x64xf32>
    %153 = vector.extract_strided_slice %143 {offsets = [2, 0], sizes = [2, 64], strides = [1, 1]} : vector<24x64xf32> to vector<2x64xf32>
    %154 = arith.truncf %153 : vector<2x64xf32> to vector<2x64xbf16>
    %c64_100 = arith.constant 64 : index
    %c0_101 = arith.constant 0 : index
    %155 = vector.load %arg14[%c64_100, %c0_101] : memref<576x64xbf16, #tpu.memory_space<vmem>>, vector<64x64xbf16>
    %cst_102 = arith.constant dense<0.000000e+00> : vector<2x64xf32>
    %156 = tpu.matmul %154, %155, %cst_102 {dimension_numbers = #tpu.dot_dimension_numbers<[1], [0], [0], [1], [0, 0, 1, 1], [], []>} : vector<2x64xbf16>, vector<64x64xbf16>, vector<2x64xf32> -> vector<2x64xf32>
    %157 = arith.addf %152, %156 : vector<2x64xf32>
    %158 = vector.extract_strided_slice %143 {offsets = [4, 0], sizes = [2, 64], strides = [1, 1]} : vector<24x64xf32> to vector<2x64xf32>
    %159 = arith.truncf %158 : vector<2x64xf32> to vector<2x64xbf16>
    %c128_103 = arith.constant 128 : index
    %c0_104 = arith.constant 0 : index
    %160 = vector.load %arg14[%c128_103, %c0_104] : memref<576x64xbf16, #tpu.memory_space<vmem>>, vector<64x64xbf16>
    %cst_105 = arith.constant dense<0.000000e+00> : vector<2x64xf32>
    %161 = tpu.matmul %159, %160, %cst_105 {dimension_numbers = #tpu.dot_dimension_numbers<[1], [0], [0], [1], [0, 0, 1, 1], [], []>} : vector<2x64xbf16>, vector<64x64xbf16>, vector<2x64xf32> -> vector<2x64xf32>
    %162 = arith.addf %157, %161 : vector<2x64xf32>
    %163 = vector.extract_strided_slice %143 {offsets = [6, 0], sizes = [2, 64], strides = [1, 1]} : vector<24x64xf32> to vector<2x64xf32>
    %164 = arith.truncf %163 : vector<2x64xf32> to vector<2x64xbf16>
    %c192_106 = arith.constant 192 : index
    %c0_107 = arith.constant 0 : index
    %165 = vector.load %arg14[%c192_106, %c0_107] : memref<576x64xbf16, #tpu.memory_space<vmem>>, vector<64x64xbf16>
    %cst_108 = arith.constant dense<0.000000e+00> : vector<2x64xf32>
    %166 = tpu.matmul %164, %165, %cst_108 {dimension_numbers = #tpu.dot_dimension_numbers<[1], [0], [0], [1], [0, 0, 1, 1], [], []>} : vector<2x64xbf16>, vector<64x64xbf16>, vector<2x64xf32> -> vector<2x64xf32>
    %167 = arith.addf %162, %166 : vector<2x64xf32>
    %168 = vector.extract_strided_slice %143 {offsets = [8, 0], sizes = [2, 64], strides = [1, 1]} : vector<24x64xf32> to vector<2x64xf32>
    %169 = arith.truncf %168 : vector<2x64xf32> to vector<2x64xbf16>
    %c256_109 = arith.constant 256 : index
    %c0_110 = arith.constant 0 : index
    %170 = vector.load %arg14[%c256_109, %c0_110] : memref<576x64xbf16, #tpu.memory_space<vmem>>, vector<64x64xbf16>
    %cst_111 = arith.constant dense<0.000000e+00> : vector<2x64xf32>
    %171 = tpu.matmul %169, %170, %cst_111 {dimension_numbers = #tpu.dot_dimension_numbers<[1], [0], [0], [1], [0, 0, 1, 1], [], []>} : vector<2x64xbf16>, vector<64x64xbf16>, vector<2x64xf32> -> vector<2x64xf32>
    %172 = arith.addf %167, %171 : vector<2x64xf32>
    %173 = vector.extract_strided_slice %143 {offsets = [10, 0], sizes = [2, 64], strides = [1, 1]} : vector<24x64xf32> to vector<2x64xf32>
    %174 = arith.truncf %173 : vector<2x64xf32> to vector<2x64xbf16>
    %c320_112 = arith.constant 320 : index
    %c0_113 = arith.constant 0 : index
    %175 = vector.load %arg14[%c320_112, %c0_113] : memref<576x64xbf16, #tpu.memory_space<vmem>>, vector<64x64xbf16>
    %cst_114 = arith.constant dense<0.000000e+00> : vector<2x64xf32>
    %176 = tpu.matmul %174, %175, %cst_114 {dimension_numbers = #tpu.dot_dimension_numbers<[1], [0], [0], [1], [0, 0, 1, 1], [], []>} : vector<2x64xbf16>, vector<64x64xbf16>, vector<2x64xf32> -> vector<2x64xf32>
    %177 = arith.addf %172, %176 : vector<2x64xf32>
    %178 = vector.extract_strided_slice %143 {offsets = [12, 0], sizes = [2, 64], strides = [1, 1]} : vector<24x64xf32> to vector<2x64xf32>
    %179 = arith.truncf %178 : vector<2x64xf32> to vector<2x64xbf16>
    %c384_115 = arith.constant 384 : index
    %c0_116 = arith.constant 0 : index
    %180 = vector.load %arg14[%c384_115, %c0_116] : memref<576x64xbf16, #tpu.memory_space<vmem>>, vector<64x64xbf16>
    %cst_117 = arith.constant dense<0.000000e+00> : vector<2x64xf32>
    %181 = tpu.matmul %179, %180, %cst_117 {dimension_numbers = #tpu.dot_dimension_numbers<[1], [0], [0], [1], [0, 0, 1, 1], [], []>} : vector<2x64xbf16>, vector<64x64xbf16>, vector<2x64xf32> -> vector<2x64xf32>
    %182 = arith.addf %177, %181 : vector<2x64xf32>
    %183 = vector.extract_strided_slice %143 {offsets = [14, 0], sizes = [2, 64], strides = [1, 1]} : vector<24x64xf32> to vector<2x64xf32>
    %184 = arith.truncf %183 : vector<2x64xf32> to vector<2x64xbf16>
    %c448_118 = arith.constant 448 : index
    %c0_119 = arith.constant 0 : index
    %185 = vector.load %arg14[%c448_118, %c0_119] : memref<576x64xbf16, #tpu.memory_space<vmem>>, vector<64x64xbf16>
    %cst_120 = arith.constant dense<0.000000e+00> : vector<2x64xf32>
    %186 = tpu.matmul %184, %185, %cst_120 {dimension_numbers = #tpu.dot_dimension_numbers<[1], [0], [0], [1], [0, 0, 1, 1], [], []>} : vector<2x64xbf16>, vector<64x64xbf16>, vector<2x64xf32> -> vector<2x64xf32>
    %187 = arith.addf %182, %186 : vector<2x64xf32>
    %188 = vector.extract_strided_slice %143 {offsets = [16, 0], sizes = [2, 64], strides = [1, 1]} : vector<24x64xf32> to vector<2x64xf32>
    %189 = arith.truncf %188 : vector<2x64xf32> to vector<2x64xbf16>
    %c512_121 = arith.constant 512 : index
    %c0_122 = arith.constant 0 : index
    %190 = vector.load %arg14[%c512_121, %c0_122] : memref<576x64xbf16, #tpu.memory_space<vmem>>, vector<64x64xbf16>
    %cst_123 = arith.constant dense<0.000000e+00> : vector<2x64xf32>
    %191 = tpu.matmul %189, %190, %cst_123 {dimension_numbers = #tpu.dot_dimension_numbers<[1], [0], [0], [1], [0, 0, 1, 1], [], []>} : vector<2x64xbf16>, vector<64x64xbf16>, vector<2x64xf32> -> vector<2x64xf32>
    %192 = arith.addf %187, %191 : vector<2x64xf32>
    %cst_124 = arith.constant 0.000000e+00 : f32
    %193 = vector.broadcast %cst_124 : f32 to vector<2x64xf32>
    %194 = arith.maximumf %192, %193 : vector<2x64xf32>
    %195 = vector.extract_strided_slice %194 {offsets = [0, 0], sizes = [2, 32], strides = [1, 1]} : vector<2x64xf32> to vector<2x32xf32>
    %196 = arith.truncf %195 : vector<2x32xf32> to vector<2x32xbf16>
    %197 = vector.extract_strided_slice %194 {offsets = [0, 32], sizes = [2, 32], strides = [1, 1]} : vector<2x64xf32> to vector<2x32xf32>
    %198 = arith.truncf %197 : vector<2x32xf32> to vector<2x32xbf16>
    %c1_i32_125 = arith.constant 1 : i32
    %199 = tpu.memref_slice %arg17[%c1_i32_125] : memref<3x!tpu.dma_semaphore, #tpu.memory_space<semaphore_mem>> -> memref<1x!tpu.dma_semaphore, #tpu.memory_space<semaphore_mem>>
    %200 = tpu.memref_squeeze %199 : memref<1x!tpu.dma_semaphore, #tpu.memory_space<semaphore_mem>> -> memref<!tpu.dma_semaphore, #tpu.memory_space<semaphore_mem>>
    tpu.wait_dma2 semaphore(%200 : memref<!tpu.dma_semaphore, #tpu.memory_space<semaphore_mem>>) src(%arg10 : memref<32x128xbf16, #tpu.memory_space<any>>) dst(%arg15 : memref<32x128xbf16, #tpu.memory_space<vmem>>)
    %c2_i32_126 = arith.constant 2 : i32
    %201 = tpu.memref_slice %arg17[%c2_i32_126] : memref<3x!tpu.dma_semaphore, #tpu.memory_space<semaphore_mem>> -> memref<1x!tpu.dma_semaphore, #tpu.memory_space<semaphore_mem>>
    %202 = tpu.memref_squeeze %201 : memref<1x!tpu.dma_semaphore, #tpu.memory_space<semaphore_mem>> -> memref<!tpu.dma_semaphore, #tpu.memory_space<semaphore_mem>>
    tpu.wait_dma2 semaphore(%202 : memref<!tpu.dma_semaphore, #tpu.memory_space<semaphore_mem>>) src(%arg11 : memref<32x768xbf16, #tpu.memory_space<any>>) dst(%arg16 : memref<32x768xbf16, #tpu.memory_space<vmem>>)
    %c0_127 = arith.constant 0 : index
    %c0_128 = arith.constant 0 : index
    %203 = vector.load %arg15[%c0_127, %c0_128] : memref<32x128xbf16, #tpu.memory_space<vmem>>, vector<32x128xbf16>
    %cst_129 = arith.constant dense<0.000000e+00> : vector<2x128xf32>
    %204 = tpu.matmul %196, %203, %cst_129 {dimension_numbers = #tpu.dot_dimension_numbers<[1], [0], [0], [1], [0, 0, 1, 1], [], []>} : vector<2x32xbf16>, vector<32x128xbf16>, vector<2x128xf32> -> vector<2x128xf32>
    %c0_130 = arith.constant 0 : index
    %c0_131 = arith.constant 0 : index
    %205 = vector.load %arg7[%c0_130, %c0_131] : memref<1x128xf32, #tpu.memory_space<vmem>>, vector<1x128xf32>
    %206 = vector.broadcast %205 : vector<1x128xf32> to vector<2x128xf32>
    %207 = arith.addf %204, %206 : vector<2x128xf32>
    %c0_132 = arith.constant 0 : index
    %c0_133 = arith.constant 0 : index
    %208 = vector.load %arg16[%c0_132, %c0_133] : memref<32x768xbf16, #tpu.memory_space<vmem>>, vector<32x768xbf16>
    %cst_134 = arith.constant dense<0.000000e+00> : vector<2x768xf32>
    %209 = tpu.matmul %198, %208, %cst_134 {dimension_numbers = #tpu.dot_dimension_numbers<[1], [0], [0], [1], [0, 0, 1, 1], [], []>} : vector<2x32xbf16>, vector<32x768xbf16>, vector<2x768xf32> -> vector<2x768xf32>
    %c0_135 = arith.constant 0 : index
    %c0_136 = arith.constant 0 : index
    %210 = vector.load %arg8[%c0_135, %c0_136] : memref<1x768xf32, #tpu.memory_space<vmem>>, vector<1x768xf32>
    %211 = vector.broadcast %210 : vector<1x768xf32> to vector<2x768xf32>
    %212 = arith.addf %209, %211 : vector<2x768xf32>
    %213 = vector.extract_strided_slice %212 {offsets = [0, 0], sizes = [2, 128], strides = [1, 1]} : vector<2x768xf32> to vector<2x128xf32>
    %214 = vector.extract_strided_slice %212 {offsets = [0, 128], sizes = [2, 128], strides = [1, 1]} : vector<2x768xf32> to vector<2x128xf32>
    %215 = arith.addf %213, %214 : vector<2x128xf32>
    %216 = vector.extract_strided_slice %212 {offsets = [0, 256], sizes = [2, 128], strides = [1, 1]} : vector<2x768xf32> to vector<2x128xf32>
    %217 = arith.addf %215, %216 : vector<2x128xf32>
    %218 = vector.extract_strided_slice %212 {offsets = [0, 384], sizes = [2, 128], strides = [1, 1]} : vector<2x768xf32> to vector<2x128xf32>
    %219 = arith.addf %217, %218 : vector<2x128xf32>
    %220 = vector.extract_strided_slice %212 {offsets = [0, 512], sizes = [2, 128], strides = [1, 1]} : vector<2x768xf32> to vector<2x128xf32>
    %221 = arith.addf %219, %220 : vector<2x128xf32>
    %222 = vector.extract_strided_slice %212 {offsets = [0, 640], sizes = [2, 128], strides = [1, 1]} : vector<2x768xf32> to vector<2x128xf32>
    %223 = arith.addf %221, %222 : vector<2x128xf32>
    %cst_137 = arith.constant 0.166666672 : f32
    %224 = vector.broadcast %cst_137 : f32 to vector<2x128xf32>
    %225 = arith.mulf %223, %224 : vector<2x128xf32>
    %226 = arith.subf %207, %225 : vector<2x128xf32>
    %227 = tpu.iota {dimensions = array<i32: 1>} : vector<2x128xi32>
    %c51_i32 = arith.constant 51 : i32
    %228 = vector.broadcast %c51_i32 : i32 to vector<2x128xi32>
    %229 = arith.cmpi slt, %227, %228 : vector<2x128xi32>
    %230 = vector.extract_strided_slice %212 {offsets = [0, 0], sizes = [2, 128], strides = [1, 1]} : vector<2x768xf32> to vector<2x128xf32>
    %231 = arith.addf %226, %230 : vector<2x128xf32>
    %cst_138 = arith.constant -1.000000e+30 : f32
    %232 = vector.broadcast %cst_138 : f32 to vector<2x128xf32>
    %233 = arith.select %229, %231, %232 : vector<2x128xi1>, vector<2x128xf32>
    %cst_139 = arith.constant dense<0xFF800000> : vector<2xf32>
    %234 = vector.multi_reduction <maximumf>, %233, %cst_139 [1] : vector<2x128xf32> to vector<2xf32>
    %235 = vector.shape_cast %234 : vector<2xf32> to vector<2x1xf32>
    %236 = vector.broadcast %235 : vector<2x1xf32> to vector<2x128xf32>
    %237 = arith.subf %233, %236 : vector<2x128xf32>
    %238 = math.exp %237 : vector<2x128xf32>
    %cst_140 = arith.constant dense<0.000000e+00> : vector<2xf32>
    %239 = vector.multi_reduction <add>, %238, %cst_140 [1] : vector<2x128xf32> to vector<2xf32>
    %240 = vector.shape_cast %239 : vector<2xf32> to vector<2x1xf32>
    %241 = vector.broadcast %240 : vector<2x1xf32> to vector<2x128xf32>
    %242 = arith.divf %238, %241 : vector<2x128xf32>
    %c0_141 = arith.constant 0 : index
    %c0_142 = arith.constant 0 : index
    %243 = vector.load %arg12[%c0_141, %c0_142] : memref<2x768xf32, #tpu.memory_space<vmem>>, vector<2x128xf32>
    tpu.vector_store %arg12[%c0_141, %c0_142], %242 {strides = array<i32>} : memref<2x768xf32, #tpu.memory_space<vmem>>, vector<2x128xf32>,
    %244 = vector.extract_strided_slice %212 {offsets = [0, 128], sizes = [2, 128], strides = [1, 1]} : vector<2x768xf32> to vector<2x128xf32>
    %245 = arith.addf %226, %244 : vector<2x128xf32>
    %cst_143 = arith.constant -1.000000e+30 : f32
    %246 = vector.broadcast %cst_143 : f32 to vector<2x128xf32>
    %247 = arith.select %229, %245, %246 : vector<2x128xi1>, vector<2x128xf32>
    %cst_144 = arith.constant dense<0xFF800000> : vector<2xf32>
    %248 = vector.multi_reduction <maximumf>, %247, %cst_144 [1] : vector<2x128xf32> to vector<2xf32>
    %249 = vector.shape_cast %248 : vector<2xf32> to vector<2x1xf32>
    %250 = vector.broadcast %249 : vector<2x1xf32> to vector<2x128xf32>
    %251 = arith.subf %247, %250 : vector<2x128xf32>
    %252 = math.exp %251 : vector<2x128xf32>
    %cst_145 = arith.constant dense<0.000000e+00> : vector<2xf32>
    %253 = vector.multi_reduction <add>, %252, %cst_145 [1] : vector<2x128xf32> to vector<2xf32>
    %254 = vector.shape_cast %253 : vector<2xf32> to vector<2x1xf32>
    %255 = vector.broadcast %254 : vector<2x1xf32> to vector<2x128xf32>
    %256 = arith.divf %252, %255 : vector<2x128xf32>
    %c0_146 = arith.constant 0 : index
    %c128_147 = arith.constant 128 : index
    %257 = vector.load %arg12[%c0_146, %c128_147] : memref<2x768xf32, #tpu.memory_space<vmem>>, vector<2x128xf32>
    tpu.vector_store %arg12[%c0_146, %c128_147], %256 {strides = array<i32>} : memref<2x768xf32, #tpu.memory_space<vmem>>, vector<2x128xf32>,
    %258 = vector.extract_strided_slice %212 {offsets = [0, 256], sizes = [2, 128], strides = [1, 1]} : vector<2x768xf32> to vector<2x128xf32>
    %259 = arith.addf %226, %258 : vector<2x128xf32>
    %cst_148 = arith.constant -1.000000e+30 : f32
    %260 = vector.broadcast %cst_148 : f32 to vector<2x128xf32>
    %261 = arith.select %229, %259, %260 : vector<2x128xi1>, vector<2x128xf32>
    %cst_149 = arith.constant dense<0xFF800000> : vector<2xf32>
    %262 = vector.multi_reduction <maximumf>, %261, %cst_149 [1] : vector<2x128xf32> to vector<2xf32>
    %263 = vector.shape_cast %262 : vector<2xf32> to vector<2x1xf32>
    %264 = vector.broadcast %263 : vector<2x1xf32> to vector<2x128xf32>
    %265 = arith.subf %261, %264 : vector<2x128xf32>
    %266 = math.exp %265 : vector<2x128xf32>
    %cst_150 = arith.constant dense<0.000000e+00> : vector<2xf32>
    %267 = vector.multi_reduction <add>, %266, %cst_150 [1] : vector<2x128xf32> to vector<2xf32>
    %268 = vector.shape_cast %267 : vector<2xf32> to vector<2x1xf32>
    %269 = vector.broadcast %268 : vector<2x1xf32> to vector<2x128xf32>
    %270 = arith.divf %266, %269 : vector<2x128xf32>
    %c0_151 = arith.constant 0 : index
    %c256_152 = arith.constant 256 : index
    %271 = vector.load %arg12[%c0_151, %c256_152] : memref<2x768xf32, #tpu.memory_space<vmem>>, vector<2x128xf32>
    tpu.vector_store %arg12[%c0_151, %c256_152], %270 {strides = array<i32>} : memref<2x768xf32, #tpu.memory_space<vmem>>, vector<2x128xf32>,
    %272 = vector.extract_strided_slice %212 {offsets = [0, 384], sizes = [2, 128], strides = [1, 1]} : vector<2x768xf32> to vector<2x128xf32>
    %273 = arith.addf %226, %272 : vector<2x128xf32>
    %cst_153 = arith.constant -1.000000e+30 : f32
    %274 = vector.broadcast %cst_153 : f32 to vector<2x128xf32>
    %275 = arith.select %229, %273, %274 : vector<2x128xi1>, vector<2x128xf32>
    %cst_154 = arith.constant dense<0xFF800000> : vector<2xf32>
    %276 = vector.multi_reduction <maximumf>, %275, %cst_154 [1] : vector<2x128xf32> to vector<2xf32>
    %277 = vector.shape_cast %276 : vector<2xf32> to vector<2x1xf32>
    %278 = vector.broadcast %277 : vector<2x1xf32> to vector<2x128xf32>
    %279 = arith.subf %275, %278 : vector<2x128xf32>
    %280 = math.exp %279 : vector<2x128xf32>
    %cst_155 = arith.constant dense<0.000000e+00> : vector<2xf32>
    %281 = vector.multi_reduction <add>, %280, %cst_155 [1] : vector<2x128xf32> to vector<2xf32>
    %282 = vector.shape_cast %281 : vector<2xf32> to vector<2x1xf32>
    %283 = vector.broadcast %282 : vector<2x1xf32> to vector<2x128xf32>
    %284 = arith.divf %280, %283 : vector<2x128xf32>
    %c0_156 = arith.constant 0 : index
    %c384_157 = arith.constant 384 : index
    %285 = vector.load %arg12[%c0_156, %c384_157] : memref<2x768xf32, #tpu.memory_space<vmem>>, vector<2x128xf32>
    tpu.vector_store %arg12[%c0_156, %c384_157], %284 {strides = array<i32>} : memref<2x768xf32, #tpu.memory_space<vmem>>, vector<2x128xf32>,
    %286 = vector.extract_strided_slice %212 {offsets = [0, 512], sizes = [2, 128], strides = [1, 1]} : vector<2x768xf32> to vector<2x128xf32>
    %287 = arith.addf %226, %286 : vector<2x128xf32>
    %cst_158 = arith.constant -1.000000e+30 : f32
    %288 = vector.broadcast %cst_158 : f32 to vector<2x128xf32>
    %289 = arith.select %229, %287, %288 : vector<2x128xi1>, vector<2x128xf32>
    %cst_159 = arith.constant dense<0xFF800000> : vector<2xf32>
    %290 = vector.multi_reduction <maximumf>, %289, %cst_159 [1] : vector<2x128xf32> to vector<2xf32>
    %291 = vector.shape_cast %290 : vector<2xf32> to vector<2x1xf32>
    %292 = vector.broadcast %291 : vector<2x1xf32> to vector<2x128xf32>
    %293 = arith.subf %289, %292 : vector<2x128xf32>
    %294 = math.exp %293 : vector<2x128xf32>
    %cst_160 = arith.constant dense<0.000000e+00> : vector<2xf32>
    %295 = vector.multi_reduction <add>, %294, %cst_160 [1] : vector<2x128xf32> to vector<2xf32>
    %296 = vector.shape_cast %295 : vector<2xf32> to vector<2x1xf32>
    %297 = vector.broadcast %296 : vector<2x1xf32> to vector<2x128xf32>
    %298 = arith.divf %294, %297 : vector<2x128xf32>
    %c0_161 = arith.constant 0 : index
    %c512_162 = arith.constant 512 : index
    %299 = vector.load %arg12[%c0_161, %c512_162] : memref<2x768xf32, #tpu.memory_space<vmem>>, vector<2x128xf32>
    tpu.vector_store %arg12[%c0_161, %c512_162], %298 {strides = array<i32>} : memref<2x768xf32, #tpu.memory_space<vmem>>, vector<2x128xf32>,
    %300 = vector.extract_strided_slice %212 {offsets = [0, 640], sizes = [2, 128], strides = [1, 1]} : vector<2x768xf32> to vector<2x128xf32>
    %301 = arith.addf %226, %300 : vector<2x128xf32>
    %cst_163 = arith.constant -1.000000e+30 : f32
    %302 = vector.broadcast %cst_163 : f32 to vector<2x128xf32>
    %303 = arith.select %229, %301, %302 : vector<2x128xi1>, vector<2x128xf32>
    %cst_164 = arith.constant dense<0xFF800000> : vector<2xf32>
    %304 = vector.multi_reduction <maximumf>, %303, %cst_164 [1] : vector<2x128xf32> to vector<2xf32>
    %305 = vector.shape_cast %304 : vector<2xf32> to vector<2x1xf32>
    %306 = vector.broadcast %305 : vector<2x1xf32> to vector<2x128xf32>
    %307 = arith.subf %303, %306 : vector<2x128xf32>
    %308 = math.exp %307 : vector<2x128xf32>
    %cst_165 = arith.constant dense<0.000000e+00> : vector<2xf32>
    %309 = vector.multi_reduction <add>, %308, %cst_165 [1] : vector<2x128xf32> to vector<2xf32>
    %310 = vector.shape_cast %309 : vector<2xf32> to vector<2x1xf32>
    %311 = vector.broadcast %310 : vector<2x1xf32> to vector<2x128xf32>
    %312 = arith.divf %308, %311 : vector<2x128xf32>
    %c0_166 = arith.constant 0 : index
    %c640_167 = arith.constant 640 : index
    %313 = vector.load %arg12[%c0_166, %c640_167] : memref<2x768xf32, #tpu.memory_space<vmem>>, vector<2x128xf32>
    tpu.vector_store %arg12[%c0_166, %c640_167], %312 {strides = array<i32>} : memref<2x768xf32, #tpu.memory_space<vmem>>, vector<2x128xf32>,
    return
  }
  func.func @transform_0(%arg0: i32) -> (i32, i32) {
    %c0_i32 = arith.constant 0 : i32
    %c0_i32_0 = arith.constant 0 : i32
    %c0_i32_1 = arith.constant 0 : i32
    return %c0_i32, %c0_i32_0 : i32, i32
  }
  func.func @transform_1(%arg0: i32) -> (i32, i32) {
    %c0_i32 = arith.constant 0 : i32
    %c0_i32_0 = arith.constant 0 : i32
    %c0_i32_1 = arith.constant 0 : i32
    return %c0_i32, %c0_i32_0 : i32, i32
  }
  func.func @transform_2(%arg0: i32) -> (i32, i32) {
    %c0_i32 = arith.constant 0 : i32
    %c0_i32_0 = arith.constant 0 : i32
    %c0_i32_1 = arith.constant 0 : i32
    return %c0_i32, %c0_i32_0 : i32, i32
  }
  func.func @transform_3(%arg0: i32) -> (i32, i32) {
    %c0_i32 = arith.constant 0 : i32
    %c0_i32_0 = arith.constant 0 : i32
    %c0_i32_1 = arith.constant 0 : i32
    return %c0_i32, %c0_i32_0 : i32, i32
  }
  func.func @transform_4(%arg0: i32) -> (i32, i32) {
    %c0_i32 = arith.constant 0 : i32
    %c0_i32_0 = arith.constant 0 : i32
    %c0_i32_1 = arith.constant 0 : i32
    return %c0_i32, %c0_i32_0 : i32, i32
  }
  func.func @transform_5(%arg0: i32) -> (i32, i32) {
    %c0_i32 = arith.constant 0 : i32
    %c0_i32_0 = arith.constant 0 : i32
    %c0_i32_1 = arith.constant 0 : i32
    return %c0_i32, %c0_i32_0 : i32, i32
  }
  func.func @transform_6(%arg0: i32) -> (i32, i32) {
    %c0_i32 = arith.constant 0 : i32
    %c0_i32_0 = arith.constant 0 : i32
    %c0_i32_1 = arith.constant 0 : i32
    return %c0_i32, %c0_i32_0 : i32, i32
  }
  func.func @transform_7(%arg0: i32) -> (i32, i32) {
    %c0_i32 = arith.constant 0 : i32
    %c0_i32_0 = arith.constant 0 : i32
    %c0_i32_1 = arith.constant 0 : i32
    return %c0_i32, %c0_i32_0 : i32, i32
  }
  func.func @transform_11(%arg0: i32) -> (i32, i32) {
    %c0_i32 = arith.constant 0 : i32
    %c0_i32_0 = arith.constant 0 : i32
    %c0_i32_1 = arith.constant 0 : i32
    return %c0_i32, %c0_i32_0 : i32, i32
  }
}

</mosaic_0001>

<bundles_post_ra>
// kernel: dqn_forward.1
= control target key start
LH: loop header
LB: loop body
LE: loop exit
PB: predicated region body
PF: predicated region fallthrough
CT: control target
= control target key end

     0   :  { %s4812_s0 = inlined_call_operand.vmem [shape: bf16[600,100], index: 0, kind: input, shape index: {}]   ;;  %s4813_s1 = inlined_call_operand.vmem [shape: bf16[100,32], index: 1, kind: input, shape index: {}]   ;;  %s4814_s2 = inlined_call_operand.vmem [shape: f32[1,32], index: 2, kind: input, shape index: {}]   ;;  %s4815_s3 = inlined_call_operand.vmem [shape: bf16[800,64], index: 3, kind: input, shape index: {}]   ;;  %s4816_s4 = inlined_call_operand.vmem [shape: f32[1,64], index: 4, kind: input, shape index: {}]   ;;  %s4817_s5 = inlined_call_operand.vmem [shape: f32[1,64], index: 5, kind: input, shape index: {}]   ;;  %s4818_s6 = inlined_call_operand.vmem [shape: f32[1,128], index: 6, kind: input, shape index: {}]   ;;  %s4819_s7 = inlined_call_operand.vmem [shape: f32[1,768], index: 7, kind: input, shape index: {}]   ;;  %s4820_s8 = inlined_call_operand.vmem [shape: bf16[576,64], index: 8, kind: input, shape index: {}]   ;;  %s4821_s9 = inlined_call_operand.vmem [shape: bf16[32,128], index: 9, kind: input, shape index: {}]   ;;  %s4822_s10 = inlined_call_operand.vmem [shape: bf16[32,768], index: 10, kind: input, shape index: {}]   ;;  %s4823_s11 = inlined_call_operand.vmem [shape: f32[2,768], index: 11, kind: output, shape index: {}]  }
   0x1   :  { %v43_v0 = vld [vmem:[%s4820_s8] sm:$0xff]  ;;  %v45_v1 = vld [vmem:[%s4820_s8 + $0x8] sm:$0xff]  ;;  %v47_v2 = vld [vmem:[%s4820_s8 + $0x10] sm:$0xff] }
   0x2   :  { %44 = vst [vmem:[#allocation3 + $0xb0] sm:$0xff] %v43_v0  ;;  %v49_v3 = vld [vmem:[%s4820_s8 + $0x18] sm:$0xff]  ;;  %v51_v4 = vld [vmem:[%s4820_s8 + $0x20] sm:$0xff]  ;;  %v53_v5 = vld [vmem:[%s4820_s8 + $0x28] sm:$0xff] }
   0x3   :  { %46 = vst [vmem:[#allocation3 + $0xd0] sm:$0xff] %v45_v1  ;;  %v55_v6 = vld [vmem:[%s4820_s8 + $0x30] sm:$0xff]  ;;  %v57_v7 = vld [vmem:[%s4820_s8 + $0x38] sm:$0xff]  ;;  %v59_v8 = vld [vmem:[%s4820_s8 + $0x40] sm:$0xff] }
   0x4   :  { %48 = vst [vmem:[#allocation3 + $0x10] sm:$0xff] %v47_v2  ;;  %v61_v9 = vld [vmem:[%s4820_s8 + $0x48] sm:$0xff]  ;;  %v63_v10 = vld [vmem:[%s4820_s8 + $0x50] sm:$0xff]  ;;  %v65_v11 = vld [vmem:[%s4820_s8 + $0x58] sm:$0xff] }
   0x5   :  { %50 = vst [vmem:[#allocation3 + $0x48] sm:$0xff] %v49_v3  ;;  %v67_v12 = vld [vmem:[%s4820_s8 + $0x60] sm:$0xff]  ;;  %v69_v13 = vld [vmem:[%s4820_s8 + $0x68] sm:$0xff]  ;;  %v71_v14 = vld [vmem:[%s4820_s8 + $0x70] sm:$0xff] }
   0x6   :  { %52 = vst [vmem:[#allocation3 + $0x108] sm:$0xff] %v51_v4  ;;  %v73_v15 = vld [vmem:[%s4820_s8 + $0x78] sm:$0xff]  ;;  %v75_v16 = vld [vmem:[%s4820_s8 + $0x80] sm:$0xff]  ;;  %v77_v17 = vld [vmem:[%s4820_s8 + $0x88] sm:$0xff] }
   0x7   :  { %54 = vst [vmem:[#allocation3 + $0x68] sm:$0xff] %v53_v5  ;;  %v79_v18 = vld [vmem:[%s4820_s8 + $0x90] sm:$0xff]  ;;  %v81_v19 = vld [vmem:[%s4820_s8 + $0x98] sm:$0xff]  ;;  %v83_v20 = vld [vmem:[%s4820_s8 + $0xa0] sm:$0xff] }
   0x8   :  { %56 = vst [vmem:[#allocation3 + $0x30] sm:$0xff] %v55_v6  ;;  %v85_v21 = vld [vmem:[%s4820_s8 + $0xa8] sm:$0xff]  ;;  %v87_v22 = vld [vmem:[%s4820_s8 + $0xb0] sm:$0xff]  ;;  %v89_v23 = vld [vmem:[%s4820_s8 + $0xb8] sm:$0xff] }
   0x9   :  { %58 = vst [vmem:[#allocation3 + $0x18] sm:$0xff] %v57_v7  ;;  %v91_v24 = vld [vmem:[%s4820_s8 + $0xc0] sm:$0xff]  ;;  %v93_v25 = vld [vmem:[%s4820_s8 + $0xc8] sm:$0xff]  ;;  %v95_v26 = vld [vmem:[%s4820_s8 + $0xd0] sm:$0xff] }
   0xa   :  { %60 = vst [vmem:[#allocation3 + $0x80] sm:$0xff] %v59_v8  ;;  %v97_v27 = vld [vmem:[%s4820_s8 + $0xd8] sm:$0xff]  ;;  %v99_v28 = vld [vmem:[%s4820_s8 + $0xe0] sm:$0xff]  ;;  %v101_v29 = vld [vmem:[%s4820_s8 + $0xe8] sm:$0xff] }
   0xb   :  { %62 = vst [vmem:[#allocation3 + $0x110] sm:$0xff] %v61_v9  ;;  %v103_v30 = vld [vmem:[%s4820_s8 + $0xf0] sm:$0xff]  ;;  %v105_v31 = vld [vmem:[%s4820_s8 + $0xf8] sm:$0xff]  ;;  %v107_v32 = vld [vmem:[%s4820_s8 + $0x100] sm:$0xff] }
   0xc   :  { %64 = vst [vmem:[#allocation3 + $0x118] sm:$0xff] %v63_v10  ;;  %v109_v33 = vld [vmem:[%s4820_s8 + $0x108] sm:$0xff]  ;;  %v111_v34 = vld [vmem:[%s4820_s8 + $0x110] sm:$0xff]  ;;  %v113_v35 = vld [vmem:[%s4820_s8 + $0x118] sm:$0xff] }
   0xd   :  { %66 = vst [vmem:[#allocation3 + $0x98] sm:$0xff] %v65_v11 }
   0xe   :  { %68 = vst [vmem:[#allocation3 + $0xf8] sm:$0xff] %v67_v12 }
   0xf   :  { %70 = vst [vmem:[#allocation3 + $0x38] sm:$0xff] %v69_v13 }
  0x10   :  { %72 = vst [vmem:[#allocation3 + $0x8] sm:$0xff] %v71_v14 }
  0x11   :  { %74 = vst [vmem:[#allocation3 + $0x78] sm:$0xff] %v73_v15 }
  0x12   :  { %76 = vst [vmem:[#allocation3 + $0x20] sm:$0xff] %v75_v16 }
  0x13   :  { %78 = vst [vmem:[#allocation3 + $0xc8] sm:$0xff] %v77_v17 }
  0x14   :  { %80 = vst [vmem:[#allocation3 + $0x90] sm:$0xff] %v79_v18 }
  0x15   :  { %82 = vst [vmem:[#allocation3 + $0xa0] sm:$0xff] %v81_v19 }
  0x16   :  { %84 = vst [vmem:[#allocation3 + $0x70] sm:$0xff] %v83_v20 }
  0x17   :  { %86 = vst [vmem:[#allocation3 + $0x58] sm:$0xff] %v85_v21 }
  0x18   :  { %88 = vst [vmem:[#allocation3 + $0xe0] sm:$0xff] %v87_v22 }
  0x19   :  { %90 = vst [vmem:[#allocation3 + $0x60] sm:$0xff] %v89_v23 }
  0x1a   :  { %92 = vst [vmem:[#allocation3 + $0xa8] sm:$0xff] %v91_v24 }
  0x1b   :  { %94 = vst [vmem:[#allocation3 + $0x88] sm:$0xff] %v93_v25 }
  0x1c   :  { %96 = vst [vmem:[#allocation3 + $0xd8] sm:$0xff] %v95_v26 }
  0x1d   :  { %98 = vst [vmem:[#allocation3 + $0xc0] sm:$0xff] %v97_v27 }
  0x1e   :  { %100 = vst [vmem:[#allocation3 + $0x50] sm:$0xff] %v99_v28 }
  0x1f   :  { %102 = vst [vmem:[#allocation3 + $0xf0] sm:$0xff] %v101_v29 }
  0x20   :  { %104 = vst [vmem:[#allocation3 + $0xb8] sm:$0xff] %v103_v30 }
  0x21   :  { %106 = vst [vmem:[#allocation3 + $0x28] sm:$0xff] %v105_v31 }
  0x22   :  { %108 = vst [vmem:[#allocation3 + $0x100] sm:$0xff] %v107_v32 }
  0x23   :  { %110 = vst [vmem:[#allocation3] sm:$0xff] %v109_v33 }
  0x24   :  { %112 = vst [vmem:[#allocation3 + $0x40] sm:$0xff] %v111_v34 }
  0x25   :  { %114 = vst [vmem:[#allocation3 + $0xe8] sm:$0xff] %v113_v35 }
  0x26   :  { %120 = vsyncadd [#allocation6], 4608  ;;  %v132_v36 = vld [vmem:[%s4821_s9] sm:$0xff]  ;;  %v134_v37 = vld [vmem:[%s4821_s9 + $0x8] sm:$0xff] }
  0x27   :  { %133 = vst [vmem:[#allocation4] sm:$0xff] %v132_v36 }
  0x28   :  { %135 = vst [vmem:[#allocation4 + $0x8] sm:$0xff] %v134_v37 }
  0x29   :  { %141 = vsyncadd [#allocation6 + $0x1], 256  ;;  %v153_v38 = vld [vmem:[%s4822_s10] sm:$0xff]  ;;  %v155_v39 = vld [vmem:[%s4822_s10 + $0x8] sm:$0xff] }
  0x2a   :  { %154 = vst [vmem:[#allocation5] sm:$0xff] %v153_v38  ;;  %v157_v40 = vld [vmem:[%s4822_s10 + $0x10] sm:$0xff]  ;;  %v159_v41 = vld [vmem:[%s4822_s10 + $0x18] sm:$0xff]  ;;  %v161_v42 = vld [vmem:[%s4822_s10 + $0x20] sm:$0xff] }
  0x2b   :  { %156 = vst [vmem:[#allocation5 + $0x8] sm:$0xff] %v155_v39  ;;  %v163_v43 = vld [vmem:[%s4822_s10 + $0x28] sm:$0xff]  ;;  %v165_v44 = vld [vmem:[%s4822_s10 + $0x30] sm:$0xff]  ;;  %v167_v45 = vld [vmem:[%s4822_s10 + $0x38] sm:$0xff] }
  0x2c   :  { %158 = vst [vmem:[#allocation5 + $0x10] sm:$0xff] %v157_v40  ;;  %v169_v46 = vld [vmem:[%s4822_s10 + $0x40] sm:$0xff]  ;;  %v171_v47 = vld [vmem:[%s4822_s10 + $0x48] sm:$0xff]  ;;  %v173_v48 = vld [vmem:[%s4822_s10 + $0x50] sm:$0xff] }
  0x2d   :  { %160 = vst [vmem:[#allocation5 + $0x18] sm:$0xff] %v159_v41  ;;  %v175_v49 = vld [vmem:[%s4822_s10 + $0x58] sm:$0xff] }
  0x2e   :  { %162 = vst [vmem:[#allocation5 + $0x20] sm:$0xff] %v161_v42 }
  0x2f   :  { %164 = vst [vmem:[#allocation5 + $0x28] sm:$0xff] %v163_v43 }
  0x30   :  { %166 = vst [vmem:[#allocation5 + $0x30] sm:$0xff] %v165_v44 }
  0x31   :  { %168 = vst [vmem:[#allocation5 + $0x38] sm:$0xff] %v167_v45 }
  0x32   :  { %170 = vst [vmem:[#allocation5 + $0x40] sm:$0xff] %v169_v46 }
  0x33   :  { %172 = vst [vmem:[#allocation5 + $0x48] sm:$0xff] %v171_v47 }
  0x34   :  { %174 = vst [vmem:[#allocation5 + $0x50] sm:$0xff] %v173_v48 }
  0x35   :  { %176 = vst [vmem:[#allocation5 + $0x58] sm:$0xff] %v175_v49 }
  0x36   :  { %182 = vsyncadd [#allocation6 + $0x2], 1536  ;;  %v270_v50 = vld [vmem:[%s4813_s1 + $0x30] sm:$0x3]  ;;  %vm617_vm0 = vcmask 1041408   ;;  %v3782_v54 = vld [vmem:[%s4813_s1 + $0x28] sm:$0xff] }
  0x37   :  { %v488_v51 = vunpack.c.l.b16 %v270_v50  ;;  %v3781_v55 = vld [vmem:[%s4813_s1 + $0x20] sm:$0xff]  ;;  %v3780_v56 = vld [vmem:[%s4813_s1 + $0x18] sm:$0xff]  ;;  %v3779_v57 = vld [vmem:[%s4813_s1 + $0x10] sm:$0xff]  ;;  %vm502_vm1 = vcmask 818176   ;;  %vm894_vm2 = vcmask 261120  }
  0x38   :  { %v3778_v58 = vld [vmem:[%s4813_s1 + $0x8] sm:$0xff]  ;;  %v3777_v59 = vld [vmem:[%s4813_s1] sm:$0xff]  ;;  %v3742_v62 = vld [vmem:[%s4812_s0 + $0x10] sm:$0xff] }
  0x39   :  { %v495_v52 = vpack.c.b16 %v488_v51, %v488_v51  ;;  %v3740_v60 = vld [vmem:[%s4812_s0] sm:$0xff]  ;;  %v3741_v61 = vld [vmem:[%s4812_s0 + $0x8] sm:$0xff]  ;;  %v3743_v63 = vld [vmem:[%s4812_s0 + $0x18] sm:$0xff] }
  0x3a   :  { %v3766_v0 = vld [vmem:[%s4812_s0 + $0xd0] sm:$0xff]  ;;  %v3744_v1 = vld [vmem:[%s4812_s0 + $0x20] sm:$0xff]  ;;  %v3767_v2 = vld [vmem:[%s4812_s0 + $0xd8] sm:$0xff] }
  0x3b   :  { %v619_v53 = vsel %vm617_vm0, %v495_v52, 0  ;;  %v3770_v3 = vld [vmem:[%s4812_s0 + $0xf0] sm:$0xff]  ;;  %v3745_v4 = vld [vmem:[%s4812_s0 + $0x28] sm:$0xff]  ;;  %v3768_v5 = vld [vmem:[%s4812_s0 + $0xe0] sm:$0xff] }
  0x3c   :  { %622 = vmatpush.bf16.msra.mxu0 %v619_v53  ;;  %3883 = vmatpush.bf16.msra.mxu1 %v619_v53  ;;  %v3771_v6 = vld [vmem:[%s4812_s0 + $0xf8] sm:$0xff]  ;;  %v3746_v7 = vld [vmem:[%s4812_s0 + $0x30] sm:$0xff]  ;;  %v3769_v8 = vld [vmem:[%s4812_s0 + $0xe8] sm:$0xff] }
  0x3d   :  { %3884 = vmatpush.bf16.msra.mxu2 %v619_v53  ;;  %3885 = vmatpush.bf16.msra.mxu3 %v619_v53  ;;  %v3774_v9 = vld [vmem:[%s4812_s0 + $0x110] sm:$0xff]  ;;  %v3772_v10 = vld [vmem:[%s4812_s0 + $0x100] sm:$0xff]  ;;  %v3784_v11 = vld [vmem:[%s4815_s3 + $0x8] sm:$0xff] }
  0x3e   :  { %v3747_v12 = vld [vmem:[%s4812_s0 + $0x38] sm:$0xff]  ;;  %v3783_v13 = vld [vmem:[%s4815_s3] sm:$0xff]  ;;  %v3773_v16 = vld [vmem:[%s4812_s0 + $0x108] sm:$0xff] }
  0x3f   :  { %v3775_v14 = vld [vmem:[%s4812_s0 + $0x118] sm:$0xff]  ;;  %v4250_v15 = vld [vmem:[%s4814_s2] ss:$0 sm:$0xff]  ;;  %v3785_v25 = vld [vmem:[%s4815_s3 + $0x10] sm:$0xff] }
  0x40   :  { %623 = vmatpush.bf16.msra.mxu0 %v3782_v54  ;;  %3886 = vmatpush.bf16.msra.mxu1 %v3782_v54  ;;  %v3748_v17 = vld [vmem:[%s4812_s0 + $0x40] sm:$0xff]  ;;  %v3786_v22 = vld [vmem:[%s4815_s3 + $0x18] sm:$0xff]  ;;  %v3749_v27 = vld [vmem:[%s4812_s0 + $0x48] sm:$0xff] }
  0x41   :  { %3887 = vmatpush.bf16.msra.mxu2 %v3782_v54  ;;  %3888 = vmatpush.bf16.msra.mxu3 %v3782_v54  ;;  %v3776_v21 = vld [vmem:[%s4812_s0 + $0x120] sm:$0xff]  ;;  %v257_v30 = vld [vmem:[%s4812_s0 + $0x128] sm:$0xf]  ;;  %v3750_v41 = vld [vmem:[%s4812_s0 + $0x50] sm:$0xff] }
  0x42   :  { %v424_v32 = vunpack.c.l.b16 %v257_v30  ;;  %v3788_v40 = vld [vmem:[%s4815_s3 + $0x28] sm:$0xff]  ;;  %v3787_v45 = vld [vmem:[%s4815_s3 + $0x20] sm:$0xff]  ;;  %v3751_v54 = vld [vmem:[%s4812_s0 + $0x58] sm:$0xff] }
  0x43   :  { %v3791_v30 = vld [vmem:[%s4815_s3 + $0x40] sm:$0xff] }
  0x44   :  { %624 = vmatpush.bf16.msra.mxu0 %v3781_v55  ;;  %3889 = vmatpush.bf16.msra.mxu1 %v3781_v55  ;;  %v462_v36 = vpack.c.b16 %v424_v32, %v424_v32 }
  0x45   :  { %3890 = vmatpush.bf16.msra.mxu2 %v3781_v55  ;;  %3891 = vmatpush.bf16.msra.mxu3 %v3781_v55 }
  0x48   :  { %625 = vmatpush.bf16.msra.mxu0 %v3780_v56  ;;  %3892 = vmatpush.bf16.msra.mxu1 %v3780_v56 }
  0x49   :  { %3893 = vmatpush.bf16.msra.mxu2 %v3780_v56  ;;  %3894 = vmatpush.bf16.msra.mxu3 %v3780_v56 }
  0x4c   :  { %626 = vmatpush.bf16.msra.mxu0 %v3779_v57  ;;  %3895 = vmatpush.bf16.msra.mxu1 %v3779_v57 }
  0x4d   :  { %3896 = vmatpush.bf16.msra.mxu2 %v3779_v57  ;;  %3897 = vmatpush.bf16.msra.mxu3 %v3779_v57 }
  0x50   :  { %627 = vmatpush.bf16.msra.mxu0 %v3778_v58  ;;  %3898 = vmatpush.bf16.msra.mxu1 %v3778_v58 }
  0x51   :  { %3899 = vmatpush.bf16.msra.mxu2 %v3778_v58  ;;  %3900 = vmatpush.bf16.msra.mxu3 %v3778_v58 }
  0x54   :  { %628 = vmatpush.bf16.msra.mxu0 %v3777_v59  ;;  %3901 = vmatpush.bf16.msra.mxu1 %v3777_v59 }
  0x55   :  { %3902 = vmatpush.bf16.msra.mxu2 %v3777_v59  ;;  %3903 = vmatpush.bf16.msra.mxu3 %v3777_v59 }
  0x57   :  { %3233 = vmatmul.msk.bf16.vlgmr.msra.gmra.mxu0 %vm502_vm1, %v3740_v60  ;;  %3259 = vmatmul.msk.bf16.vlgmr.msra.gmra.mxu1 %vm502_vm1, %v3766_v0  ;;  %v3790_v60 = vld [vmem:[%s4815_s3 + $0x38] sm:$0xff] }
  0x58   :  { %3263 = vmatmul.msk.bf16.vlgmr.msra.gmra.mxu2 %vm502_vm1, %v3770_v3  ;;  %3267 = vmatmul.msk.bf16.vlgmr.msra.gmra.mxu3 %vm502_vm1, %v3774_v9 }
  0x59   :  { %1004 = vmatpush.bf16.msrb.mxu1 %v3784_v11  ;;  %1055 = vmatpush.bf16.msrb.mxu2 %v3786_v22 }
  0x5a   :  { %1103 = vmatpush.bf16.msrb.mxu3 %v3788_v40 }
  0x5d   :  { %1005 = vmatpush.bf16.msrb.mxu1 %v3783_v13  ;;  %1056 = vmatpush.bf16.msrb.mxu2 %v3785_v25 }
  0x5e   :  { %1104 = vmatpush.bf16.msrb.mxu3 %v3787_v45 }
  0x61   :  { %1151 = vmatpush.bf16.msra.mxu1 %v3790_v60 }
  0x67   :  { %3234 = vmatmul.msk.bf16.gmra.mxu0 %vm502_vm1, %v3741_v61  ;;  %3260 = vmatmul.msk.bf16.gmra.mxu1 %vm502_vm1, %v3767_v2 }
  0x68   :  { %3264 = vmatmul.msk.bf16.gmra.mxu2 %vm502_vm1, %v3771_v6  ;;  %3268 = vmatmul.msk.bf16.gmra.mxu3 %vm502_vm1, %v3775_v14  ;;  %v3752_v6 = vld [vmem:[%s4812_s0 + $0x60] sm:$0xff] }
  0x77   :  { %3235 = vmatmul.msk.bf16.gmra.mxu0 %vm502_vm1, %v3742_v62  ;;  %3261 = vmatmul.msk.bf16.gmra.mxu1 %vm502_vm1, %v3768_v5 }
  0x78   :  { %3265 = vmatmul.msk.bf16.gmra.mxu2 %vm502_vm1, %v3772_v10  ;;  %3269 = vmatmul.msk.bf16.gmra.mxu3 %vm502_vm1, %v3776_v21 }
  0x87   :  { %3236 = vmatmul.msk.bf16.gmra.mxu0 %vm502_vm1, %v3743_v63  ;;  %3262 = vmatmul.msk.bf16.gmra.mxu1 %vm502_vm1, %v3769_v8 }
  0x88   :  { %3266 = vmatmul.msk.bf16.gmra.mxu2 %vm502_vm1, %v3773_v16  ;;  %3270 = vmatmul.msk.bf16.gmra.mxu3 %vm502_vm1, %v462_v36 }
  0x97   :  { %3237 = vmatmul.msk.bf16.gmra.mxu0 %vm502_vm1, %v3744_v1  ;;  %v3789_v1 = vld [vmem:[%s4815_s3 + $0x30] sm:$0xff] }
  0x98   :  { %1152 = vmatpush.bf16.msra.mxu1 %v3789_v1 }
  0xa7   :  { %3238 = vmatmul.msk.bf16.gmra.mxu0 %vm502_vm1, %v3745_v4 }
  0xb7   :  { %3239 = vmatmul.msk.bf16.gmra.mxu0 %vm502_vm1, %v3746_v7 }
  0xc7   :  { %3240 = vmatmul.msk.bf16.gmra.mxu0 %vm502_vm1, %v3747_v12 }
  0xd4   :  { %v630_v18 = vpop.f32.mrf.mxu0  ;;  %v760_v58 = vpop.f32.mrf.mxu1 }
  0xd5   :  { %v631_v19 = vadd.f32 %v4250_v15, %v630_v18  ;;  %v761_v59 = vadd.f32 %v4250_v15, %v760_v58  ;;  %v3794_v58 = vld [vmem:[%s4815_s3 + $0x58] sm:$0xff] }
  0xd6   :  { %1247 = vmatpush.bf16.msra.mxu3 %v3794_v58 }
  0xd7   :  { %v819_v20 = vmax.f32 %v631_v19, 0.0  ;;  %3241 = vmatmul.msk.bf16.gmra.mxu0 %vm502_vm1, %v3748_v17  ;;  %v871_v61 = vmax.f32 %v761_v59, 0.0 }
  0xd9   :  { %895 = vst.msk [vmem:[#allocation2] sm:$0xff] %vm894_vm2, %v819_v20 }
  0xda   :  { %947 = vst.msk [vmem:[#allocation2 + $0x1a0] sm:$0xff] %vm894_vm2, %v871_v61 }
  0xdb   :  { %v800_v1 = vpop.f32.mrf.mxu3 }
  0xdc   :  { %v632_v23 = vpop.f32.mrf.mxu0  ;;  %v762_v3 = vpop.f32.mrf.mxu1 }
  0xdd   :  { %v633_v24 = vadd.f32 %v4250_v15, %v632_v23  ;;  %v763_v5 = vadd.f32 %v4250_v15, %v762_v3  ;;  %v3792_v23 = vld [vmem:[%s4815_s3 + $0x48] sm:$0xff] }
  0xde   :  { %1199 = vmatpush.bf16.msra.mxu2 %v3792_v23 }
  0xdf   :  { %v820_v26 = vmax.f32 %v633_v24, 0.0  ;;  %v872_v7 = vmax.f32 %v763_v5, 0.0  ;;  %v3753_v24 = vld [vmem:[%s4812_s0 + $0x68] sm:$0xff] }
  0xe0   :  { %v971_v33 = vld [vmem:[#allocation2] sm:$0xff] }
  0xe1   :  { %896 = vst.msk [vmem:[#allocation2 + $0x8] sm:$0xff] %vm894_vm2, %v820_v26 }
  0xe2   :  { %948 = vst.msk [vmem:[#allocation2 + $0x1a8] sm:$0xff] %vm894_vm2, %v872_v7  ;;  %1200 = vmatpush.bf16.msra.mxu2 %v3791_v30  ;;  %v801_v7 = vadd.f32 %v4250_v15, %v800_v1 }
  0xe4   :  { %v635_v28 = vpop.f32.mrf.mxu0  ;;  %v765_v13 = vpop.f32.mrf.mxu1 }
  0xe5   :  { %v636_v29 = vadd.f32 %v4250_v15, %v635_v28  ;;  %v766_v16 = vadd.f32 %v4250_v15, %v765_v13 }
  0xe7   :  { %v821_v31 = vmax.f32 %v636_v29, 0.0  ;;  %3242 = vmatmul.msk.bf16.gmra.mxu0 %vm502_vm1, %v3749_v27  ;;  %v873_v17 = vmax.f32 %v766_v16, 0.0  ;;  %v780_v29 = vpop.f32.mrf.mxu2 }
  0xe8   :  { %v972_v34 = vld [vmem:[#allocation2 + $0x8] sm:$0xff] }
  0xe9   :  { %897 = vst.msk [vmem:[#allocation2 + $0x10] sm:$0xff] %vm894_vm2, %v821_v31  ;;  %v974_v35 = vpack.c.bf16 %v972_v34, %v971_v33  ;;  %v781_v34 = vadd.f32 %v4250_v15, %v780_v29 }
  0xea   :  { %949 = vst.msk [vmem:[#allocation2 + $0x1b0] sm:$0xff] %vm894_vm2, %v873_v17  ;;  %v802_v17 = vpop.f32.mrf.mxu3 }
  0xeb   :  { %3279 = vmatmul.msk.bf16.vlgmr.msrb.gmra.mxu1 %vm894_vm2, %v974_v35  ;;  %v879_v36 = vmax.f32 %v781_v34, 0.0  ;;  %v803_v23 = vadd.f32 %v4250_v15, %v802_v17  ;;  %v3756_v34 = vld [vmem:[%s4812_s0 + $0x80] sm:$0xff] }
  0xec   :  { %v637_v37 = vpop.f32.mrf.mxu0  ;;  %v767_v21 = vpop.f32.mrf.mxu1 }
  0xed   :  { %v638_v38 = vadd.f32 %v4250_v15, %v637_v37  ;;  %v768_v22 = vadd.f32 %v4250_v15, %v767_v21  ;;  %955 = vst.msk [vmem:[#allocation2 + $0x1e0] sm:$0xff] %vm894_vm2, %v879_v36 }
  0xef   :  { %v822_v39 = vmax.f32 %v638_v38, 0.0  ;;  %v874_v25 = vmax.f32 %v768_v22, 0.0  ;;  %v782_v40 = vpop.f32.mrf.mxu2 }
  0xf0   :  { %v973_v44 = vld [vmem:[#allocation2 + $0x10] sm:$0xff] }
  0xf1   :  { %898 = vst.msk [vmem:[#allocation2 + $0x18] sm:$0xff] %vm894_vm2, %v822_v39  ;;  %v975_v47 = vpack.c.bf16 %v973_v44, %v973_v44 }
  0xf2   :  { %950 = vst.msk [vmem:[#allocation2 + $0x1b8] sm:$0xff] %vm894_vm2, %v874_v25  ;;  %v888_v25 = vmax.f32 %v803_v23, 0.0  ;;  %v805_v29 = vpop.f32.mrf.mxu3 }
  0xf4   :  { %v640_v42 = vpop.f32.mrf.mxu0  ;;  %v770_v32 = vpop.f32.mrf.mxu1  ;;  %964 = vst.msk [vmem:[#allocation2 + $0x228] sm:$0xff] %vm894_vm2, %v888_v25 }
  0xf5   :  { %v641_v43 = vadd.f32 %v4250_v15, %v640_v42  ;;  %v771_v35 = vadd.f32 %v4250_v15, %v770_v32  ;;  %v806_v32 = vadd.f32 %v4250_v15, %v805_v29 }
  0xf7   :  { %v823_v46 = vmax.f32 %v641_v43, 0.0  ;;  %3243 = vmatmul.msk.bf16.gmra.mxu0 %vm502_vm1, %v3750_v41  ;;  %v875_v37 = vmax.f32 %v771_v35, 0.0  ;;  %v889_v36 = vmax.f32 %v806_v32, 0.0  ;;  %v3759_v32 = vld [vmem:[%s4812_s0 + $0x98] sm:$0xff] }
  0xf8   :  { %v1022_v51 = vld [vmem:[#allocation2 + $0x18] sm:$0xff] }
  0xf9   :  { %899 = vst.msk [vmem:[#allocation2 + $0x20] sm:$0xff] %vm894_vm2, %v823_v46  ;;  %v783_v46 = vadd.f32 %v4250_v15, %v782_v40 }
  0xfa   :  { %951 = vst.msk [vmem:[#allocation2 + $0x1c0] sm:$0xff] %vm894_vm2, %v875_v37 }
  0xfb   :  { %3280 = vmatmul.msk.bf16.gmra.mxu1 %vm894_vm2, %v975_v47  ;;  %965 = vst.msk [vmem:[#allocation2 + $0x230] sm:$0xff] %vm894_vm2, %v889_v36 }
  0xfc   :  { %v642_v48 = vpop.f32.mrf.mxu0  ;;  %v772_v44 = vpop.f32.mrf.mxu1 }
  0xfd   :  { %v643_v49 = vadd.f32 %v4250_v15, %v642_v48  ;;  %v773_v47 = vadd.f32 %v4250_v15, %v772_v44  ;;  %v3754_v48 = vld [vmem:[%s4812_s0 + $0x70] sm:$0xff] }
  0xff   :  { %v824_v50 = vmax.f32 %v643_v49, 0.0  ;;  %v880_v49 = vmax.f32 %v783_v46, 0.0 }
 0x100   :  { %v1023_v52 = vld [vmem:[#allocation2 + $0x20] sm:$0xff] }
 0x101   :  { %900 = vst.msk [vmem:[#allocation2 + $0x28] sm:$0xff] %vm894_vm2, %v824_v50  ;;  %v1025_v53 = vpack.c.bf16 %v1023_v52, %v1022_v51  ;;  %v876_v50 = vmax.f32 %v773_v47, 0.0 }
 0x102   :  { %956 = vst.msk [vmem:[#allocation2 + $0x1e8] sm:$0xff] %vm894_vm2, %v880_v49 }
 0x103   :  { %3289 = vmatmul.msk.bf16.vlgmr.msrb.gmra.mxu2 %vm894_vm2, %v1025_v53  ;;  %952 = vst.msk [vmem:[#allocation2 + $0x1c8] sm:$0xff] %vm894_vm2, %v876_v50  ;;  %v785_v53 = vpop.f32.mrf.mxu2 }
 0x104   :  { %v645_v55 = vpop.f32.mrf.mxu0 }
 0x105   :  { %v646_v56 = vadd.f32 %v4250_v15, %v645_v55  ;;  %v775_v55 = vpop.f32.mrf.mxu1 }
 0x107   :  { %v825_v57 = vmax.f32 %v646_v56, 0.0  ;;  %3244 = vmatmul.msk.bf16.gmra.mxu0 %vm502_vm1, %v3751_v54  ;;  %v786_v56 = vadd.f32 %v4250_v15, %v785_v53 }
 0x108   :  { %v1024_v0 = vld [vmem:[#allocation2 + $0x28] sm:$0xff] }
 0x109   :  { %901 = vst.msk [vmem:[#allocation2 + $0x30] sm:$0xff] %vm894_vm2, %v825_v57  ;;  %v1026_v4 = vpack.c.bf16 %v1024_v0, %v1024_v0  ;;  %v776_v57 = vadd.f32 %v4250_v15, %v775_v55  ;;  %v881_v59 = vmax.f32 %v786_v56, 0.0 }
 0x10b   :  { %v877_v60 = vmax.f32 %v776_v57, 0.0  ;;  %957 = vst.msk [vmem:[#allocation2 + $0x1f0] sm:$0xff] %vm894_vm2, %v881_v59  ;;  %v787_v0 = vpop.f32.mrf.mxu2  ;;  %v3757_v59 = vld [vmem:[%s4812_s0 + $0x88] sm:$0xff] }
 0x10c   :  { %v647_v62 = vpop.f32.mrf.mxu0 }
 0x10d   :  { %v648_v63 = vadd.f32 %v4250_v15, %v647_v62  ;;  %953 = vst.msk [vmem:[#allocation2 + $0x1d0] sm:$0xff] %vm894_vm2, %v877_v60 }
 0x10f   :  { %v826_v2 = vmax.f32 %v648_v63, 0.0 }
 0x110   :  { %v1070_v11 = vld [vmem:[#allocation2 + $0x30] sm:$0xff] }
 0x111   :  { %902 = vst.msk [vmem:[#allocation2 + $0x38] sm:$0xff] %vm894_vm2, %v826_v2  ;;  %v3793_v2 = vld [vmem:[%s4815_s3 + $0x50] sm:$0xff] }
 0x112   :  { %1248 = vmatpush.bf16.msra.mxu3 %v3793_v2 }
 0x113   :  { %3290 = vmatmul.msk.bf16.gmra.mxu2 %vm894_vm2, %v1026_v4  ;;  %v777_v4 = vpop.f32.mrf.mxu1  ;;  %v790_v16 = vpop.f32.mrf.mxu2 }
 0x114   :  { %v650_v8 = vpop.f32.mrf.mxu0  ;;  %v791_v22 = vadd.f32 %v4250_v15, %v790_v16  ;;  %v3758_v16 = vld [vmem:[%s4812_s0 + $0x90] sm:$0xff] }
 0x115   :  { %v651_v9 = vadd.f32 %v4250_v15, %v650_v8  ;;  %v778_v8 = vadd.f32 %v4250_v15, %v777_v4  ;;  %v3798_v4 = vld [vmem:[%s4815_s3 + $0x78] sm:$0xff] }
 0x116   :  { %1343 = vmatpush.bf16.msrb.mxu2 %v3798_v4 }
 0x117   :  { %v827_v10 = vmax.f32 %v651_v9, 0.0  ;;  %3245 = vmatmul.msk.bf16.gmra.mxu0 %vm502_vm1, %v3752_v6  ;;  %v788_v6 = vadd.f32 %v4250_v15, %v787_v0  ;;  %v3755_v9 = vld [vmem:[%s4812_s0 + $0x78] sm:$0xff] }
 0x118   :  { %v1071_v12 = vld [vmem:[#allocation2 + $0x38] sm:$0xff] }
 0x119   :  { %903 = vst.msk [vmem:[#allocation2 + $0x40] sm:$0xff] %vm894_vm2, %v827_v10  ;;  %v1073_v14 = vpack.c.bf16 %v1071_v12, %v1070_v11  ;;  %v882_v10 = vmax.f32 %v788_v6, 0.0  ;;  %v887_v11 = vmax.f32 %v801_v7, 0.0  ;;  %v878_v12 = vmax.f32 %v778_v8, 0.0 }
 0x11b   :  { %3299 = vmatmul.msk.bf16.vlgmr.msrb.gmra.mxu3 %vm894_vm2, %v1073_v14  ;;  %958 = vst.msk [vmem:[#allocation2 + $0x1f8] sm:$0xff] %vm894_vm2, %v882_v10  ;;  %v3797_v10 = vld [vmem:[%s4815_s3 + $0x70] sm:$0xff] }
 0x11c   :  { %v652_v18 = vpop.f32.mrf.mxu0  ;;  %963 = vst.msk [vmem:[#allocation2 + $0x220] sm:$0xff] %vm894_vm2, %v887_v11  ;;  %1344 = vmatpush.bf16.msrb.mxu2 %v3797_v10 }
 0x11d   :  { %v653_v19 = vadd.f32 %v4250_v15, %v652_v18  ;;  %954 = vst.msk [vmem:[#allocation2 + $0x1d8] sm:$0xff] %vm894_vm2, %v878_v12 }
 0x11f   :  { %v828_v20 = vmax.f32 %v653_v19, 0.0 }
 0x120   :  { %v1072_v28 = vld [vmem:[#allocation2 + $0x40] sm:$0xff] }
 0x121   :  { %904 = vst.msk [vmem:[#allocation2 + $0x48] sm:$0xff] %vm894_vm2, %v828_v20  ;;  %v1074_v33 = vpack.c.bf16 %v1072_v28, %v1072_v28  ;;  %v792_v28 = vpop.f32.mrf.mxu2 }
 0x124   :  { %v655_v26 = vpop.f32.mrf.mxu0 }
 0x125   :  { %v656_v27 = vadd.f32 %v4250_v15, %v655_v26 }
 0x127   :  { %v829_v31 = vmax.f32 %v656_v27, 0.0  ;;  %3246 = vmatmul.msk.bf16.gmra.mxu0 %vm502_vm1, %v3753_v24  ;;  %v883_v24 = vmax.f32 %v791_v22, 0.0 }
 0x128   :  { %v1118_v42 = vld [vmem:[#allocation2 + $0x48] sm:$0xff] }
 0x129   :  { %905 = vst.msk [vmem:[#allocation2 + $0x50] sm:$0xff] %vm894_vm2, %v829_v31  ;;  %v793_v31 = vadd.f32 %v4250_v15, %v792_v28  ;;  %v795_v40 = vpop.f32.mrf.mxu2 }
 0x12a   :  { %959 = vst.msk [vmem:[#allocation2 + $0x200] sm:$0xff] %vm894_vm2, %v883_v24 }
 0x12b   :  { %3300 = vmatmul.msk.bf16.gmra.mxu3 %vm894_vm2, %v1074_v33  ;;  %v3796_v33 = vld [vmem:[%s4815_s3 + $0x68] sm:$0xff]  ;;  %v884_v35 = vmax.f32 %v793_v31, 0.0 }
 0x12c   :  { %v657_v38 = vpop.f32.mrf.mxu0  ;;  %1295 = vmatpush.bf16.msrb.mxu1 %v3796_v33  ;;  %v3800_v31 = vld [vmem:[%s4815_s3 + $0x88] sm:$0xff] }
 0x12d   :  { %v658_v39 = vadd.f32 %v4250_v15, %v657_v38  ;;  %960 = vst.msk [vmem:[#allocation2 + $0x208] sm:$0xff] %vm894_vm2, %v884_v35  ;;  %1391 = vmatpush.bf16.msrb.mxu3 %v3800_v31 }
 0x12f   :  { %v830_v41 = vmax.f32 %v658_v39, 0.0 }
 0x130   :  { %v1119_v43 = vld [vmem:[#allocation2 + $0x50] sm:$0xff] }
 0x131   :  { %906 = vst.msk [vmem:[#allocation2 + $0x58] sm:$0xff] %vm894_vm2, %v830_v41  ;;  %v1121_v45 = vpack.c.bf16 %v1119_v43, %v1118_v42  ;;  %v807_v41 = vpop.f32.mrf.mxu3  ;;  %v3795_v42 = vld [vmem:[%s4815_s3 + $0x60] sm:$0xff]  ;;  %v797_v55 = vpop.f32.mrf.mxu2 }
 0x132   :  { %1296 = vmatpush.bf16.msrb.mxu1 %v3795_v42  ;;  %v808_v46 = vadd.f32 %v4250_v15, %v807_v41  ;;  %v798_v57 = vadd.f32 %v4250_v15, %v797_v55 }
 0x133   :  { %3309 = vmatmul.msk.bf16.vlgmr.msra.gmra.mxu1 %vm894_vm2, %v1121_v45  ;;  %v796_v45 = vadd.f32 %v4250_v15, %v795_v40 }
 0x134   :  { %v660_v51 = vpop.f32.mrf.mxu0  ;;  %v886_v60 = vmax.f32 %v798_v57, 0.0 }
 0x135   :  { %v661_v52 = vadd.f32 %v4250_v15, %v660_v51  ;;  %v885_v47 = vmax.f32 %v796_v45, 0.0 }
 0x136   :  { %962 = vst.msk [vmem:[#allocation2 + $0x218] sm:$0xff] %vm894_vm2, %v886_v60 }
 0x137   :  { %v831_v54 = vmax.f32 %v661_v52, 0.0  ;;  %3247 = vmatmul.msk.bf16.gmra.mxu0 %vm502_vm1, %v3754_v48  ;;  %v890_v48 = vmax.f32 %v808_v46, 0.0  ;;  %961 = vst.msk [vmem:[#allocation2 + $0x210] sm:$0xff] %vm894_vm2, %v885_v47 }
 0x138   :  { %v1120_v63 = vld [vmem:[#allocation2 + $0x58] sm:$0xff] }
 0x139   :  { %907 = vst.msk [vmem:[#allocation2 + $0x60] sm:$0xff] %vm894_vm2, %v831_v54  ;;  %v1122_v5 = vpack.c.bf16 %v1120_v63, %v1120_v63  ;;  %v810_v51 = vpop.f32.mrf.mxu3 }
 0x13a   :  { %966 = vst.msk [vmem:[#allocation2 + $0x238] sm:$0xff] %vm894_vm2, %v890_v48  ;;  %v811_v58 = vadd.f32 %v4250_v15, %v810_v51 }
 0x13c   :  { %v662_v61 = vpop.f32.mrf.mxu0 }
 0x13d   :  { %v663_v62 = vadd.f32 %v4250_v15, %v662_v61  ;;  %v891_v61 = vmax.f32 %v811_v58, 0.0 }
 0x13f   :  { %v832_v3 = vmax.f32 %v663_v62, 0.0  ;;  %967 = vst.msk [vmem:[#allocation2 + $0x240] sm:$0xff] %vm894_vm2, %v891_v61 }
 0x140   :  { %v1166_v19 = vld [vmem:[#allocation2 + $0x60] sm:$0xff] }
 0x141   :  { %908 = vst.msk [vmem:[#allocation2 + $0x68] sm:$0xff] %vm894_vm2, %v832_v3  ;;  %v812_v0 = vpop.f32.mrf.mxu3 }
 0x142   :  { %v813_v3 = vadd.f32 %v4250_v15, %v812_v0 }
 0x143   :  { %3310 = vmatmul.msk.bf16.gmra.mxu1 %vm894_vm2, %v1122_v5 }
 0x144   :  { %v665_v13 = vpop.f32.mrf.mxu0  ;;  %v892_v5 = vmax.f32 %v813_v3, 0.0 }
 0x145   :  { %v666_v14 = vadd.f32 %v4250_v15, %v665_v13 }
 0x146   :  { %968 = vst.msk [vmem:[#allocation2 + $0x248] sm:$0xff] %vm894_vm2, %v892_v5 }
 0x147   :  { %v833_v18 = vmax.f32 %v666_v14, 0.0  ;;  %3248 = vmatmul.msk.bf16.gmra.mxu0 %vm502_vm1, %v3755_v9 }
 0x148   :  { %v1167_v20 = vld [vmem:[#allocation2 + $0x68] sm:$0xff] }
 0x149   :  { %909 = vst.msk [vmem:[#allocation2 + $0x70] sm:$0xff] %vm894_vm2, %v833_v18  ;;  %v1169_v21 = vpack.c.bf16 %v1167_v20, %v1166_v19  ;;  %v815_v9 = vpop.f32.mrf.mxu3 }
 0x14a   :  { %v816_v14 = vadd.f32 %v4250_v15, %v815_v9 }
 0x14b   :  { %3319 = vmatmul.msk.bf16.vlgmr.msra.gmra.mxu2 %vm894_vm2, %v1169_v21 }
 0x14c   :  { %v667_v26 = vpop.f32.mrf.mxu0  ;;  %v893_v17 = vmax.f32 %v816_v14, 0.0 }
 0x14d   :  { %v668_v27 = vadd.f32 %v4250_v15, %v667_v26 }
 0x14e   :  { %969 = vst.msk [vmem:[#allocation2 + $0x250] sm:$0xff] %vm894_vm2, %v893_v17 }
 0x14f   :  { %v834_v30 = vmax.f32 %v668_v27, 0.0 }
 0x150   :  { %v1168_v39 = vld [vmem:[#allocation2 + $0x70] sm:$0xff] }
 0x151   :  { %910 = vst.msk [vmem:[#allocation2 + $0x78] sm:$0xff] %vm894_vm2, %v834_v30  ;;  %v1170_v44 = vpack.c.bf16 %v1168_v39, %v1168_v39  ;;  %v817_v20 = vpop.f32.mrf.mxu3  ;;  %v4457_v30 = vld [vmem:[%s4816_s4] ss:$0 sm:$0xff] }
 0x152   :  { %v3762_v20 = vld [vmem:[%s4812_s0 + $0xb0] sm:$0xff] }
 0x154   :  { %v670_v37 = vpop.f32.mrf.mxu0 }
 0x155   :  { %v671_v38 = vadd.f32 %v4250_v15, %v670_v37 }
 0x157   :  { %v835_v43 = vmax.f32 %v671_v38, 0.0  ;;  %3249 = vmatmul.msk.bf16.gmra.mxu0 %vm502_vm1, %v3756_v34  ;;  %v3799_v38 = vld [vmem:[%s4815_s3 + $0x80] sm:$0xff] }
 0x158   :  { %v1214_v53 = vld [vmem:[#allocation2 + $0x78] sm:$0xff]  ;;  %1392 = vmatpush.bf16.msrb.mxu3 %v3799_v38 }
 0x159   :  { %911 = vst.msk [vmem:[#allocation2 + $0x80] sm:$0xff] %vm894_vm2, %v835_v43  ;;  %v3763_v38 = vld [vmem:[%s4812_s0 + $0xb8] sm:$0xff] }
 0x15b   :  { %3320 = vmatmul.msk.bf16.gmra.mxu2 %vm894_vm2, %v1170_v44 }
 0x15c   :  { %v672_v49 = vpop.f32.mrf.mxu0 }
 0x15d   :  { %v673_v50 = vadd.f32 %v4250_v15, %v672_v49  ;;  %v3760_v49 = vld [vmem:[%s4812_s0 + $0xa0] sm:$0xff] }
 0x15f   :  { %v836_v52 = vmax.f32 %v673_v50, 0.0 }
 0x160   :  { %v1215_v54 = vld [vmem:[#allocation2 + $0x80] sm:$0xff] }
 0x161   :  { %912 = vst.msk [vmem:[#allocation2 + $0x88] sm:$0xff] %vm894_vm2, %v836_v52  ;;  %v1217_v56 = vpack.c.bf16 %v1215_v54, %v1214_v53 }
 0x163   :  { %3329 = vmatmul.msk.bf16.vlgmr.msra.gmra.mxu3 %vm894_vm2, %v1217_v56  ;;  %v3802_v56 = vld [vmem:[%s4815_s3 + $0x98] sm:$0xff] }
 0x164   :  { %v675_v62 = vpop.f32.mrf.mxu0  ;;  %1439 = vmatpush.bf16.msra.mxu1 %v3802_v56 }
 0x165   :  { %v676_v63 = vadd.f32 %v4250_v15, %v675_v62  ;;  %v3801_v62 = vld [vmem:[%s4815_s3 + $0x90] sm:$0xff] }
 0x167   :  { %v837_v1 = vmax.f32 %v676_v63, 0.0  ;;  %3250 = vmatmul.msk.bf16.gmra.mxu0 %vm502_vm1, %v3757_v59 }
 0x168   :  { %v1007_v2 = vpop.f32.mrf.mxu1  ;;  %v1216_v8 = vld [vmem:[#allocation2 + $0x88] sm:$0xff]  ;;  %1440 = vmatpush.bf16.msra.mxu1 %v3801_v62 }
 0x169   :  { %913 = vst.msk [vmem:[#allocation2 + $0x90] sm:$0xff] %vm894_vm2, %v837_v1  ;;  %v1218_v13 = vpack.c.bf16 %v1216_v8, %v1216_v8  ;;  %v1019_v34 = vadd.f32 %v4457_v30, %v1007_v2  ;;  %v3761_v2 = vld [vmem:[%s4812_s0 + $0xa8] sm:$0xff] }
 0x16c   :  { %v677_v6 = vpop.f32.mrf.mxu0 }
 0x16d   :  { %v678_v7 = vadd.f32 %v4250_v15, %v677_v6 }
 0x16f   :  { %v838_v11 = vmax.f32 %v678_v7, 0.0 }
 0x170   :  { %v4440_v12 = vpop.f32.mrf.mxu1  ;;  %v1262_v23 = vld [vmem:[#allocation2 + $0x90] sm:$0xff] }
 0x171   :  { %914 = vst.msk [vmem:[#allocation2 + $0x98] sm:$0xff] %vm894_vm2, %v838_v11 }
 0x173   :  { %3330 = vmatmul.msk.bf16.gmra.mxu3 %vm894_vm2, %v1218_v13 }
 0x174   :  { %v680_v18 = vpop.f32.mrf.mxu0 }
 0x175   :  { %v681_v19 = vadd.f32 %v4250_v15, %v680_v18 }
 0x177   :  { %v839_v21 = vmax.f32 %v681_v19, 0.0  ;;  %3251 = vmatmul.msk.bf16.gmra.mxu0 %vm502_vm1, %v3758_v16  ;;  %v3804_v19 = vld [vmem:[%s4815_s3 + $0xa8] sm:$0xff] }
 0x178   :  { %v1012_v22 = vpop.f32.mrf.mxu1  ;;  %v1263_v24 = vld [vmem:[#allocation2 + $0x98] sm:$0xff]  ;;  %1487 = vmatpush.bf16.msra.mxu2 %v3804_v19 }
 0x179   :  { %915 = vst.msk [vmem:[#allocation2 + $0xa0] sm:$0xff] %vm894_vm2, %v839_v21  ;;  %v1265_v25 = vpack.c.bf16 %v1263_v24, %v1262_v23  ;;  %v1021_v51 = vadd.f32 %v4457_v30, %v1012_v22 }
 0x17b   :  { %3339 = vmatmul.msk.bf16.vlgmr.msrb.gmra.mxu1 %vm894_vm2, %v1265_v25  ;;  %v3803_v25 = vld [vmem:[%s4815_s3 + $0xa0] sm:$0xff] }
 0x17c   :  { %v682_v26 = vpop.f32.mrf.mxu0  ;;  %1488 = vmatpush.bf16.msra.mxu2 %v3803_v25 }
 0x17d   :  { %v683_v27 = vadd.f32 %v4250_v15, %v682_v26 }
 0x17f   :  { %v840_v28 = vmax.f32 %v683_v27, 0.0 }
 0x180   :  { %v1014_v29 = vpop.f32.mrf.mxu1  ;;  %v1264_v37 = vld [vmem:[#allocation2 + $0xa0] sm:$0xff] }
 0x181   :  { %916 = vst.msk [vmem:[#allocation2 + $0xa8] sm:$0xff] %vm894_vm2, %v840_v28  ;;  %v1266_v41 = vpack.c.bf16 %v1264_v37, %v1264_v37 }
 0x184   :  { %v685_v33 = vpop.f32.mrf.mxu0 }
 0x185   :  { %v686_v35 = vadd.f32 %v4250_v15, %v685_v33 }
 0x186   :  { %v1058_v36 = vpop.f32.mrf.mxu2 }
 0x187   :  { %v841_v39 = vmax.f32 %v686_v35, 0.0  ;;  %v1067_v40 = vadd.f32 %v1058_v36, %v1019_v34  ;;  %3252 = vmatmul.msk.bf16.gmra.mxu0 %vm502_vm1, %v3759_v32 }
 0x188   :  { %v1310_v46 = vld [vmem:[#allocation2 + $0xa8] sm:$0xff] }
 0x189   :  { %917 = vst.msk [vmem:[#allocation2 + $0xb0] sm:$0xff] %vm894_vm2, %v841_v39 }
 0x18b   :  { %3340 = vmatmul.msk.bf16.gmra.mxu1 %vm894_vm2, %v1266_v41 }
 0x18c   :  { %v687_v42 = vpop.f32.mrf.mxu0 }
 0x18d   :  { %v688_v43 = vadd.f32 %v4250_v15, %v687_v42 }
 0x18e   :  { %v4475_v44 = vpop.f32.mrf.mxu2 }
 0x18f   :  { %v842_v45 = vmax.f32 %v688_v43, 0.0  ;;  %v3806_v43 = vld [vmem:[%s4815_s3 + $0xb8] sm:$0xff] }
 0x190   :  { %v1311_v47 = vld [vmem:[#allocation2 + $0xb0] sm:$0xff]  ;;  %1535 = vmatpush.bf16.msra.mxu3 %v3806_v43 }
 0x191   :  { %918 = vst.msk [vmem:[#allocation2 + $0xb8] sm:$0xff] %vm894_vm2, %v842_v45  ;;  %v1313_v48 = vpack.c.bf16 %v1311_v47, %v1310_v46 }
 0x193   :  { %3349 = vmatmul.msk.bf16.vlgmr.msrb.gmra.mxu2 %vm894_vm2, %v1313_v48 }
 0x194   :  { %v690_v50 = vpop.f32.mrf.mxu0 }
 0x195   :  { %v691_v52 = vadd.f32 %v4250_v15, %v690_v50 }
 0x196   :  { %v1063_v53 = vpop.f32.mrf.mxu2 }
 0x197   :  { %v843_v54 = vmax.f32 %v691_v52, 0.0  ;;  %v1069_v55 = vadd.f32 %v1063_v53, %v1021_v51  ;;  %3253 = vmatmul.msk.bf16.gmra.mxu0 %vm502_vm1, %v3760_v49  ;;  %v3805_v49 = vld [vmem:[%s4815_s3 + $0xb0] sm:$0xff]  ;;  %v3764_v53 = vld [vmem:[%s4812_s0 + $0xc0] sm:$0xff] }
 0x198   :  { %v1312_v61 = vld [vmem:[#allocation2 + $0xb8] sm:$0xff]  ;;  %1536 = vmatpush.bf16.msra.mxu3 %v3805_v49 }
 0x199   :  { %919 = vst.msk [vmem:[#allocation2 + $0xc0] sm:$0xff] %vm894_vm2, %v843_v54  ;;  %v1314_v1 = vpack.c.bf16 %v1312_v61, %v1312_v61 }
 0x19c   :  { %v692_v57 = vpop.f32.mrf.mxu0 }
 0x19d   :  { %v693_v58 = vadd.f32 %v4250_v15, %v692_v57 }
 0x19e   :  { %v1065_v59 = vpop.f32.mrf.mxu2  ;;  %v1106_v60 = vpop.f32.mrf.mxu3 }
 0x19f   :  { %v844_v63 = vmax.f32 %v693_v58, 0.0  ;;  %v1115_v0 = vadd.f32 %v1106_v60, %v1067_v40 }
 0x1a0   :  { %v1358_v7 = vld [vmem:[#allocation2 + $0xc0] sm:$0xff] }
 0x1a1   :  { %920 = vst.msk [vmem:[#allocation2 + $0xc8] sm:$0xff] %vm894_vm2, %v844_v63 }
 0x1a3   :  { %3350 = vmatmul.msk.bf16.gmra.mxu2 %vm894_vm2, %v1314_v1 }
 0x1a4   :  { %v695_v3 = vpop.f32.mrf.mxu0 }
 0x1a5   :  { %v696_v4 = vadd.f32 %v4250_v15, %v695_v3  ;;  %v3765_v3 = vld [vmem:[%s4812_s0 + $0xc8] sm:$0xff] }
 0x1a6   :  { %v4499_v5 = vpop.f32.mrf.mxu3 }
 0x1a7   :  { %v845_v6 = vmax.f32 %v696_v4, 0.0  ;;  %3254 = vmatmul.msk.bf16.gmra.mxu0 %vm502_vm1, %v3761_v2  ;;  %v3808_v2 = vld [vmem:[%s4815_s3 + $0xc8] sm:$0xff] }
 0x1a8   :  { %v1359_v8 = vld [vmem:[#allocation2 + $0xc8] sm:$0xff]  ;;  %1583 = vmatpush.bf16.msrb.mxu1 %v3808_v2 }
 0x1a9   :  { %921 = vst.msk [vmem:[#allocation2 + $0xd0] sm:$0xff] %vm894_vm2, %v845_v6  ;;  %v1361_v9 = vpack.c.bf16 %v1359_v8, %v1358_v7 }
 0x1ab   :  { %3359 = vmatmul.msk.bf16.vlgmr.msrb.gmra.mxu3 %vm894_vm2, %v1361_v9 }
 0x1ac   :  { %v697_v10 = vpop.f32.mrf.mxu0 }
 0x1ad   :  { %v698_v11 = vadd.f32 %v4250_v15, %v697_v10  ;;  %v3807_v10 = vld [vmem:[%s4815_s3 + $0xc0] sm:$0xff] }
 0x1ae   :  { %v1111_v13 = vpop.f32.mrf.mxu3  ;;  %1584 = vmatpush.bf16.msrb.mxu1 %v3807_v10 }
 0x1af   :  { %v846_v14 = vmax.f32 %v698_v11, 0.0  ;;  %v1117_v16 = vadd.f32 %v1111_v13, %v1069_v55 }
 0x1b0   :  { %v1154_v17 = vpop.f32.mrf.mxu1  ;;  %v1360_v24 = vld [vmem:[#allocation2 + $0xd0] sm:$0xff] }
 0x1b1   :  { %922 = vst.msk [vmem:[#allocation2 + $0xd8] sm:$0xff] %vm894_vm2, %v846_v14  ;;  %v1163_v18 = vadd.f32 %v1154_v17, %v1115_v0  ;;  %v1362_v28 = vpack.c.bf16 %v1360_v24, %v1360_v24 }
 0x1b4   :  { %v700_v21 = vpop.f32.mrf.mxu0 }
 0x1b5   :  { %v701_v22 = vadd.f32 %v4250_v15, %v700_v21 }
 0x1b6   :  { %v1113_v23 = vpop.f32.mrf.mxu3 }
 0x1b7   :  { %v847_v26 = vmax.f32 %v701_v22, 0.0  ;;  %3255 = vmatmul.msk.bf16.gmra.mxu0 %vm502_vm1, %v3762_v20 }
 0x1b8   :  { %v4517_v27 = vpop.f32.mrf.mxu1  ;;  %v1406_v34 = vld [vmem:[#allocation2 + $0xd8] sm:$0xff] }
 0x1b9   :  { %923 = vst.msk [vmem:[#allocation2 + $0xe0] sm:$0xff] %vm894_vm2, %v847_v26 }
 0x1bb   :  { %3360 = vmatmul.msk.bf16.gmra.mxu3 %vm894_vm2, %v1362_v28 }
 0x1bc   :  { %v702_v29 = vpop.f32.mrf.mxu0 }
 0x1bd   :  { %v703_v31 = vadd.f32 %v4250_v15, %v702_v29 }
 0x1bf   :  { %v848_v32 = vmax.f32 %v703_v31, 0.0 }
 0x1c0   :  { %v1159_v33 = vpop.f32.mrf.mxu1  ;;  %v1407_v35 = vld [vmem:[#allocation2 + $0xe0] sm:$0xff] }
 0x1c1   :  { %924 = vst.msk [vmem:[#allocation2 + $0xe8] sm:$0xff] %vm894_vm2, %v848_v32  ;;  %v1165_v36 = vadd.f32 %v1159_v33, %v1117_v16  ;;  %v1409_v37 = vpack.c.bf16 %v1407_v35, %v1406_v34  ;;  %v3810_v32 = vld [vmem:[%s4815_s3 + $0xd8] sm:$0xff] }
 0x1c2   :  { %1631 = vmatpush.bf16.msrb.mxu2 %v3810_v32 }
 0x1c3   :  { %3369 = vmatmul.msk.bf16.vlgmr.msra.gmra.mxu1 %vm894_vm2, %v1409_v37  ;;  %v3809_v37 = vld [vmem:[%s4815_s3 + $0xd0] sm:$0xff] }
 0x1c4   :  { %v705_v39 = vpop.f32.mrf.mxu0 }
 0x1c5   :  { %v706_v40 = vadd.f32 %v4250_v15, %v705_v39 }
 0x1c6   :  { %1632 = vmatpush.bf16.msrb.mxu2 %v3809_v37 }
 0x1c7   :  { %v849_v41 = vmax.f32 %v706_v40, 0.0  ;;  %3256 = vmatmul.msk.bf16.gmra.mxu0 %vm502_vm1, %v3763_v38 }
 0x1c8   :  { %v1161_v42 = vpop.f32.mrf.mxu1  ;;  %v1408_v48 = vld [vmem:[#allocation2 + $0xe8] sm:$0xff] }
 0x1c9   :  { %925 = vst.msk [vmem:[#allocation2 + $0xf0] sm:$0xff] %vm894_vm2, %v849_v41  ;;  %v1410_v52 = vpack.c.bf16 %v1408_v48, %v1408_v48 }
 0x1cc   :  { %v707_v45 = vpop.f32.mrf.mxu0 }
 0x1cd   :  { %v708_v46 = vadd.f32 %v4250_v15, %v707_v45 }
 0x1ce   :  { %v1202_v47 = vpop.f32.mrf.mxu2 }
 0x1cf   :  { %v850_v50 = vmax.f32 %v708_v46, 0.0  ;;  %v1211_v51 = vadd.f32 %v1202_v47, %v1163_v18 }
 0x1d0   :  { %v1454_v58 = vld [vmem:[#allocation2 + $0xf0] sm:$0xff] }
 0x1d1   :  { %926 = vst.msk [vmem:[#allocation2 + $0xf8] sm:$0xff] %vm894_vm2, %v850_v50 }
 0x1d3   :  { %3370 = vmatmul.msk.bf16.gmra.mxu1 %vm894_vm2, %v1410_v52 }
 0x1d4   :  { %v710_v54 = vpop.f32.mrf.mxu0 }
 0x1d5   :  { %v711_v55 = vadd.f32 %v4250_v15, %v710_v54  ;;  %v3812_v54 = vld [vmem:[%s4815_s3 + $0xe8] sm:$0xff] }
 0x1d6   :  { %v4543_v56 = vpop.f32.mrf.mxu2  ;;  %1679 = vmatpush.bf16.msrb.mxu3 %v3812_v54 }
 0x1d7   :  { %v851_v57 = vmax.f32 %v711_v55, 0.0  ;;  %3257 = vmatmul.msk.bf16.gmra.mxu0 %vm502_vm1, %v3764_v53 }
 0x1d8   :  { %v1455_v59 = vld [vmem:[#allocation2 + $0xf8] sm:$0xff] }
 0x1d9   :  { %927 = vst.msk [vmem:[#allocation2 + $0x100] sm:$0xff] %vm894_vm2, %v851_v57  ;;  %v1457_v60 = vpack.c.bf16 %v1455_v59, %v1454_v58 }
 0x1db   :  { %3379 = vmatmul.msk.bf16.vlgmr.msra.gmra.mxu2 %vm894_vm2, %v1457_v60  ;;  %v3811_v60 = vld [vmem:[%s4815_s3 + $0xe0] sm:$0xff] }
 0x1dc   :  { %v712_v61 = vpop.f32.mrf.mxu0  ;;  %1680 = vmatpush.bf16.msrb.mxu3 %v3811_v60 }
 0x1dd   :  { %v713_v62 = vadd.f32 %v4250_v15, %v712_v61 }
 0x1de   :  { %v1207_v63 = vpop.f32.mrf.mxu2 }
 0x1df   :  { %v852_v0 = vmax.f32 %v713_v62, 0.0  ;;  %v1213_v1 = vadd.f32 %v1207_v63, %v1165_v36 }
 0x1e0   :  { %v1456_v9 = vld [vmem:[#allocation2 + $0x100] sm:$0xff] }
 0x1e1   :  { %928 = vst.msk [vmem:[#allocation2 + $0x108] sm:$0xff] %vm894_vm2, %v852_v0  ;;  %v1458_v14 = vpack.c.bf16 %v1456_v9, %v1456_v9 }
 0x1e4   :  { %v715_v4 = vpop.f32.mrf.mxu0 }
 0x1e5   :  { %v716_v6 = vadd.f32 %v4250_v15, %v715_v4 }
 0x1e6   :  { %v1209_v7 = vpop.f32.mrf.mxu2  ;;  %v1250_v8 = vpop.f32.mrf.mxu3 }
 0x1e7   :  { %v853_v11 = vmax.f32 %v716_v6, 0.0  ;;  %v1259_v13 = vadd.f32 %v1250_v8, %v1211_v51  ;;  %3258 = vmatmul.msk.bf16.gmra.mxu0 %vm502_vm1, %v3765_v3  ;;  %v3814_v8 = vld [vmem:[%s4815_s3 + $0xf8] sm:$0xff] }
 0x1e8   :  { %v1502_v20 = vld [vmem:[#allocation2 + $0x108] sm:$0xff]  ;;  %1727 = vmatpush.bf16.msra.mxu1 %v3814_v8 }
 0x1e9   :  { %929 = vst.msk [vmem:[#allocation2 + $0x110] sm:$0xff] %vm894_vm2, %v853_v11 }
 0x1eb   :  { %3380 = vmatmul.msk.bf16.gmra.mxu2 %vm894_vm2, %v1458_v14 }
 0x1ec   :  { %v717_v16 = vpop.f32.mrf.mxu0 }
 0x1ed   :  { %v718_v17 = vadd.f32 %v4250_v15, %v717_v16 }
 0x1ee   :  { %v4564_v18 = vpop.f32.mrf.mxu3 }
 0x1ef   :  { %v854_v19 = vmax.f32 %v718_v17, 0.0 }
 0x1f0   :  { %v1503_v21 = vld [vmem:[#allocation2 + $0x110] sm:$0xff] }
 0x1f1   :  { %930 = vst.msk [vmem:[#allocation2 + $0x118] sm:$0xff] %vm894_vm2, %v854_v19  ;;  %v1505_v22 = vpack.c.bf16 %v1503_v21, %v1502_v20 }
 0x1f3   :  { %3389 = vmatmul.msk.bf16.vlgmr.msra.gmra.mxu3 %vm894_vm2, %v1505_v22  ;;  %v4611_v22 = vld [vmem:[%s4814_s2] ss:$0 sm:$0xff] }
 0x1f4   :  { %v720_v23 = vpop.f32.mrf.mxu0 }
 0x1f5   :  { %v721_v24 = vadd.f32 %v4250_v15, %v720_v23 }
 0x1f6   :  { %v1255_v25 = vpop.f32.mrf.mxu3 }
 0x1f7   :  { %v855_v26 = vmax.f32 %v721_v24, 0.0  ;;  %v1261_v28 = vadd.f32 %v1255_v25, %v1213_v1 }
 0x1f8   :  { %v1298_v29 = vpop.f32.mrf.mxu1  ;;  %v1504_v36 = vld [vmem:[#allocation2 + $0x118] sm:$0xff] }
 0x1f9   :  { %931 = vst.msk [vmem:[#allocation2 + $0x120] sm:$0xff] %vm894_vm2, %v855_v26  ;;  %v1307_v31 = vadd.f32 %v1298_v29, %v1259_v13  ;;  %v1506_v40 = vpack.c.bf16 %v1504_v36, %v1504_v36  ;;  %v1020_v13 = vadd.f32 %v4457_v30, %v4440_v12 }
 0x1fb   :  { %v1068_v17 = vadd.f32 %v4475_v44, %v1020_v13  ;;  %v3813_v44 = vld [vmem:[%s4815_s3 + $0xf0] sm:$0xff] }
 0x1fc   :  { %v722_v33 = vpop.f32.mrf.mxu0  ;;  %1728 = vmatpush.bf16.msra.mxu1 %v3813_v44 }
 0x1fd   :  { %v723_v34 = vadd.f32 %v4250_v15, %v722_v33  ;;  %v1116_v19 = vadd.f32 %v4499_v5, %v1068_v17 }
 0x1fe   :  { %v1257_v35 = vpop.f32.mrf.mxu3 }
 0x1ff   :  { %v856_v38 = vmax.f32 %v723_v34, 0.0  ;;  %v1164_v21 = vadd.f32 %v4517_v27, %v1116_v19 }
 0x200   :  { %v4577_v39 = vpop.f32.mrf.mxu1  ;;  %v1550_v46 = vld [vmem:[#allocation2 + $0x120] sm:$0xff] }
 0x201   :  { %932 = vst.msk [vmem:[#allocation2 + $0x128] sm:$0xff] %vm894_vm2, %v856_v38  ;;  %v1212_v24 = vadd.f32 %v4543_v56, %v1164_v21  ;;  %v3818_v38 = vld [vmem:[%s4815_s3 + $0x118] sm:$0xff] }
 0x202   :  { %1823 = vmatpush.bf16.msra.mxu3 %v3818_v38 }
 0x203   :  { %3390 = vmatmul.msk.bf16.gmra.mxu3 %vm894_vm2, %v1506_v40  ;;  %v1260_v27 = vadd.f32 %v4564_v18, %v1212_v24  ;;  %v3816_v18 = vld [vmem:[%s4815_s3 + $0x108] sm:$0xff] }
 0x204   :  { %v725_v41 = vpop.f32.mrf.mxu0  ;;  %1775 = vmatpush.bf16.msra.mxu2 %v3816_v18 }
 0x205   :  { %v726_v42 = vadd.f32 %v4250_v15, %v725_v41 }
 0x207   :  { %v857_v43 = vmax.f32 %v726_v42, 0.0 }
 0x208   :  { %v1303_v45 = vpop.f32.mrf.mxu1  ;;  %v1551_v47 = vld [vmem:[#allocation2 + $0x128] sm:$0xff] }
 0x209   :  { %933 = vst.msk [vmem:[#allocation2 + $0x130] sm:$0xff] %vm894_vm2, %v857_v43  ;;  %v1309_v48 = vadd.f32 %v1303_v45, %v1261_v28  ;;  %v1553_v49 = vpack.c.bf16 %v1551_v47, %v1550_v46  ;;  %v1308_v28 = vadd.f32 %v4577_v39, %v1260_v27  ;;  %v3820_v47 = vld [vmem:[%s4815_s3 + $0x128] sm:$0xff] }
 0x20b   :  { %3399 = vmatmul.msk.bf16.vlgmr.msrb.gmra.mxu1 %vm894_vm2, %v1553_v49 }
 0x20c   :  { %v727_v50 = vpop.f32.mrf.mxu0  ;;  %1871 = vmatpush.bf16.msrb.mxu1 %v3820_v47  ;;  %v1840_v47 = vld [vmem:[#allocation2 + $0x1c0] sm:$0xff] }
 0x20d   :  { %v728_v51 = vadd.f32 %v4250_v15, %v727_v50 }
 0x20f   :  { %v858_v52 = vmax.f32 %v728_v51, 0.0 }
 0x210   :  { %v1305_v53 = vpop.f32.mrf.mxu1  ;;  %v1552_v59 = vld [vmem:[#allocation2 + $0x130] sm:$0xff] }
 0x211   :  { %934 = vst.msk [vmem:[#allocation2 + $0x138] sm:$0xff] %vm894_vm2, %v858_v52  ;;  %v1554_v63 = vpack.c.bf16 %v1552_v59, %v1552_v59  ;;  %v3815_v52 = vld [vmem:[%s4815_s3 + $0x100] sm:$0xff] }
 0x212   :  { %1776 = vmatpush.bf16.msra.mxu2 %v3815_v52 }
 0x214   :  { %v730_v55 = vpop.f32.mrf.mxu0 }
 0x215   :  { %v731_v57 = vadd.f32 %v4250_v15, %v730_v55 }
 0x216   :  { %v1346_v58 = vpop.f32.mrf.mxu2 }
 0x217   :  { %v859_v61 = vmax.f32 %v731_v57, 0.0  ;;  %v1355_v62 = vadd.f32 %v1346_v58, %v1307_v31  ;;  %v3817_v58 = vld [vmem:[%s4815_s3 + $0x110] sm:$0xff] }
 0x218   :  { %v1598_v4 = vld [vmem:[#allocation2 + $0x138] sm:$0xff]  ;;  %1824 = vmatpush.bf16.msra.mxu3 %v3817_v58 }
 0x219   :  { %935 = vst.msk [vmem:[#allocation2 + $0x140] sm:$0xff] %vm894_vm2, %v859_v61  ;;  %v3819_v61 = vld [vmem:[%s4815_s3 + $0x120] sm:$0xff] }
 0x21a   :  { %1872 = vmatpush.bf16.msrb.mxu1 %v3819_v61 }
 0x21b   :  { %3400 = vmatmul.msk.bf16.gmra.mxu1 %vm894_vm2, %v1554_v63 }
 0x21c   :  { %v732_v0 = vpop.f32.mrf.mxu0 }
 0x21d   :  { %v733_v1 = vadd.f32 %v4250_v15, %v732_v0 }
 0x21e   :  { %v1348_v2 = vpop.f32.mrf.mxu2 }
 0x21f   :  { %v860_v3 = vmax.f32 %v733_v1, 0.0  ;;  %v1356_v31 = vadd.f32 %v1348_v2, %v1308_v28 }
 0x220   :  { %v1599_v6 = vld [vmem:[#allocation2 + $0x140] sm:$0xff] }
 0x221   :  { %936 = vst.msk [vmem:[#allocation2 + $0x148] sm:$0xff] %vm894_vm2, %v860_v3  ;;  %v1601_v7 = vpack.c.bf16 %v1599_v6, %v1598_v4 }
 0x223   :  { %3409 = vmatmul.msk.bf16.vlgmr.msrb.gmra.mxu2 %vm894_vm2, %v1601_v7 }
 0x224   :  { %v735_v9 = vpop.f32.mrf.mxu0 }
 0x225   :  { %v736_v10 = vadd.f32 %v4250_v15, %v735_v9  ;;  %v3822_v9 = vld [vmem:[%s4815_s3 + $0x138] sm:$0xff] }
 0x226   :  { %v1351_v11 = vpop.f32.mrf.mxu2  ;;  %1919 = vmatpush.bf16.msrb.mxu2 %v3822_v9  ;;  %v1935_v9 = vld [vmem:[#allocation2 + $0x1e8] sm:$0xff] }
 0x227   :  { %v861_v14 = vmax.f32 %v736_v10, 0.0  ;;  %v1357_v16 = vadd.f32 %v1351_v11, %v1309_v48  ;;  %v3824_v10 = vld [vmem:[%s4815_s3 + $0x148] sm:$0xff] }
 0x228   :  { %v1600_v30 = vld [vmem:[#allocation2 + $0x148] sm:$0xff] }
 0x229   :  { %937 = vst.msk [vmem:[#allocation2 + $0x150] sm:$0xff] %vm894_vm2, %v861_v14  ;;  %v1602_v26 = vpack.c.bf16 %v1600_v30, %v1600_v30  ;;  %v3821_v30 = vld [vmem:[%s4815_s3 + $0x130] sm:$0xff] }
 0x22a   :  { %1920 = vmatpush.bf16.msrb.mxu2 %v3821_v30 }
 0x22c   :  { %v737_v20 = vpop.f32.mrf.mxu0 }
 0x22d   :  { %v738_v15 = vadd.f32 %v4611_v22, %v737_v20  ;;  %v3826_v20 = vld [vmem:[%s4815_s3 + $0x158] sm:$0xff] }
 0x22e   :  { %v1353_v23 = vpop.f32.mrf.mxu2  ;;  %v1394_v12 = vpop.f32.mrf.mxu3 }
 0x22f   :  { %v862_v5 = vmax.f32 %v738_v15, 0.0  ;;  %v1403_v25 = vadd.f32 %v1394_v12, %v1355_v62 }
 0x230   :  { %v1646_v56 = vld [vmem:[#allocation2 + $0x150] sm:$0xff] }
 0x231   :  { %938 = vst.msk [vmem:[#allocation2 + $0x158] sm:$0xff] %vm894_vm2, %v862_v5 }
 0x233   :  { %3410 = vmatmul.msk.bf16.gmra.mxu2 %vm894_vm2, %v1602_v26  ;;  %v3823_v26 = vld [vmem:[%s4815_s3 + $0x140] sm:$0xff] }
 0x234   :  { %v740_v29 = vpop.f32.mrf.mxu0 }
 0x235   :  { %v741_v32 = vadd.f32 %v4611_v22, %v740_v29 }
 0x236   :  { %v1396_v33 = vpop.f32.mrf.mxu3 }
 0x237   :  { %v863_v34 = vmax.f32 %v741_v32, 0.0  ;;  %v1404_v35 = vadd.f32 %v1396_v33, %v1356_v31  ;;  %v1838_v32 = vld [vmem:[#allocation2 + $0x1b0] sm:$0xff]  ;;  %v1839_v33 = vld [vmem:[#allocation2 + $0x1b8] sm:$0xff] }
 0x238   :  { %v1647_v36 = vld [vmem:[#allocation2 + $0x158] sm:$0xff] }
 0x239   :  { %939 = vst.msk [vmem:[#allocation2 + $0x160] sm:$0xff] %vm894_vm2, %v863_v34  ;;  %v1649_v37 = vpack.c.bf16 %v1647_v36, %v1646_v56  ;;  %v3825_v34 = vld [vmem:[%s4815_s3 + $0x150] sm:$0xff]  ;;  %v1841_v36 = vpack.c.bf16 %v1839_v33, %v1838_v32 }
 0x23a   :  { %v2079_v32 = vld [vmem:[#allocation2 + $0x230] sm:$0xff] }
 0x23b   :  { %3419 = vmatmul.msk.bf16.vlgmr.msrb.gmra.mxu3 %vm894_vm2, %v1649_v37 }
 0x23c   :  { %v742_v39 = vpop.f32.mrf.mxu0  ;;  %1967 = vmatpush.bf16.msrb.mxu3 %v3824_v10 }
 0x23d   :  { %v743_v40 = vadd.f32 %v4611_v22, %v742_v39 }
 0x23e   :  { %v1399_v41 = vpop.f32.mrf.mxu3 }
 0x23f   :  { %v864_v42 = vmax.f32 %v743_v40, 0.0  ;;  %v1405_v43 = vadd.f32 %v1399_v41, %v1357_v16  ;;  %v1791_v40 = vld [vmem:[#allocation2 + $0x1a0] sm:$0xff] }
 0x240   :  { %v1442_v45 = vpop.f32.mrf.mxu1  ;;  %v1648_v51 = vld [vmem:[#allocation2 + $0x160] sm:$0xff]  ;;  %1968 = vmatpush.bf16.msrb.mxu3 %v3823_v26 }
 0x241   :  { %940 = vst.msk [vmem:[#allocation2 + $0x168] sm:$0xff] %vm894_vm2, %v864_v42  ;;  %v1451_v46 = vadd.f32 %v1442_v45, %v1403_v25  ;;  %v1650_v57 = vpack.c.bf16 %v1648_v51, %v1648_v51  ;;  %v3830_v45 = vld [vmem:[%s4815_s3 + $0x178] sm:$0xff]  ;;  %v1792_v51 = vld [vmem:[#allocation2 + $0x1a8] sm:$0xff] }
 0x244   :  { %v745_v48 = vpop.f32.mrf.mxu0 }
 0x245   :  { %v746_v49 = vadd.f32 %v4611_v22, %v745_v48 }
 0x246   :  { %v1401_v50 = vpop.f32.mrf.mxu3 }
 0x247   :  { %v865_v53 = vmax.f32 %v746_v49, 0.0  ;;  %v3832_v49 = vld [vmem:[%s4815_s3 + $0x188] sm:$0xff]  ;;  %v1842_v50 = vpack.c.bf16 %v1840_v47, %v1840_v47 }
 0x248   :  { %v1444_v54 = vpop.f32.mrf.mxu1  ;;  %v1694_v0 = vld [vmem:[#allocation2 + $0x168] sm:$0xff] }
 0x249   :  { %941 = vst.msk [vmem:[#allocation2 + $0x170] sm:$0xff] %vm894_vm2, %v865_v53  ;;  %v1452_v55 = vadd.f32 %v1444_v54, %v1404_v35  ;;  %v1886_v53 = vld [vmem:[#allocation2 + $0x1c8] sm:$0xff]  ;;  %v1887_v54 = vld [vmem:[#allocation2 + $0x1d0] sm:$0xff] }
 0x24a   :  { %v1889_v61 = vpack.c.bf16 %v1887_v54, %v1886_v53 }
 0x24b   :  { %3420 = vmatmul.msk.bf16.gmra.mxu3 %vm894_vm2, %v1650_v57 }
 0x24c   :  { %v747_v59 = vpop.f32.mrf.mxu0 }
 0x24d   :  { %v748_v60 = vadd.f32 %v4611_v22, %v747_v59 }
 0x24f   :  { %v866_v62 = vmax.f32 %v748_v60, 0.0  ;;  %v1794_v60 = vpack.c.bf16 %v1792_v51, %v1792_v51 }
 0x250   :  { %v1447_v63 = vpop.f32.mrf.mxu1  ;;  %v1695_v1 = vld [vmem:[#allocation2 + $0x170] sm:$0xff] }
 0x251   :  { %942 = vst.msk [vmem:[#allocation2 + $0x178] sm:$0xff] %vm894_vm2, %v866_v62  ;;  %v1453_v2 = vadd.f32 %v1447_v63, %v1405_v43  ;;  %v1697_v3 = vpack.c.bf16 %v1695_v1, %v1694_v0  ;;  %v3828_v43 = vld [vmem:[%s4815_s3 + $0x168] sm:$0xff]  ;;  %v3829_v62 = vld [vmem:[%s4815_s3 + $0x170] sm:$0xff]  ;;  %v1982_v0 = vld [vmem:[#allocation2 + $0x1f8] sm:$0xff] }
 0x252   :  { %v1983_v1 = vld [vmem:[#allocation2 + $0x200] sm:$0xff] }
 0x253   :  { %3429 = vmatmul.msk.bf16.vlgmr.msra.gmra.mxu1 %vm894_vm2, %v1697_v3 }
 0x254   :  { %v750_v4 = vpop.f32.mrf.mxu0  ;;  %2015 = vmatpush.bf16.msra.mxu1 %v3826_v20 }
 0x255   :  { %v751_v6 = vadd.f32 %v4611_v22, %v750_v4 }
 0x257   :  { %v867_v7 = vmax.f32 %v751_v6, 0.0  ;;  %v1985_v6 = vpack.c.bf16 %v1983_v1, %v1982_v0 }
 0x258   :  { %v1449_v8 = vpop.f32.mrf.mxu1  ;;  %v1696_v16 = vld [vmem:[#allocation2 + $0x178] sm:$0xff]  ;;  %2016 = vmatpush.bf16.msra.mxu1 %v3825_v34 }
 0x259   :  { %943 = vst.msk [vmem:[#allocation2 + $0x180] sm:$0xff] %vm894_vm2, %v867_v7  ;;  %v1698_v21 = vpack.c.bf16 %v1696_v16, %v1696_v16  ;;  %v1888_v7 = vld [vmem:[#allocation2 + $0x1d8] sm:$0xff]  ;;  %v1934_v8 = vld [vmem:[#allocation2 + $0x1e0] sm:$0xff]  ;;  %v1984_v16 = vld [vmem:[#allocation2 + $0x208] sm:$0xff] }
 0x25c   :  { %v752_v11 = vpop.f32.mrf.mxu0 }
 0x25d   :  { %v753_v13 = vadd.f32 %v4611_v22, %v752_v11 }
 0x25e   :  { %v1490_v14 = vpop.f32.mrf.mxu2 }
 0x25f   :  { %v868_v17 = vmax.f32 %v753_v13, 0.0  ;;  %v1499_v19 = vadd.f32 %v1490_v14, %v1451_v46  ;;  %v1890_v13 = vpack.c.bf16 %v1888_v7, %v1888_v7  ;;  %v1937_v14 = vpack.c.bf16 %v1935_v9, %v1934_v8 }
 0x260   :  { %v1742_v5 = vld [vmem:[#allocation2 + $0x180] sm:$0xff] }
 0x261   :  { %944 = vst.msk [vmem:[#allocation2 + $0x188] sm:$0xff] %vm894_vm2, %v868_v17 }
 0x263   :  { %3430 = vmatmul.msk.bf16.gmra.mxu1 %vm894_vm2, %v1698_v21  ;;  %v1936_v21 = vld [vmem:[#allocation2 + $0x1f0] sm:$0xff] }
 0x264   :  { %v755_v15 = vpop.f32.mrf.mxu0  ;;  %v1938_v30 = vpack.c.bf16 %v1936_v21, %v1936_v21 }
 0x265   :  { %v756_v23 = vadd.f32 %v4611_v22, %v755_v15  ;;  %v2030_v15 = vld [vmem:[#allocation2 + $0x210] sm:$0xff] }
 0x266   :  { %v1492_v12 = vpop.f32.mrf.mxu2 }
 0x267   :  { %v869_v44 = vmax.f32 %v756_v23, 0.0  ;;  %v1500_v24 = vadd.f32 %v1492_v12, %v1452_v55  ;;  %v3827_v55 = vld [vmem:[%s4815_s3 + $0x160] sm:$0xff]  ;;  %v2031_v23 = vld [vmem:[#allocation2 + $0x218] sm:$0xff] }
 0x268   :  { %v1743_v25 = vld [vmem:[#allocation2 + $0x188] sm:$0xff] }
 0x269   :  { %945 = vst.msk [vmem:[#allocation2 + $0x190] sm:$0xff] %vm894_vm2, %v869_v44  ;;  %v1745_v27 = vpack.c.bf16 %v1743_v25, %v1742_v5  ;;  %v2033_v44 = vpack.c.bf16 %v2031_v23, %v2030_v15  ;;  %v2126_v5 = vld [vmem:[#allocation2 + $0x240] sm:$0xff]  ;;  %v2127_v25 = vld [vmem:[#allocation2 + $0x248] sm:$0xff] }
 0x26a   :  { %v2129_v26 = vpack.c.bf16 %v2127_v25, %v2126_v5 }
 0x26b   :  { %3439 = vmatmul.msk.bf16.vlgmr.msra.gmra.mxu2 %vm894_vm2, %v1745_v27 }
 0x26c   :  { %v757_v28 = vpop.f32.mrf.mxu0  ;;  %2063 = vmatpush.bf16.msra.mxu2 %v3828_v43 }
 0x26d   :  { %v758_v29 = vadd.f32 %v4611_v22, %v757_v28 }
 0x26e   :  { %v1495_v31 = vpop.f32.mrf.mxu2 }
 0x26f   :  { %v870_v35 = vmax.f32 %v758_v29, 0.0  ;;  %v1501_v56 = vadd.f32 %v1495_v31, %v1453_v2  ;;  %v3831_v2 = vld [vmem:[%s4815_s3 + $0x180] sm:$0xff]  ;;  %v2078_v31 = vld [vmem:[#allocation2 + $0x228] sm:$0xff] }
 0x270   :  { %v1744_v38 = vld [vmem:[#allocation2 + $0x190] sm:$0xff]  ;;  %2064 = vmatpush.bf16.msra.mxu2 %v3827_v55  ;;  %v2032_v29 = vld [vmem:[#allocation2 + $0x220] sm:$0xff] }
 0x271   :  { %946 = vst.msk [vmem:[#allocation2 + $0x198] sm:$0xff] %vm894_vm2, %v870_v35  ;;  %v1746_v41 = vpack.c.bf16 %v1744_v38, %v1744_v38  ;;  %v2034_v34 = vpack.c.bf16 %v2032_v29, %v2032_v29  ;;  %v2081_v35 = vpack.c.bf16 %v2079_v32, %v2078_v31 }
 0x273   :  { %3459 = vmatmul.msk.bf16.vlgmr.msrb.gmra.mxu1 %vm894_vm2, %v1841_v36 }
 0x274   :  { %2159 = vmatpush.bf16.msrb.mxu1 %v3832_v49 }
 0x276   :  { %v1497_v37 = vpop.f32.mrf.mxu2  ;;  %v1538_v18 = vpop.f32.mrf.mxu3 }
 0x277   :  { %v1547_v22 = vadd.f32 %v1538_v18, %v1499_v19  ;;  %v1986_v19 = vpack.c.bf16 %v1984_v16, %v1984_v16  ;;  %v2128_v37 = vld [vmem:[#allocation2 + $0x250] sm:$0xff] }
 0x278   :  { %v1790_v39 = vld [vmem:[#allocation2 + $0x198] sm:$0xff]  ;;  %2160 = vmatpush.bf16.msrb.mxu1 %v3831_v2  ;;  %v2130_v38 = vpack.c.bf16 %v2128_v37, %v2128_v37 }
 0x279   :  { %v1793_v42 = vpack.c.bf16 %v1791_v40, %v1790_v39  ;;  %v2080_v39 = vld [vmem:[#allocation2 + $0x238] sm:$0xff] }
 0x27b   :  { %3440 = vmatmul.msk.bf16.gmra.mxu2 %vm894_vm2, %v1746_v41  ;;  %3449 = vmatmul.msk.bf16.vlgmr.msra.gmra.mxu3 %vm894_vm2, %v1793_v42  ;;  %v2082_v41 = vpack.c.bf16 %v2080_v39, %v2080_v39 }
 0x27c   :  { %2111 = vmatpush.bf16.msra.mxu3 %v3830_v45 }
 0x27e   :  { %v1540_v46 = vpop.f32.mrf.mxu3 }
 0x27f   :  { %v1548_v48 = vadd.f32 %v1540_v46, %v1500_v24 }
 0x280   :  { %2112 = vmatpush.bf16.msra.mxu3 %v3829_v62 }
 0x283   :  { %3460 = vmatmul.msk.bf16.gmra.mxu1 %vm894_vm2, %v1842_v50 }
 0x286   :  { %v1543_v52 = vpop.f32.mrf.mxu3 }
 0x287   :  { %v1549_v57 = vadd.f32 %v1543_v52, %v1501_v56 }
 0x288   :  { %v1586_v58 = vpop.f32.mrf.mxu1 }
 0x289   :  { %v1595_v59 = vadd.f32 %v1586_v58, %v1547_v22 }
 0x28b   :  { %3450 = vmatmul.msk.bf16.gmra.mxu3 %vm894_vm2, %v1794_v60  ;;  %3469 = vmatmul.msk.bf16.vlgmr.msrb.gmra.mxu2 %vm894_vm2, %v1889_v61 }
 0x28e   :  { %v1545_v63 = vpop.f32.mrf.mxu3 }
 0x290   :  { %v1588_v3 = vpop.f32.mrf.mxu1 }
 0x291   :  { %v1596_v4 = vadd.f32 %v1588_v3, %v1548_v48 }
 0x293   :  { %3489 = vmatmul.msk.bf16.vlgmr.msra.gmra.mxu1 %vm894_vm2, %v1985_v6 }
 0x298   :  { %v1591_v10 = vpop.f32.mrf.mxu1 }
 0x299   :  { %v1597_v11 = vadd.f32 %v1591_v10, %v1549_v57 }
 0x29b   :  { %3470 = vmatmul.msk.bf16.gmra.mxu2 %vm894_vm2, %v1890_v13  ;;  %3479 = vmatmul.msk.bf16.vlgmr.msrb.gmra.mxu3 %vm894_vm2, %v1937_v14 }
 0x2a0   :  { %v1593_v17 = vpop.f32.mrf.mxu1 }
 0x2a3   :  { %3490 = vmatmul.msk.bf16.gmra.mxu1 %vm894_vm2, %v1986_v19 }
 0x2a6   :  { %v1634_v20 = vpop.f32.mrf.mxu2 }
 0x2a7   :  { %v1643_v12 = vadd.f32 %v1634_v20, %v1595_v59 }
 0x2ab   :  { %3480 = vmatmul.msk.bf16.gmra.mxu3 %vm894_vm2, %v1938_v30  ;;  %3499 = vmatmul.msk.bf16.vlgmr.msra.gmra.mxu2 %vm894_vm2, %v2033_v44 }
 0x2ae   :  { %v1636_v24 = vpop.f32.mrf.mxu2 }
 0x2af   :  { %v1644_v27 = vadd.f32 %v1636_v24, %v1596_v4 }
 0x2b3   :  { %3519 = vmatmul.msk.bf16.vlgmr.msrb.gmra.mxu1 %vm894_vm2, %v2129_v26 }
 0x2b6   :  { %v1639_v28 = vpop.f32.mrf.mxu2 }
 0x2b7   :  { %v1645_v33 = vadd.f32 %v1639_v28, %v1597_v11 }
 0x2bb   :  { %3500 = vmatmul.msk.bf16.gmra.mxu2 %vm894_vm2, %v2034_v34  ;;  %3509 = vmatmul.msk.bf16.vlgmr.msra.gmra.mxu3 %vm894_vm2, %v2081_v35 }
 0x2be   :  { %v1641_v56 = vpop.f32.mrf.mxu2  ;;  %v1682_v36 = vpop.f32.mrf.mxu3 }
 0x2bf   :  { %v1691_v18 = vadd.f32 %v1682_v36, %v1643_v12 }
 0x2c3   :  { %3520 = vmatmul.msk.bf16.gmra.mxu1 %vm894_vm2, %v2130_v38 }
 0x2c6   :  { %v1684_v22 = vpop.f32.mrf.mxu3 }
 0x2c7   :  { %v1692_v40 = vadd.f32 %v1684_v22, %v1644_v27 }
 0x2cb   :  { %3510 = vmatmul.msk.bf16.gmra.mxu3 %vm894_vm2, %v2082_v41 }
 0x2ce   :  { %v1687_v42 = vpop.f32.mrf.mxu3 }
 0x2cf   :  { %v1693_v43 = vadd.f32 %v1687_v42, %v1645_v33 }
 0x2d0   :  { %v1730_v45 = vpop.f32.mrf.mxu1 }
 0x2d1   :  { %v1739_v46 = vadd.f32 %v1730_v45, %v1691_v18 }
 0x2d6   :  { %v1689_v47 = vpop.f32.mrf.mxu3 }
 0x2d8   :  { %v1732_v48 = vpop.f32.mrf.mxu1 }
 0x2d9   :  { %v1740_v49 = vadd.f32 %v1732_v48, %v1692_v40 }
 0x2e0   :  { %v1735_v50 = vpop.f32.mrf.mxu1 }
 0x2e1   :  { %v1741_v51 = vadd.f32 %v1735_v50, %v1693_v43 }
 0x2e8   :  { %v1737_v52 = vpop.f32.mrf.mxu1 }
 0x2ee   :  { %v1778_v53 = vpop.f32.mrf.mxu2 }
 0x2ef   :  { %v1787_v54 = vadd.f32 %v1778_v53, %v1739_v46 }
 0x2f0   :  { %v1874_v55 = vpop.f32.mrf.mxu1 }
 0x2f6   :  { %v1780_v57 = vpop.f32.mrf.mxu2 }
 0x2f7   :  { %v1788_v58 = vadd.f32 %v1780_v57, %v1740_v49 }
 0x2f8   :  { %v1876_v59 = vpop.f32.mrf.mxu1 }
 0x2fe   :  { %v1783_v60 = vpop.f32.mrf.mxu2  ;;  %v1826_v61 = vpop.f32.mrf.mxu3 }
 0x2ff   :  { %v1789_v62 = vadd.f32 %v1783_v60, %v1741_v51  ;;  %v1835_v63 = vadd.f32 %v1826_v61, %v1787_v54 }
 0x300   :  { %v1879_v0 = vpop.f32.mrf.mxu1 }
 0x301   :  { %v1883_v1 = vadd.f32 %v1874_v55, %v1835_v63 }
 0x306   :  { %v1785_v2 = vpop.f32.mrf.mxu2  ;;  %v1828_v3 = vpop.f32.mrf.mxu3 }
 0x307   :  { %v1836_v4 = vadd.f32 %v1828_v3, %v1788_v58 }
 0x308   :  { %v1881_v6 = vpop.f32.mrf.mxu1 }
 0x309   :  { %v1884_v7 = vadd.f32 %v1876_v59, %v1836_v4 }
 0x30e   :  { %v1831_v8 = vpop.f32.mrf.mxu3  ;;  %v1922_v9 = vpop.f32.mrf.mxu2 }
 0x30f   :  { %v1837_v10 = vadd.f32 %v1831_v8, %v1789_v62  ;;  %v1931_v5 = vadd.f32 %v1922_v9, %v1883_v1 }
 0x310   :  { %v2018_v11 = vpop.f32.mrf.mxu1 }
 0x311   :  { %v1885_v13 = vadd.f32 %v1879_v0, %v1837_v10 }
 0x316   :  { %v1833_v14 = vpop.f32.mrf.mxu3  ;;  %v1924_v16 = vpop.f32.mrf.mxu2 }
 0x317   :  { %v1932_v31 = vadd.f32 %v1924_v16, %v1884_v7 }
 0x318   :  { %v2020_v17 = vpop.f32.mrf.mxu1 }
 0x31e   :  { %v1927_v19 = vpop.f32.mrf.mxu2  ;;  %v1970_v20 = vpop.f32.mrf.mxu3 }
 0x31f   :  { %v1979_v26 = vadd.f32 %v1970_v20, %v1931_v5  ;;  %v1933_v22 = vadd.f32 %v1927_v19, %v1885_v13 }
 0x320   :  { %v2023_v21 = vpop.f32.mrf.mxu1 }
 0x321   :  { %v2027_v29 = vadd.f32 %v2018_v11, %v1979_v26 }
 0x326   :  { %v1929_v15 = vpop.f32.mrf.mxu2  ;;  %v1972_v23 = vpop.f32.mrf.mxu3 }
 0x327   :  { %v1980_v35 = vadd.f32 %v1972_v23, %v1932_v31 }
 0x328   :  { %v2025_v12 = vpop.f32.mrf.mxu1 }
 0x329   :  { %v2028_v18 = vadd.f32 %v2020_v17, %v1980_v35 }
 0x32e   :  { %v1975_v30 = vpop.f32.mrf.mxu3  ;;  %v2066_v44 = vpop.f32.mrf.mxu2 }
 0x32f   :  { %v2075_v32 = vadd.f32 %v2066_v44, %v2027_v29  ;;  %v1981_v42 = vadd.f32 %v1975_v30, %v1933_v22 }
 0x330   :  { %v2162_v24 = vpop.f32.mrf.mxu1 }
 0x331   :  { %v2029_v47 = vadd.f32 %v2023_v21, %v1981_v42 }
 0x336   :  { %v1977_v25 = vpop.f32.mrf.mxu3  ;;  %v2068_v27 = vpop.f32.mrf.mxu2 }
 0x337   :  { %v2076_v39 = vadd.f32 %v2068_v27, %v2028_v18 }
 0x338   :  { %v2164_v28 = vpop.f32.mrf.mxu1 }
 0x33e   :  { %v2071_v33 = vpop.f32.mrf.mxu2  ;;  %v2114_v34 = vpop.f32.mrf.mxu3 }
 0x33f   :  { %v2123_v56 = vadd.f32 %v2114_v34, %v2075_v32  ;;  %v2077_v49 = vadd.f32 %v2071_v33, %v2029_v47 }
 0x340   :  { %v2167_v36 = vpop.f32.mrf.mxu1 }
 0x341   :  { %v2171_v37 = vadd.f32 %v2162_v24, %v2123_v56 }
 0x343   :  { %v2174_v38 = vmax.f32 %v2171_v37, 0.0 }
 0x346   :  { %v2073_v40 = vpop.f32.mrf.mxu2  ;;  %v2116_v41 = vpop.f32.mrf.mxu3 }
 0x347   :  { %v2124_v43 = vadd.f32 %v2116_v41, %v2076_v39 }
 0x348   :  { %v2169_v45 = vpop.f32.mrf.mxu1 }
 0x349   :  { %v2172_v46 = vadd.f32 %v2164_v28, %v2124_v43 }
 0x34b   :  { %v2175_v48 = vmax.f32 %v2172_v46, 0.0 }
 0x34e   :  { %v2119_v50 = vpop.f32.mrf.mxu3 }
 0x34f   :  { %v2125_v51 = vadd.f32 %v2119_v50, %v2077_v49 }
 0x351   :  { %v4714_v52 = vadd.f32 %v2167_v36, %v2125_v51 }
 0x353   :  { %v2176_v53 = vmax.f32 %v4714_v52, 0.0 }
 0x356   :  { %v2121_v54 = vpop.f32.mrf.mxu3 }
 0x357   :  { %3934 = dma.done.wait [#allocation6], 4608 }
 0x358   :  { %3935 = vsyncadd [#allocation6], 4294962688  ;;  %v3836_v55 = vld [vmem:[#allocation3 + $0x48] sm:$0xff]  ;;  %v3840_v57 = vld [vmem:[#allocation3 + $0x18] sm:$0xff]  ;;  %v2182_v0 = vpack.c.bf16 %v2174_v38, %v2174_v38  ;;  %vm2215_vm3 = vcmask 523264   ;;  %v2387_v16 = vpack.c.bf16 %v2175_v48, %v2175_v48  ;;  %v2588_v36 = vpack.c.bf16 %v2176_v53, %v2176_v53 }
 0x359   :  { %2223 = vmatpush.bf16.msrb.mxu2 %v3836_v55  ;;  %2277 = vmatpush.bf16.msrb.mxu3 %v3840_v57  ;;  %v3835_v58 = vld [vmem:[#allocation3 + $0x10] sm:$0xff]  ;;  %v3852_v60 = vld [vmem:[#allocation3 + $0xa0] sm:$0xff]  ;;  %v3838_v62 = vld [vmem:[#allocation3 + $0x68] sm:$0xff] }
 0x35a   :  { %v3839_v59 = vld [vmem:[#allocation3 + $0x30] sm:$0xff]  ;;  %2427 = vmatpush.bf16.msra.mxu1 %v3852_v60  ;;  %v3837_v2 = vld [vmem:[#allocation3 + $0x108] sm:$0xff]  ;;  %v3844_v3 = vld [vmem:[#allocation3 + $0x98] sm:$0xff]  ;;  %v2245_v7 = vrot.slane %v2182_v0, 1  ;;  %v2295_v44 = vrot.slane %v2182_v0, 2  ;;  %v2345_v24 = vrot.slane %v2182_v0, 3 }
 0x35b   :  { %v3834_v61 = vld [vmem:[#allocation3 + $0xd0] sm:$0xff]  ;;  %v3848_v4 = vld [vmem:[#allocation3 + $0x78] sm:$0xff]  ;;  %v3850_v6 = vld [vmem:[#allocation3 + $0xc8] sm:$0xff]  ;;  %v2546_v31 = vrot.slane %v2387_v16, 3  ;;  %v2446_v33 = vrot.slane %v2387_v16, 1  ;;  %v2496_v34 = vrot.slane %v2387_v16, 2 }
 0x35c   :  { %v3851_v63 = vld [vmem:[#allocation3 + $0x90] sm:$0xff]  ;;  %v3843_v8 = vld [vmem:[#allocation3 + $0x118] sm:$0xff]  ;;  %v3847_v9 = vld [vmem:[#allocation3 + $0x8] sm:$0xff] }
 0x35d   :  { %2224 = vmatpush.bf16.msrb.mxu2 %v3835_v58  ;;  %2278 = vmatpush.bf16.msrb.mxu3 %v3839_v59  ;;  %v3833_v1 = vld [vmem:[#allocation3 + $0xb0] sm:$0xff]  ;;  %v3849_v10 = vld [vmem:[#allocation3 + $0x20] sm:$0xff]  ;;  %v3864_v11 = vld [vmem:[#allocation3 + $0x28] sm:$0xff] }
 0x35e   :  { %2428 = vmatpush.bf16.msra.mxu1 %v3851_v63  ;;  %v3842_v13 = vld [vmem:[#allocation3 + $0x110] sm:$0xff]  ;;  %v3846_v14 = vld [vmem:[#allocation3 + $0x38] sm:$0xff]  ;;  %v3841_v19 = vld [vmem:[#allocation3 + $0x80] sm:$0xff] }
 0x35f   :  { %v3863_v17 = vld [vmem:[#allocation3 + $0xb8] sm:$0xff]  ;;  %v3856_v21 = vld [vmem:[#allocation3 + $0x60] sm:$0xff]  ;;  %v3862_v23 = vld [vmem:[#allocation3 + $0xf0] sm:$0xff] }
 0x360   :  { %v3845_v20 = vld [vmem:[#allocation3 + $0xf8] sm:$0xff]  ;;  %v3860_v15 = vld [vmem:[#allocation3 + $0xc0] sm:$0xff]  ;;  %v3861_v5 = vld [vmem:[#allocation3 + $0x50] sm:$0xff] }
 0x361   :  { %2225 = vmatpush.bf16.msrb.mxu2 %v3834_v61  ;;  %2279 = vmatpush.bf16.msrb.mxu3 %v3838_v62  ;;  %v3855_v12 = vld [vmem:[#allocation3 + $0xe0] sm:$0xff]  ;;  %v3859_v30 = vld [vmem:[#allocation3 + $0xd8] sm:$0xff]  ;;  %v3858_v27 = vld [vmem:[#allocation3 + $0x88] sm:$0xff] }
 0x362   :  { %2429 = vmatpush.bf16.msra.mxu1 %v3850_v6  ;;  %v3854_v25 = vld [vmem:[#allocation3 + $0x58] sm:$0xff]  ;;  %v3853_v26 = vld [vmem:[#allocation3 + $0x70] sm:$0xff]  ;;  %v3857_v28 = vld [vmem:[#allocation3 + $0xa8] sm:$0xff] }
 0x363   :  { %v3868_v29 = vld [vmem:[#allocation3 + $0xe8] sm:$0xff]  ;;  %v3867_v32 = vld [vmem:[#allocation3 + $0x40] sm:$0xff] }
 0x364   :  { %v3866_v35 = vld [vmem:[#allocation3] sm:$0xff]  ;;  %v3908_v45 = vld [vmem:[%s4817_s5] ss:$0 sm:$0xff] }
 0x365   :  { %2226 = vmatpush.bf16.msrb.mxu2 %v3833_v1  ;;  %2280 = vmatpush.bf16.msrb.mxu3 %v3837_v2  ;;  %v3865_v56 = vld [vmem:[#allocation3 + $0x100] sm:$0xff] }
 0x366   :  { %2430 = vmatpush.bf16.msra.mxu1 %v3849_v10 }
 0x368   :  { %3537 = vmatmul.msk.bf16.vlgmr.msrb.gmra.mxu2 %vm2215_vm3, %v2182_v0  ;;  %3554 = vmatmul.msk.bf16.vlgmr.msrb.gmra.mxu3 %vm2215_vm3, %v2245_v7 }
 0x369   :  { %2327 = vmatpush.bf16.msra.mxu2 %v3844_v3  ;;  %2377 = vmatpush.bf16.msra.mxu3 %v3848_v4 }
 0x36a   :  { %2578 = vmatpush.bf16.msrb.mxu1 %v3864_v11 }
 0x36b   :  { %3605 = vmatmul.msk.bf16.vlgmr.msra.gmra.mxu1 %vm2215_vm3, %v2387_v16 }
 0x36d   :  { %2328 = vmatpush.bf16.msra.mxu2 %v3843_v8  ;;  %2378 = vmatpush.bf16.msra.mxu3 %v3847_v9 }
 0x36e   :  { %2579 = vmatpush.bf16.msrb.mxu1 %v3863_v17 }
 0x371   :  { %2329 = vmatpush.bf16.msra.mxu2 %v3842_v13  ;;  %2379 = vmatpush.bf16.msra.mxu3 %v3846_v14 }
 0x372   :  { %2580 = vmatpush.bf16.msrb.mxu1 %v3862_v23 }
 0x375   :  { %2330 = vmatpush.bf16.msra.mxu2 %v3841_v19  ;;  %2380 = vmatpush.bf16.msra.mxu3 %v3845_v20 }
 0x376   :  { %2581 = vmatpush.bf16.msrb.mxu1 %v3861_v5 }
 0x378   :  { %3571 = vmatmul.msk.bf16.vlgmr.msra.gmra.mxu2 %vm2215_vm3, %v2295_v44  ;;  %3588 = vmatmul.msk.bf16.vlgmr.msra.gmra.mxu3 %vm2215_vm3, %v2345_v24 }
 0x379   :  { %2478 = vmatpush.bf16.msrb.mxu2 %v3856_v21  ;;  %2528 = vmatpush.bf16.msrb.mxu3 %v3860_v15 }
 0x37b   :  { %3656 = vmatmul.msk.bf16.vlgmr.msrb.gmra.mxu1 %vm2215_vm3, %v2546_v31 }
 0x37d   :  { %2479 = vmatpush.bf16.msrb.mxu2 %v3855_v12  ;;  %2529 = vmatpush.bf16.msrb.mxu3 %v3859_v30 }
 0x381   :  { %2480 = vmatpush.bf16.msrb.mxu2 %v3854_v25  ;;  %2530 = vmatpush.bf16.msrb.mxu3 %v3858_v27 }
 0x385   :  { %2481 = vmatpush.bf16.msrb.mxu2 %v3853_v26  ;;  %2531 = vmatpush.bf16.msrb.mxu3 %v3857_v28 }
 0x388   :  { %3622 = vmatmul.msk.bf16.vlgmr.msrb.gmra.mxu2 %vm2215_vm3, %v2446_v33  ;;  %3639 = vmatmul.msk.bf16.vlgmr.msrb.gmra.mxu3 %vm2215_vm3, %v2496_v34 }
 0x389   :  { %2628 = vmatpush.bf16.msra.mxu2 %v3868_v29 }
 0x38d   :  { %2629 = vmatpush.bf16.msra.mxu2 %v3867_v32 }
 0x391   :  { %2630 = vmatpush.bf16.msra.mxu2 %v3866_v35 }
 0x395   :  { %2631 = vmatpush.bf16.msra.mxu2 %v3865_v56 }
 0x398   :  { %3673 = vmatmul.msk.bf16.vlgmr.msra.gmra.mxu2 %vm2215_vm3, %v2588_v36 }
 0x3e8   :  { %v2432_v38 = vpop.f32.mrf.mxu1 }
 0x3eb   :  { %v2228_v37 = vpop.f32.mrf.mxu2  ;;  %v2282_v18 = vpop.f32.mrf.mxu3 }
 0x3ec   :  { %v2235_v46 = vadd.f32 %v3908_v45, %v2228_v37 }
 0x3ee   :  { %v2286_v50 = vadd.f32 %v2282_v18, %v2235_v46 }
 0x3f0   :  { %v2434_v40 = vpop.f32.mrf.mxu1 }
 0x3f3   :  { %v2230_v22 = vpop.f32.mrf.mxu2  ;;  %v2284_v39 = vpop.f32.mrf.mxu3 }
 0x3f8   :  { %v2583_v43 = vpop.f32.mrf.mxu1 }
 0x3fb   :  { %v2332_v41 = vpop.f32.mrf.mxu2  ;;  %v2382_v42 = vpop.f32.mrf.mxu3 }
 0x3fc   :  { %v2336_v51 = vadd.f32 %v2332_v41, %v2286_v50 }
 0x3fe   :  { %v2386_v54 = vadd.f32 %v2382_v42, %v2336_v51 }
 0x400   :  { %v2585_v49 = vpop.f32.mrf.mxu1  ;;  %v2436_v55 = vadd.f32 %v2432_v38, %v2386_v54 }
 0x403   :  { %v2334_v47 = vpop.f32.mrf.mxu2  ;;  %v2384_v48 = vpop.f32.mrf.mxu3 }
 0x40b   :  { %v2483_v52 = vpop.f32.mrf.mxu2  ;;  %v2533_v53 = vpop.f32.mrf.mxu3 }
 0x40c   :  { %v2487_v57 = vadd.f32 %v2483_v52, %v2436_v55 }
 0x40e   :  { %v2537_v60 = vadd.f32 %v2533_v53, %v2487_v57 }
 0x410   :  { %v2587_v61 = vadd.f32 %v2583_v43, %v2537_v60 }
 0x413   :  { %v2485_v58 = vpop.f32.mrf.mxu2  ;;  %v2535_v59 = vpop.f32.mrf.mxu3 }
 0x41b   :  { %v2633_v62 = vpop.f32.mrf.mxu2 }
 0x41c   :  { %v2637_v63 = vadd.f32 %v2633_v62, %v2587_v61 }
 0x41e   :  { %v2638_v0 = vmax.f32 %v2637_v63, 0.0 }
 0x420   :  { %v2639_v1 = vpack.c.bf16 %v2638_v0, %v2638_v0 }
 0x423   :  { %v2635_v2 = vpop.f32.mrf.mxu2 }
 0x424   :  { %3936 = dma.done.wait [#allocation6 + $0x1], 256 }
 0x425   :  { %3937 = vsyncadd [#allocation6 + $0x1], 4294967040 }
 0x426   :  { %3938 = dma.done.wait [#allocation6 + $0x2], 1536 }
 0x427   :  { %3939 = vsyncadd [#allocation6 + $0x2], 4294965760  ;;  %s3940_s5 = smov 96   ;;  %v3870_v3 = vld [vmem:[#allocation4 + $0x8] sm:$0xff]  ;;  %v3869_v4 = vld [vmem:[#allocation4] sm:$0xff] }
 0x428   :  { %2710 = vrot.lane.b32.xlu0 %v2639_v1, %s3940_s5  ;;  %v3717_v6 = vld [vmem:[#allocation5 + $0x38] sm:$0xf]  ;;  %v3881_v7 = vld [vmem:[#allocation5 + $0x4c] sm:$0xf0]  ;;  %v3880_v9 = vld [vmem:[#allocation5 + $0x44] sm:$0xf0]  ;;  %2676 = vmatpush.bf16.msra.mxu3 %v3870_v3 }
 0x429   :  { %v3709_v8 = vld [vmem:[#allocation5 + $0x30] sm:$0xf]  ;;  %v3877_v11 = vld [vmem:[#allocation5 + $0x34] sm:$0xf]  ;;  %v3711_v13 = vld [vmem:[#allocation5 + $0x48] sm:$0xf0]  ;;  %v3718_v16 = vor.u32 %v3881_v7, %v3717_v6  ;;  %v2860_v6 = vlaneseq }
 0x42a   :  { %v3710_v10 = vor.u32 %v3880_v9, %v3709_v8  ;;  %v3693_v14 = vld [vmem:[#allocation5 + $0x8] sm:$0xf]  ;;  %v3714_v17 = vor.u32 %v3877_v11, %v3711_v13  ;;  %v3875_v19 = vld [vmem:[#allocation5 + $0x1c] sm:$0xf0]  ;;  %v3874_v21 = vld [vmem:[#allocation5 + $0x14] sm:$0xf0] }
 0x42b   :  { %v3685_v20 = vld [vmem:[#allocation5] sm:$0xf]  ;;  %v3871_v23 = vld [vmem:[#allocation5 + $0x4] sm:$0xf]  ;;  %v3687_v12 = vld [vmem:[#allocation5 + $0x18] sm:$0xf0]  ;;  %v3694_v44 = vor.u32 %v3875_v19, %v3693_v14 }
 0x42c   :  { %2781 = vmatpush.bf16.msra.mxu1 %v3710_v10  ;;  %v3686_v15 = vor.u32 %v3874_v21, %v3685_v20  ;;  %2794 = vmatpush.bf16.msrb.mxu2 %v3714_v17  ;;  %v3690_v30 = vor.u32 %v3871_v23, %v3687_v12  ;;  %v3725_v24 = vld [vmem:[#allocation5 + $0x40] sm:$0xf]  ;;  %v3882_v5 = vld [vmem:[#allocation5 + $0x54] sm:$0xf0]  ;;  %v3879_v25 = vld [vmem:[#allocation5 + $0x44] sm:$0xf] }
 0x42d   :  { %2677 = vmatpush.bf16.msra.mxu3 %v3869_v4  ;;  %v3726_v27 = vor.u32 %v3882_v5, %v3725_v24  ;;  %v3727_v26 = vld [vmem:[#allocation5 + $0x58] sm:$0xf0]  ;;  %v3719_v29 = vld [vmem:[#allocation5 + $0x50] sm:$0xf0]  ;;  %v3701_v33 = vld [vmem:[#allocation5 + $0x10] sm:$0xf] }
 0x42e   :  { %v3878_v28 = vld [vmem:[#allocation5 + $0x3c] sm:$0xf]  ;;  %v3730_v31 = vor.u32 %v3879_v25, %v3727_v26  ;;  %v3876_v34 = vld [vmem:[#allocation5 + $0x24] sm:$0xf0]  ;;  %v3873_v35 = vld [vmem:[#allocation5 + $0x14] sm:$0xf] }
 0x42f   :  { %v3722_v32 = vor.u32 %v3878_v28, %v3719_v29  ;;  %v3702_v56 = vor.u32 %v3876_v34, %v3701_v33  ;;  %v3703_v36 = vld [vmem:[#allocation5 + $0x28] sm:$0xf0]  ;;  %v3695_v18 = vld [vmem:[#allocation5 + $0x20] sm:$0xf0]  ;;  %v2695_v46 = vld [vmem:[%s4819_s7] sm:$0x3f] }
 0x430   :  { %2782 = vmatpush.bf16.msra.mxu1 %v3686_v15  ;;  %3682 = vmatmul.msk.bf16.vlgmr.msra.gmra.mxu3 %vm894_vm2, %v2639_v1  ;;  %v3872_v37 = vld [vmem:[#allocation5 + $0xc] sm:$0xf]  ;;  %v3706_v38 = vor.u32 %v3873_v35, %v3703_v36  ;;  %v2698_v48 = vperm.slane %v2695_v46, 1  ;;  %v2697_v49 = vperm.slane %v2695_v46, 0  ;;  %v2699_v53 = vperm.slane %v2695_v46, 2 }
 0x431   :  { %2807 = vmatpush.bf16.msrb.mxu3 %v3718_v16  ;;  %2795 = vmatpush.bf16.msrb.mxu2 %v3690_v30  ;;  %v3698_v22 = vor.u32 %v3872_v37, %v3695_v18  ;;  %v2700_v55 = vperm.slane %v2695_v46, 3  ;;  %v2701_v61 = vperm.slane %v2695_v46, 4  ;;  %v2702_v63 = vperm.slane %v2695_v46, 5  ;;  %v3909_v7 = vld [vmem:[%s4818_s6] ss:$0 sm:$0xff] }
 0x432   :  { %v2861_v11 = vand.u32 127, %v2860_v6 }
 0x434   :  { %2820 = vmatpush.bf16.msrb.mxu1 %v3722_v32  ;;  %vm2862_vm4 = vcmp.lt.s32.totalorder %v2861_v11, 51 }
 0x435   :  { %2808 = vmatpush.bf16.msrb.mxu3 %v3694_v44  ;;  %2833 = vmatpush.bf16.msra.mxu2 %v3726_v27 }
 0x438   :  { %2821 = vmatpush.bf16.msrb.mxu1 %v3698_v22 }
 0x439   :  { %2846 = vmatpush.bf16.msra.mxu3 %v3730_v31  ;;  %2834 = vmatpush.bf16.msra.mxu2 %v3702_v56 }
 0x43d   :  { %2847 = vmatpush.bf16.msra.mxu3 %v3706_v38 }
 0x49a   :  { %v2711_v39 = vpop.permute.xlu0 %2710 }
 0x49b   :  { %3731 = vmatmul.msk.bf16.vlgmr.msra.gmra.mxu1 %vm894_vm2, %v2711_v39  ;;  %3732 = vmatmul.msk.bf16.vlgmr.msrb.gmra.mxu2 %vm894_vm2, %v2711_v39 }
 0x49c   :  { %3733 = vmatmul.msk.bf16.vlgmr.msrb.gmra.mxu3 %vm894_vm2, %v2711_v39 }
 0x4ab   :  { %3734 = vmatmul.msk.bf16.vlgmr.msrb.gmra.mxu1 %vm894_vm2, %v2711_v39  ;;  %3735 = vmatmul.msk.bf16.vlgmr.msra.gmra.mxu2 %vm894_vm2, %v2711_v39 }
 0x4ac   :  { %3736 = vmatmul.msk.bf16.vlgmr.msra.gmra.mxu3 %vm894_vm2, %v2711_v39 }
 0x4b3   :  { %v2679_v40 = vpop.f32.mrf.mxu3 }
 0x4b4   :  { %v2680_v13 = vadd.f32 %v3909_v7, %v2679_v40 }
 0x4bb   :  { %v2681_v41 = vpop.f32.mrf.mxu3 }
 0x518   :  { %v2784_v42 = vpop.f32.mrf.mxu1 }
 0x519   :  { %v2785_v52 = vadd.f32 %v2784_v42, %v2697_v49 }
 0x51e   :  { %v2797_v43 = vpop.f32.mrf.mxu2 }
 0x51f   :  { %v2810_v45 = vpop.f32.mrf.mxu3  ;;  %v2798_v50 = vadd.f32 %v2797_v43, %v2698_v48 }
 0x520   :  { %v2786_v47 = vpop.f32.mrf.mxu1  ;;  %v2811_v59 = vadd.f32 %v2810_v45, %v2699_v53 }
 0x521   :  { %v2853_v58 = vadd.f32 %v2798_v50, %v2785_v52 }
 0x523   :  { %v2854_v62 = vadd.f32 %v2853_v58, %v2811_v59 }
 0x526   :  { %v2799_v51 = vpop.f32.mrf.mxu2 }
 0x527   :  { %v2812_v54 = vpop.f32.mrf.mxu3 }
 0x528   :  { %v2823_v57 = vpop.f32.mrf.mxu1 }
 0x529   :  { %v2824_v60 = vadd.f32 %v2823_v57, %v2700_v55 }
 0x52b   :  { %v2855_v1 = vadd.f32 %v2854_v62, %v2824_v60 }
 0x52e   :  { %v2836_v0 = vpop.f32.mrf.mxu2 }
 0x52f   :  { %v2837_v2 = vadd.f32 %v2836_v0, %v2701_v61  ;;  %v2849_v3 = vpop.f32.mrf.mxu3 }
 0x530   :  { %v2825_v4 = vpop.f32.mrf.mxu1  ;;  %v2850_v9 = vadd.f32 %v2849_v3, %v2702_v63 }
 0x531   :  { %v2856_v8 = vadd.f32 %v2855_v1, %v2837_v2 }
 0x533   :  { %v2857_v10 = vadd.f32 %v2856_v8, %v2850_v9 }
 0x535   :  { %v2858_v14 = vmul.f32 0.16666667, %v2857_v10 }
 0x536   :  { %v2838_v16 = vpop.f32.mrf.mxu2 }
 0x537   :  { %v2859_v17 = vsub.f32 %v2680_v13, %v2858_v14  ;;  %v2851_v19 = vpop.f32.mrf.mxu3 }
 0x539   :  { %v2944_v20 = vadd.f32 %v2859_v17, %v2824_v60  ;;  %v2890_v21 = vadd.f32 %v2859_v17, %v2798_v50  ;;  %v2863_v15 = vadd.f32 %v2859_v17, %v2785_v52  ;;  %v2971_v25 = vadd.f32 %v2859_v17, %v2837_v2 }
 0x53a   :  { %v2917_v27 = vadd.f32 %v2859_v17, %v2811_v59  ;;  %v2998_v32 = vadd.f32 %v2859_v17, %v2850_v9 }
 0x53b   :  { %v2945_v23 = vsel %vm2862_vm4, %v2944_v20, -1e+30  ;;  %v2891_v12 = vsel %vm2862_vm4, %v2890_v21, -1e+30  ;;  %v2864_v30 = vsel %vm2862_vm4, %v2863_v15, -1e+30 }
 0x53c   :  { %v2946_v44 = vsel %vm617_vm0, %v2945_v23, -inf  ;;  %v2892_v24 = vsel %vm617_vm0, %v2891_v12, -inf  ;;  %v2865_v5 = vsel %vm617_vm0, %v2864_v30, -inf  ;;  %v2972_v26 = vsel %vm2862_vm4, %v2971_v25, -1e+30 }
 0x53d   :  { %2947 = vmax.xlane.f32.xlu2 %v2946_v44  ;;  %2893 = vmax.xlane.f32.xlu1 %v2892_v24  ;;  %v2918_v28 = vsel %vm2862_vm4, %v2917_v27, -1e+30  ;;  %v2973_v29 = vsel %vm617_vm0, %v2972_v26, -inf  ;;  %v2999_v33 = vsel %vm2862_vm4, %v2998_v32, -1e+30 }
 0x53e   :  { %2866 = vmax.xlane.f32.xlu0 %v2865_v5  ;;  %v2919_v31 = vsel %vm617_vm0, %v2918_v28, -inf  ;;  %v3000_v34 = vsel %vm617_vm0, %v2999_v33, -inf }
 0x545   :  { %2974 = vmax.xlane.f32.xlu2 %v2973_v29  ;;  %2920 = vmax.xlane.f32.xlu1 %v2919_v31 }
 0x54d   :  { %3001 = vmax.xlane.f32.xlu1 %v3000_v34 }
 0x5b0   :  { %v2948_v35 = vpop.xlane.xlu2 %2947  ;;  %v2894_v56 = vpop.xlane.xlu1 %2893 }
 0x5b1   :  { %v2895_v36 = vsub.f32 %v2891_v12, %v2894_v56  ;;  %v2867_v37 = vpop.xlane.xlu0 %2866  ;;  %v2949_v22 = vsub.f32 %v2945_v23, %v2948_v35 }
 0x5b2   :  { %v2868_v18 = vsub.f32 %v2864_v30, %v2867_v37 }
 0x5b3   :  { %v2896_v38 = vmul.f32 1.442695, %v2895_v36  ;;  %v2950_v40 = vmul.f32 1.442695, %v2949_v22 }
 0x5b4   :  { %v2869_v39 = vmul.f32 1.442695, %v2868_v18 }
 0x5b5   :  { %3910 = vpow2.f32 %v2896_v38 }
 0x5b6   :  { %3912 = vpow2.f32 %v2869_v39 }
 0x5b7   :  { %3914 = vpow2.f32 %v2950_v40 }
 0x5b8   :  { %v2921_v41 = vpop.xlane.xlu1 %2920  ;;  %v2975_v42 = vpop.xlane.xlu2 %2974 }
 0x5b9   :  { %v2922_v43 = vsub.f32 %v2918_v28, %v2921_v41  ;;  %v2976_v47 = vsub.f32 %v2972_v26, %v2975_v42 }
 0x5bb   :  { %v2923_v45 = vmul.f32 1.442695, %v2922_v43  ;;  %v4757_v46 = vpop.eup %3910  ;;  %v2977_v51 = vmul.f32 1.442695, %v2976_v47 }
 0x5bc   :  { %v4759_v48 = vpop.eup %3912  ;;  %v2898_v49 = vsel %vm617_vm0, %v4757_v46, 0.0 }
 0x5bd   :  { %3916 = vpow2.f32 %v2923_v45  ;;  %2899 = vadd.xlane.f32.xlu1 %v2898_v49  ;;  %v2871_v50 = vsel %vm617_vm0, %v4759_v48, 0.0  ;;  %v4765_v54 = vpop.eup %3914 }
 0x5be   :  { %2872 = vadd.xlane.f32.xlu2 %v2871_v50  ;;  %3918 = vpow2.f32 %v2977_v51  ;;  %v2952_v58 = vsel %vm617_vm0, %v4765_v54, 0.0 }
 0x5c0   :  { %v3002_v52 = vpop.xlane.xlu1 %3001 }
 0x5c1   :  { %v3003_v53 = vsub.f32 %v2999_v33, %v3002_v52 }
 0x5c3   :  { %v3004_v55 = vmul.f32 1.442695, %v3003_v53  ;;  %v4767_v57 = vpop.eup %3916 }
 0x5c4   :  { %v2925_v59 = vsel %vm617_vm0, %v4767_v57, 0.0  ;;  %v4773_v60 = vpop.eup %3918 }
 0x5c5   :  { %3920 = vpow2.f32 %v3004_v55  ;;  %2953 = vadd.xlane.f32.xlu1 %v2952_v58  ;;  %v2979_v63 = vsel %vm617_vm0, %v4773_v60, 0.0 }
 0x5c6   :  { %2926 = vadd.xlane.f32.xlu2 %v2925_v59 }
 0x5cb   :  { %v4775_v61 = vpop.eup %3920 }
 0x5cc   :  { %v3006_v62 = vsel %vm617_vm0, %v4775_v61, 0.0 }
 0x5cd   :  { %3007 = vadd.xlane.f32.xlu1 %v3006_v62 }
 0x5ce   :  { %2980 = vadd.xlane.f32.xlu2 %v2979_v63 }
 0x630   :  { %v2900_v0 = vpop.xlane.xlu1 %2899 }
 0x631   :  { %3922 = vrcp.f32 %v2900_v0  ;;  %v2873_v1 = vpop.xlane.xlu2 %2872  ;;  %v2912_v10 = vand.u32 2147483648, %v2900_v0  ;;  %v2910_v14 = vand.u32 2147483647, %v2900_v0  ;;  %vm2906_vm7 = vweird.f32 %v2900_v0 }
 0x632   :  { %3924 = vrcp.f32 %v2873_v1  ;;  %v2885_v16 = vand.u32 2147483648, %v2873_v1  ;;  %v2883_v19 = vand.u32 2147483647, %v2873_v1  ;;  %vm2879_vm9 = vweird.f32 %v2873_v1 }
 0x633   :  { %v2913_v15 = vor.u32 1.1754944e-38, %v2912_v10  ;;  %vm2911_vm10 = vcmp.eq.f32.partialorder %v2910_v14, 8.507059e+37 }
 0x634   :  { %v2886_v44 = vor.u32 1.1754944e-38, %v2885_v16  ;;  %vm2884_vm12 = vcmp.eq.f32.partialorder %v2883_v19, 8.507059e+37 }
 0x637   :  { %v3923_v2 = vpop.eup %3922 }
 0x638   :  { %v3925_v3 = vpop.eup %3924  ;;  %v2902_v4 = vmul.f32 %v3923_v2, %v2900_v0  ;;  %v2954_v6 = vpop.xlane.xlu1 %2953  ;;  %vm2907_vm5 = vweird.f32 %v3923_v2 }
 0x639   :  { %v2875_v7 = vmul.f32 %v3925_v3, %v2873_v1  ;;  %3926 = vrcp.f32 %v2954_v6  ;;  %v2927_v8 = vpop.xlane.xlu2 %2926  ;;  %vm2880_vm6 = vweird.f32 %v3925_v3  ;;  %vm2908_vm8 = vmor %vm2906_vm7, %vm2907_vm5  ;;  %v2964_v34 = vand.u32 2147483647, %v2954_v6 }
 0x63a   :  { %v2903_v9 = vsub.f32 1.0, %v2902_v4  ;;  %3928 = vrcp.f32 %v2927_v8  ;;  %vm2881_vm11 = vmor %vm2879_vm9, %vm2880_vm6  ;;  %v2966_v35 = vand.u32 2147483648, %v2954_v6  ;;  %v2939_v37 = vand.u32 2147483648, %v2927_v8 }
 0x63b   :  { %v2876_v11 = vsub.f32 1.0, %v2875_v7  ;;  %v2937_v38 = vand.u32 2147483647, %v2927_v8  ;;  %vm2960_vm15 = vweird.f32 %v2954_v6  ;;  %vm2933_vm1 = vweird.f32 %v2927_v8 }
 0x63c   :  { %v2904_v13 = vmul.f32 %v3923_v2, %v2903_v9  ;;  %v2967_v39 = vor.u32 1.1754944e-38, %v2966_v35  ;;  %vm2965_vm2 = vcmp.eq.f32.partialorder %v2964_v34, 8.507059e+37  ;;  %v2940_v43 = vor.u32 1.1754944e-38, %v2939_v37 }
 0x63d   :  { %v2877_v17 = vmul.f32 %v3925_v3, %v2876_v11  ;;  %vm2938_vm4 = vcmp.eq.f32.partialorder %v2937_v38, 8.507059e+37 }
 0x63e   :  { %v2905_v20 = vadd.f32 %v3923_v2, %v2904_v13 }
 0x63f   :  { %v3927_v21 = vpop.eup %3926  ;;  %v2878_v23 = vadd.f32 %v3925_v3, %v2877_v17 }
 0x640   :  { %v3929_v12 = vpop.eup %3928  ;;  %v2909_v30 = vsel %vm2908_vm8, %v3923_v2, %v2905_v20  ;;  %v2956_v24 = vmul.f32 %v3927_v21, %v2954_v6  ;;  %v3008_v5 = vpop.xlane.xlu1 %3007  ;;  %vm2961_vm13 = vweird.f32 %v3927_v21 }
 0x641   :  { %v2914_v25 = vsel %vm2911_vm10, %v2913_v15, %v2909_v30  ;;  %v2882_v27 = vsel %vm2881_vm11, %v3925_v3, %v2878_v23  ;;  %v2929_v26 = vmul.f32 %v3929_v12, %v2927_v8  ;;  %v4781_v28 = vpop.xlane.xlu2 %2980  ;;  %3930 = vrcp.f32 %v3008_v5  ;;  %vm2962_vm0 = vmor %vm2960_vm15, %vm2961_vm13 }
 0x642   :  { %v2915_v29 = vmul.f32 %v4757_v46, %v2914_v25  ;;  %v2887_v31 = vsel %vm2884_vm12, %v2886_v44, %v2882_v27  ;;  %v2957_v32 = vsub.f32 1.0, %v2956_v24  ;;  %3932 = vrcp.f32 %v4781_v28 }
 0x643   :  { %v2888_v33 = vmul.f32 %v4759_v48, %v2887_v31  ;;  %v2930_v56 = vsub.f32 1.0, %v2929_v26  ;;  %vm2934_vm14 = vweird.f32 %v3929_v12  ;;  %v3020_v55 = vand.u32 2147483648, %v3008_v5 }
 0x644   :  { %2916 = vst [vmem:[%s4823_s11 + $0x2] sm:$0x3] %v2915_v29  ;;  %v2958_v36 = vmul.f32 %v3927_v21, %v2957_v32  ;;  %vm2935_vm3 = vmor %vm2933_vm1, %vm2934_vm14  ;;  %v3018_v59 = vand.u32 2147483647, %v3008_v5  ;;  %vm3014_vm6 = vweird.f32 %v3008_v5  ;;  %v2991_v0 = vand.u32 2147483647, %v4781_v28 }
 0x645   :  { %2889 = vst [vmem:[%s4823_s11] sm:$0x3] %v2888_v33  ;;  %v2931_v18 = vmul.f32 %v3929_v12, %v2930_v56  ;;  %v3021_v1 = vor.u32 1.1754944e-38, %v3020_v55  ;;  %vm2987_vm10 = vweird.f32 %v4781_v28 }
 0x646   :  { %v2959_v22 = vadd.f32 %v3927_v21, %v2958_v36  ;;  %vm3019_vm9 = vcmp.eq.f32.partialorder %v3018_v59, 8.507059e+37  ;;  %vm2992_vm12 = vcmp.eq.f32.partialorder %v2991_v0, 8.507059e+37 }
 0x647   :  { %v2932_v40 = vadd.f32 %v3929_v12, %v2931_v18  ;;  %v3931_v41 = vpop.eup %3930 }
 0x648   :  { %v2963_v42 = vsel %vm2962_vm0, %v3927_v21, %v2959_v22  ;;  %v3010_v47 = vmul.f32 %v3931_v41, %v3008_v5  ;;  %v3933_v48 = vpop.eup %3932  ;;  %vm3015_vm5 = vweird.f32 %v3931_v41 }
 0x649   :  { %v2968_v45 = vsel %vm2965_vm2, %v2967_v39, %v2963_v42  ;;  %v2936_v46 = vsel %vm2935_vm3, %v3929_v12, %v2932_v40  ;;  %v2983_v53 = vmul.f32 %v3933_v48, %v4781_v28  ;;  %vm2988_vm7 = vweird.f32 %v3933_v48  ;;  %vm3016_vm8 = vmor %vm3014_vm6, %vm3015_vm5 }
 0x64a   :  { %v2969_v49 = vmul.f32 %v4765_v54, %v2968_v45  ;;  %v2941_v50 = vsel %vm2938_vm4, %v2940_v43, %v2936_v46  ;;  %v3011_v52 = vsub.f32 1.0, %v3010_v47  ;;  %v2993_v54 = vand.u32 2147483648, %v4781_v28  ;;  %vm2989_vm11 = vmor %vm2987_vm10, %vm2988_vm7 }
 0x64b   :  { %v2942_v51 = vmul.f32 %v4767_v57, %v2941_v50  ;;  %v2984_v62 = vsub.f32 1.0, %v2983_v53 }
 0x64c   :  { %2970 = vst [vmem:[%s4823_s11 + $0x6] sm:$0x3] %v2969_v49  ;;  %v3012_v58 = vmul.f32 %v3931_v41, %v3011_v52  ;;  %v2994_v6 = vor.u32 1.1754944e-38, %v2993_v54 }
 0x64d   :  { %2943 = vst [vmem:[%s4823_s11 + $0x4] sm:$0x3] %v2942_v51  ;;  %v2985_v63 = vmul.f32 %v3933_v48, %v2984_v62 }
 0x64e   :  { %v3013_v57 = vadd.f32 %v3931_v41, %v3012_v58 }
 0x64f   :  { %v2986_v3 = vadd.f32 %v3933_v48, %v2985_v63 }
 0x650   :  { %v3017_v2 = vsel %vm3016_vm8, %v3931_v41, %v3013_v57 }
 0x651   :  { %v3022_v4 = vsel %vm3019_vm9, %v3021_v1, %v3017_v2  ;;  %v2990_v8 = vsel %vm2989_vm11, %v3933_v48, %v2986_v3 }
 0x652   :  { %v3023_v7 = vmul.f32 %v4775_v61, %v3022_v4  ;;  %v2995_v9 = vsel %vm2992_vm12, %v2994_v6, %v2990_v8 }
 0x653   :  { %v2996_v10 = vmul.f32 %v4773_v60, %v2995_v9 }
 0x654   :  { %3024 = vst [vmem:[%s4823_s11 + $0xa] sm:$0x3] %v3023_v7 }
 0x655   :  { %2997 = vst [vmem:[%s4823_s11 + $0x8] sm:$0x3] %v2996_v10 }
 0x656   :  { %3029 = vsyncmov [#allocation6] }
 0x659   :  { %s3030_s1 = vpop.sfrf %3029 }
 0x65a   :  { %p3737_p0 = scmp.ne.s32.totalorder %s3030_s1, 0 }
 0x65c   :  { %3034 = shalt.err (%p3737_p0)  }
 0x65d   :  { %3036 = vsyncmov [#allocation6 + $0x1] }
 0x660   :  { %s3037_s2 = vpop.sfrf %3036 }
 0x661   :  { %p3738_p1 = scmp.ne.s32.totalorder %s3037_s2, 0 }
 0x663   :  { %3041 = shalt.err (%p3738_p1)  }
 0x664   :  { %3043 = vsyncmov [#allocation6 + $0x2] }
 0x667   :  { %s3044_s16 = vpop.sfrf %3043 }
 0x668   :  { %p3739_p2 = scmp.ne.s32.totalorder %s3044_s16, 0 }
 0x66a   :  { %3048 = shalt.err (%p3739_p2)  }

</bundles_post_ra>
